<compile_context>
chip_gen: v7x
topology: tpu7x:2x2x1
jax: 0.10.0
libtpu: 0.0.40
codegen_flags: <defaults>
</compile_context>

<pallas_src>
import functools

import jax
import jax.numpy as jnp
from jax import lax
from jax.experimental import pallas as pl
from jax.experimental.pallas import tpu as pltpu

_EPS = 1e-5


# ----------------------------------------------------------------------------
# Pallas kernel 1: implicit-GEMM 3D conv (stride 1) with fused residual add
#   (optionally with per-channel affine+ReLU on the residual = fused BN),
#   fused per-channel BatchNorm statistics, and optional pre-padded output.
# ----------------------------------------------------------------------------
def _conv_kernel(*refs, KD, KH, KW, OH, OW, has_res, res_interior,
                 res_affine, emit_stats, pad_out, mxu_dtype):
    # refs = x_refs[0..KD-1], w, b, [res], [res_scale, res_shift], y, [stats]
    x_refs = refs[:KD]
    w_ref = refs[KD]
    b_ref = refs[KD + 1]
    idx = KD + 2
    res_ref = rs_ref = rt_ref = None
    if has_res:
        res_ref = refs[idx]
        idx += 1
        if res_affine:
            rs_ref = refs[idx]
            rt_ref = refs[idx + 1]
            idx += 2
    y_ref = refs[idx]
    idx += 1
    stats_ref = refs[idx] if emit_stats else None

    cin = w_ref.shape[3]
    cout = w_ref.shape[4]

    def compute():
        acc = jnp.zeros((OH * OW, cout), jnp.float32) + b_ref[...]
        for kd in range(KD):
            xk = x_refs[kd][0, 0].astype(mxu_dtype)       # (Hp, Wp, Cin)
            for kh in range(KH):
                for kw in range(KW):
                    a = xk[kh:kh + OH, kw:kw + OW, :].reshape(OH * OW, cin)
                    acc = acc + jnp.dot(a, w_ref[kd, kh, kw],
                                        preferred_element_type=jnp.float32)
        if has_res:
            r_full = res_ref[...]
            if res_interior:
                r = r_full[0, 0, 1:1 + OH, 1:1 + OW, :]
            else:
                r = r_full[0, 0]
            r = r.reshape(OH * OW, cout).astype(jnp.float32)
            if res_affine:                                  # fused BN + ReLU
                r = jnp.maximum(r * rs_ref[...] + rt_ref[...], 0.0)
            acc = acc + r

        if pad_out:
            y3 = acc.reshape(OH, OW, cout)
            zw = jnp.zeros((OH, 1, cout), jnp.float32)
            y3 = jnp.concatenate([zw, y3, zw], axis=1)
            zh = jnp.zeros((1, OW + 2, cout), jnp.float32)
            y3 = jnp.concatenate([zh, y3, zh], axis=0)
            y_ref[...] = y3.reshape(y_ref.shape).astype(y_ref.dtype)
        else:
            y_ref[...] = acc.reshape(y_ref.shape).astype(y_ref.dtype)

        if emit_stats:
            s = jnp.sum(acc, axis=0, keepdims=True)
            q = jnp.sum(acc * acc, axis=0, keepdims=True)
            pad0 = jnp.zeros((6, cout), jnp.float32)
            stats_ref[...] = jnp.concatenate([s, q, pad0],
                                             axis=0).reshape(stats_ref.shape)

    if pad_out:
        d = pl.program_id(1)
        border = jnp.logical_or(d == 0, d == pl.num_programs(1) - 1)

        @pl.when(border)
        def _():
            y_ref[...] = jnp.zeros_like(y_ref)
            if emit_stats:
                stats_ref[...] = jnp.zeros_like(stats_ref)

        @pl.when(jnp.logical_not(border))
        def _():
            compute()
    else:
        compute()


def conv3d_ndhwc(x, w, b, *, pad=((1, 1), (1, 1), (1, 1)), x_prepadded=False,
                 pad_output=False, residual=None, residual_prepadded=False,
                 res_affine=None, emit_stats=False):
    """3D cross-correlation (== nn.Conv3d, stride 1) on NDHWC data.

    Implicit GEMM: weight fully resident in VMEM, grid over (batch, out-depth),
    taps accumulated on the MXU with f32 accumulation.  Optional fusions:
      residual add (optionally affine+ReLU'd == a folded BatchNorm),
      per-channel (sum, sum_sq) emission for a following BN,
      zero-halo ("pre-padded") output so the next conv needs no jnp.pad pass.
    """
    KD, KH, KW, Cin, Cout = w.shape
    if x_prepadded:
        xp = x
    else:
        xp = jnp.pad(x, ((0, 0), pad[0], pad[1], pad[2], (0, 0)))
    N, Dp, Hp, Wp, _ = xp.shape
    OD, OH, OW = Dp - KD + 1, Hp - KH + 1, Wp - KW + 1
    po = 1 if pad_output else 0
    ND = OD + 2 * po

    # bf16 MXU operands (f32 accumulation) once the contraction is large
    # enough to matter; cast happens in-kernel so no extra HBM pass.
    mxu_dtype = jnp.bfloat16 if min(Cin, Cout) >= 64 else jnp.float32
    wc = w.astype(mxu_dtype)
    b2 = b.reshape(1, Cout).astype(jnp.float32)

    def x_map(kd):
        return lambda n, d, _k=kd: (n, jnp.clip(d - po + _k, 0, Dp - 1),
                                    0, 0, 0)

    x_specs = [pl.BlockSpec((1, 1, Hp, Wp, Cin), x_map(kd)) for kd in range(KD)]
    w_spec = pl.BlockSpec((KD, KH, KW, Cin, Cout), lambda n, d: (0, 0, 0, 0, 0))
    v_spec = pl.BlockSpec((1, Cout), lambda n, d: (0, 0))

    in_specs = x_specs + [w_spec, v_spec]
    inputs = [xp] * KD + [wc, b2]

    has_res = residual is not None
    use_affine = res_affine is not None
    if has_res:
        if residual_prepadded:
            rH, rW = OH + 2, OW + 2
            r_map = lambda n, d: (n, jnp.clip(d - po + 1, 0, OD + 1), 0, 0, 0)
        else:
            rH, rW = OH, OW
            r_map = lambda n, d: (n, jnp.clip(d - po, 0, OD - 1), 0, 0, 0)
        in_specs.append(pl.BlockSpec((1, 1, rH, rW, Cout), r_map))
        inputs.append(residual)
        if use_affine:
            rs, rt = res_affine
            in_specs += [v_spec, v_spec]
            inputs += [rs.reshape(1, Cout).astype(jnp.float32),
                       rt.reshape(1, Cout).astype(jnp.float32)]

    y_shape = jax.ShapeDtypeStruct((N, ND, OH + 2 * po, OW + 2 * po, Cout),
                                   jnp.float32)
    y_spec = pl.BlockSpec((1, 1, OH + 2 * po, OW + 2 * po, Cout),
                          lambda n, d: (n, d, 0, 0, 0))
    if emit_stats:
        out_shape = (y_shape,
                     jax.ShapeDtypeStruct((N, ND, 8, Cout), jnp.float32))
        out_specs = [y_spec,
                     pl.BlockSpec((1, 1, 8, Cout), lambda n, d: (n, d, 0, 0))]
    else:
        out_shape = y_shape
        out_specs = y_spec

    kern = functools.partial(_conv_kernel, KD=KD, KH=KH, KW=KW, OH=OH, OW=OW,
                             has_res=has_res, res_interior=residual_prepadded,
                             res_affine=use_affine, emit_stats=emit_stats,
                             pad_out=pad_output, mxu_dtype=mxu_dtype)

    out = pl.pallas_call(
        kern,
        out_shape=out_shape,
        grid_spec=pltpu.PrefetchScalarGridSpec(
            num_scalar_prefetch=0,
            grid=(N, ND),
            in_specs=in_specs,
            out_specs=out_specs),
        compiler_params=pltpu.CompilerParams(
            dimension_semantics=("parallel", "parallel")),
    )(*inputs)

    if emit_stats:
        y, st = out
        return (y,
                jnp.sum(st[:, :, 0, :], axis=(0, 1)),
                jnp.sum(st[:, :, 1, :], axis=(0, 1)))
    return out


# ----------------------------------------------------------------------------
# Pallas kernel 2: BatchNorm affine apply + ReLU (single elementwise pass)
# ----------------------------------------------------------------------------
def _bn_relu_kernel(x_ref, s_ref, t_ref, o_ref):
    o_ref[...] = jnp.maximum(x_ref[...] * s_ref[...] + t_ref[...], 0.0)


def bn_relu_apply(x, scale, shift):
    """y = relu(x * scale + shift), per-channel scale/shift, NDHWC."""
    N, D, H, W, C = x.shape
    s2 = scale.reshape(1, C).astype(jnp.float32)
    t2 = shift.reshape(1, C).astype(jnp.float32)
    blk = pl.BlockSpec((1, 1, H, W, C), lambda n, d: (n, d, 0, 0, 0))
    vec = pl.BlockSpec((1, C), lambda n, d: (0, 0))
    return pl.pallas_call(
        _bn_relu_kernel,
        out_shape=jax.ShapeDtypeStruct(x.shape, jnp.float32),
        grid_spec=pltpu.PrefetchScalarGridSpec(
            num_scalar_prefetch=0, grid=(N, D),
            in_specs=[blk, vec, vec], out_specs=blk),
        compiler_params=pltpu.CompilerParams(
            dimension_semantics=("parallel", "parallel")),
    )(x, s2, t2)


def _bn_scale_shift(gamma, beta, tot_sum, tot_sq, count):
    mean = tot_sum / count
    var = tot_sq / count - mean * mean            # biased var, PyTorch train BN
    scale = gamma * lax.rsqrt(var + _EPS)
    shift = beta - mean * scale
    return scale, shift


# ----------------------------------------------------------------------------
# deconv3d_x3 forward
# ----------------------------------------------------------------------------
def deconv3d_x3_forward(params, lhs_ncdhw, rhs_ncdhw):
    # TODO(synk): NCDHW<->NDHWC layout transposes remain plain-JAX glue.
    lhs = jnp.transpose(lhs_ncdhw, (0, 2, 3, 4, 1)).astype(jnp.float32)
    rhs = jnp.transpose(rhs_ncdhw, (0, 2, 3, 4, 1)).astype(jnp.float32)

    # ---- up = ConvTranspose3d(k=3, s=2, p=0), phase decomposed (8 small
    #      stride-1 convs), with fused per-phase BN statistics.
    wt, bt = params['up']['w'], params['up']['b']   # wt: (Cin, Cout, 3, 3, 3)
    N, Dr, Hr, Wr, _ = rhs.shape
    Cout = wt.shape[1]
    OD, OH, OW = 2 * Dr + 1, 2 * Hr + 1, 2 * Wr + 1

    tot_s = jnp.zeros((Cout,), jnp.float32)
    tot_q = jnp.zeros((Cout,), jnp.float32)
    phases = {}
    # For output phase p along an axis: even phase uses taps [w[2], w[0]] on a
    # (1,1)-padded input, odd phase uses tap [w[1]] unpadded.
    for pd in (0, 1):
        for ph in (0, 1):
            for pw in (0, 1):
                dmap = (2, 0) if pd == 0 else (1,)
                hmap = (2, 0) if ph == 0 else (1,)
                wmap = (2, 0) if pw == 0 else (1,)
                wsub = jnp.stack([jnp.stack([jnp.stack(
                    [wt[:, :, kd, kh, kw] for kw in wmap], 0)
                    for kh in hmap], 0) for kd in dmap], 0)
                pad = (((1, 1) if pd == 0 else (0, 0)),
                       ((1, 1) if ph == 0 else (0, 0)),
                       ((1, 1) if pw == 0 else (0, 0)))
                yph, s, q = conv3d_ndhwc(rhs, wsub, bt, pad=pad,
                                         emit_stats=True)
                # zero-pad odd phases up to the even-phase extent so a single
                # stack/transpose/reshape interleave works (extra rows land at
                # positions that are sliced away below).
                phases[(pd, ph, pw)] = jnp.pad(
                    yph, ((0, 0), (0, pd), (0, ph), (0, pw), (0, 0)))
                tot_s = tot_s + s
                tot_q = tot_q + q

    # TODO(synk): the sub-pixel interleave is one plain-JAX transpose+reshape
    #             pass (replaces the previous 8 strided-scatter passes).
    stk = jnp.stack([jnp.stack([jnp.stack(
        [phases[(pd, ph, pw)] for pw in (0, 1)], 0)
        for ph in (0, 1)], 0) for pd in (0, 1)], 0)
    # (2,2,2, N, Dr+1, Hr+1, Wr+1, C) -> (N, 2Dr+2, 2Hr+2, 2Wr+2, C)
    big = jnp.transpose(stk, (3, 4, 0, 5, 1, 6, 2, 7)).reshape(
        N, 2 * (Dr + 1), 2 * (Hr + 1), 2 * (Wr + 1), Cout)

    scale_up, shift_up = _bn_scale_shift(params['up']['bn']['gamma'],
                                         params['up']['bn']['beta'],
                                         tot_s, tot_q,
                                         float(N * OD * OH * OW))

    # ---- lhs_conv (3x3x3, pad 1); the cropped up output is fused in as a
    #      residual with its BN+ReLU folded into the conv epilogue.
    Dl, Hl, Wl = lhs.shape[1], lhs.shape[2], lhs.shape[3]
    od, oh, ow = (OD - Dl) // 2, (OH - Hl) // 2, (OW - Wl) // 2
    up_crop = big[:, od:od + Dl, oh:oh + Hl, ow:ow + Wl, :]

    rhs_add_p = conv3d_ndhwc(lhs, params['lhs_conv']['w'],
                             params['lhs_conv']['b'],
                             residual=up_crop,
                             res_affine=(scale_up, shift_up),
                             pad_output=True)

    # ---- conv_x3: zz = conv_1(x) + conv_3(conv_2(conv_1(x))); ReLU(BN(zz)).
    #      Intermediates are produced pre-padded -> no jnp.pad copy passes.
    z1_p = conv3d_ndhwc(rhs_add_p, params['conv1']['w'], params['conv1']['b'],
                        x_prepadded=True, pad_output=True)
    z2_p = conv3d_ndhwc(z1_p, params['conv2']['w'], params['conv2']['b'],
                        x_prepadded=True, pad_output=True)
    zz, s, q = conv3d_ndhwc(z2_p, params['conv3']['w'], params['conv3']['b'],
                            x_prepadded=True, residual=z1_p,
                            residual_prepadded=True, emit_stats=True)
    cnt = float(zz.shape[0] * zz.shape[1] * zz.shape[2] * zz.shape[3])
    scale, shift = _bn_scale_shift(params['bn_x3']['gamma'],
                                   params['bn_x3']['beta'], s, q, cnt)
    out = bn_relu_apply(zz, scale, shift)
    # TODO(synk): very large H*W*C feature maps would additionally need an
    #             H-tiling (halo) grid axis; one (H, W, C) slab per step here.
    return jnp.transpose(out, (0, 4, 1, 2, 3))      # -> NCDHW


# ----------------------------------------------------------------------------
# Deterministic synthetic parameters (PyTorch-equivalent shapes).
# Note: loading real PyTorch weights would need layout transposes
# (Conv3d: (Cout,Cin,KD,KH,KW) -> (KD,KH,KW,Cin,Cout); ConvTranspose3d kept
#  as-is in (Cin,Cout,KD,KH,KW)).
# ----------------------------------------------------------------------------
def init_params(key, in_channels, out_channels):
    keys = iter(jax.random.split(key, 16))

    def conv_p(kd, kh, kw, cin, cout):
        w = jax.random.normal(next(keys), (kd, kh, kw, cin, cout),
                              jnp.float32) / jnp.sqrt(kd * kh * kw * cin)
        b = 0.05 * jax.random.normal(next(keys), (cout,), jnp.float32)
        return {'w': w, 'b': b}

    def bn_p(c):
        g = 1.0 + 0.1 * jax.random.normal(next(keys), (c,), jnp.float32)
        be = 0.1 * jax.random.normal(next(keys), (c,), jnp.float32)
        return {'gamma': g, 'beta': be}

    up_w = jax.random.normal(next(keys), (in_channels, out_channels, 3, 3, 3),
                             jnp.float32) / jnp.sqrt(in_channels * 27.0)
    up_b = 0.05 * jax.random.normal(next(keys), (out_channels,), jnp.float32)
    return {
        'up': {'w': up_w, 'b': up_b, 'bn': bn_p(out_channels)},
        'lhs_conv': conv_p(3, 3, 3, out_channels // 2, out_channels),
        'conv1': conv_p(3, 3, 3, out_channels, out_channels),
        'conv2': conv_p(3, 3, 3, out_channels, out_channels),
        'conv3': conv_p(3, 3, 3, out_channels, out_channels),
        'bn_x3': bn_p(out_channels),
    }


# ----------------------------------------------------------------------------
# Pure-JAX reference (same train-mode BN semantics) for a correctness check.
# ----------------------------------------------------------------------------
def _ref_forward(params, lhs, rhs):
    dn = ('NDHWC', 'DHWIO', 'NDHWC')

    def conv(x, cp):
        y = lax.conv_general_dilated(x, cp['w'], (1, 1, 1), [(1, 1)] * 3,
                                     dimension_numbers=dn)
        return y + cp['b']

    def bn_relu(x, bp):
        mean = jnp.mean(x, axis=(0, 1, 2, 3))
        var = jnp.var(x, axis=(0, 1, 2, 3))
        y = (x - mean) * lax.rsqrt(var + _EPS) * bp['gamma'] + bp['beta']
        return jnp.maximum(y, 0.0)

    wt = params['up']['w']
    wflip = jnp.transpose(jnp.flip(wt, axis=(2, 3, 4)), (2, 3, 4, 0, 1))
    up = lax.conv_general_dilated(rhs, wflip, (1, 1, 1), [(2, 2)] * 3,
                                  lhs_dilation=(2, 2, 2),
                                  dimension_numbers=dn)
    up = bn_relu(up + params['up']['b'], params['up']['bn'])

    lhs_c = conv(lhs, params['lhs_conv'])
    Dl, Hl, Wl = lhs_c.shape[1:4]
    Du, Hu, Wu = up.shape[1:4]
    od, oh, ow = (Du - Dl) // 2, (Hu - Hl) // 2, (Wu - Wl) // 2
    x = up[:, od:od + Dl, oh:oh + Hl, ow:ow + Wl, :] + lhs_c

    z1 = conv(x, params['conv1'])
    z3 = conv(conv(z1, params['conv2']), params['conv3'])
    return bn_relu(z1 + z3, params['bn_x3'])


if __name__ == "__main__":
    key = jax.random.PRNGKey(0)
    kp, kl, kr = jax.random.split(key, 3)

    in_ch, out_ch = 8, 8
    params = init_params(kp, in_ch, out_ch)

    # lhs has out_channels//2 channels (per the module); rhs is the coarser map
    # whose 2x upsample ((D-1)*2+3 = 17) is center-cropped to lhs' 16^3.
    lhs = jax.random.normal(kl, (2, out_ch // 2, 16, 16, 16), jnp.float32)
    rhs = jax.random.normal(kr, (2, in_ch, 8, 8, 8), jnp.float32)

    out = deconv3d_x3_forward(params, lhs, rhs)
    out = jax.block_until_ready(out)

    assert out.shape == (2, out_ch, 16, 16, 16), out.shape
    assert bool(jnp.all(jnp.isfinite(out)))
    assert bool(jnp.all(out >= 0.0))       # ReLU output

    # Reference check (tolerance covers default TPU matmul precision).
    ref = _ref_forward(params,
                       jnp.transpose(lhs, (0, 2, 3, 4, 1)),
                       jnp.transpose(rhs, (0, 2, 3, 4, 1)))
    ref = jnp.transpose(ref, (0, 4, 1, 2, 3))
    max_err = float(jnp.max(jnp.abs(out - ref)))
    assert max_err < 5e-2, max_err

    print("KERNEL_OK")
</pallas_src>

<mosaic_0001>
module attributes {stable_mosaic.version = 11 : i64} {
  func.func @_conv_kernel(%arg0: i32, %arg1: i32, %arg2: memref<1x1x10x10x8xf32, #tpu.memory_space<vmem>>, %arg3: memref<1x1x10x10x8xf32, #tpu.memory_space<vmem>>, %arg4: memref<2x2x2x8x8xf32, #tpu.memory_space<vmem>>, %arg5: memref<1x8xf32, #tpu.memory_space<vmem>>, %arg6: memref<1x1x9x9x8xf32, #tpu.memory_space<vmem>>, %arg7: memref<1x1x8x8xf32, #tpu.memory_space<vmem>>) attributes {dimension_semantics = [#tpu.dimension_semantics<parallel>, #tpu.dimension_semantics<parallel>], iteration_bounds = array<i64: 2, 9>, scalar_prefetch = 0 : i64, scratch_operands = 0 : i64, tpu.core_type = #tpu.core_type<tc>, window_params = [{transform_indices = @transform_0, window_bounds = array<i64: 1, 1, 10, 10, 8>}, {transform_indices = @transform_1, window_bounds = array<i64: 1, 1, 10, 10, 8>}, {pipeline_mode = #tpu.pipeline_mode<synchronous>, transform_indices = @transform_2, window_bounds = array<i64: 2, 2, 2, 8, 8>}, {pipeline_mode = #tpu.pipeline_mode<synchronous>, transform_indices = @transform_3, window_bounds = array<i64: 1, 8>}, {transform_indices = @transform_4, window_bounds = array<i64: 1, 1, 9, 9, 8>}, {transform_indices = @transform_5, window_bounds = array<i64: 1, 1, 8, 8>}]} {
    %cst = arith.constant 0.000000e+00 : f32
    %0 = vector.broadcast %cst : f32 to vector<81x8xf32>
    %c0 = arith.constant 0 : index
    %c0_0 = arith.constant 0 : index
    %1 = vector.load %arg5[%c0, %c0_0] : memref<1x8xf32, #tpu.memory_space<vmem>>, vector<1x8xf32>
    %2 = vector.broadcast %1 : vector<1x8xf32> to vector<81x8xf32>
    %3 = arith.addf %0, %2 : vector<81x8xf32>
    %c0_1 = arith.constant 0 : index
    %c0_2 = arith.constant 0 : index
    %c0_3 = arith.constant 0 : index
    %c0_4 = arith.constant 0 : index
    %c0_5 = arith.constant 0 : index
    %4 = vector.load %arg2[%c0_1, %c0_2, %c0_3, %c0_4, %c0_5] : memref<1x1x10x10x8xf32, #tpu.memory_space<vmem>>, vector<1x1x10x10x8xf32>
    %5 = vector.shape_cast %4 : vector<1x1x10x10x8xf32> to vector<10x10x8xf32>
    %6 = vector.extract_strided_slice %5 {offsets = [0, 0, 0], sizes = [9, 9, 8], strides = [1, 1, 1]} : vector<10x10x8xf32> to vector<9x9x8xf32>
    %7 = vector.shape_cast %6 : vector<9x9x8xf32> to vector<81x8xf32>
    %c0_6 = arith.constant 0 : index
    %c0_7 = arith.constant 0 : index
    %c0_8 = arith.constant 0 : index
    %c0_9 = arith.constant 0 : index
    %c0_10 = arith.constant 0 : index
    %8 = vector.load %arg4[%c0_6, %c0_7, %c0_8, %c0_9, %c0_10] : memref<2x2x2x8x8xf32, #tpu.memory_space<vmem>>, vector<1x1x1x8x8xf32>
    %9 = vector.shape_cast %8 : vector<1x1x1x8x8xf32> to vector<8x8xf32>
    %cst_11 = arith.constant dense<0.000000e+00> : vector<81x8xf32>
    %10 = tpu.matmul %7, %9, %cst_11 {dimension_numbers = #tpu.dot_dimension_numbers<[1], [0], [0], [1], [0, 0, 1, 1], [], []>} : vector<81x8xf32>, vector<8x8xf32>, vector<81x8xf32> -> vector<81x8xf32>
    %11 = arith.addf %3, %10 : vector<81x8xf32>
    %12 = vector.extract_strided_slice %5 {offsets = [0, 1, 0], sizes = [9, 9, 8], strides = [1, 1, 1]} : vector<10x10x8xf32> to vector<9x9x8xf32>
    %13 = vector.shape_cast %12 : vector<9x9x8xf32> to vector<81x8xf32>
    %c0_12 = arith.constant 0 : index
    %c0_13 = arith.constant 0 : index
    %c1 = arith.constant 1 : index
    %c0_14 = arith.constant 0 : index
    %c0_15 = arith.constant 0 : index
    %14 = vector.load %arg4[%c0_12, %c0_13, %c1, %c0_14, %c0_15] : memref<2x2x2x8x8xf32, #tpu.memory_space<vmem>>, vector<1x1x1x8x8xf32>
    %15 = vector.shape_cast %14 : vector<1x1x1x8x8xf32> to vector<8x8xf32>
    %cst_16 = arith.constant dense<0.000000e+00> : vector<81x8xf32>
    %16 = tpu.matmul %13, %15, %cst_16 {dimension_numbers = #tpu.dot_dimension_numbers<[1], [0], [0], [1], [0, 0, 1, 1], [], []>} : vector<81x8xf32>, vector<8x8xf32>, vector<81x8xf32> -> vector<81x8xf32>
    %17 = arith.addf %11, %16 : vector<81x8xf32>
    %18 = vector.extract_strided_slice %5 {offsets = [1, 0, 0], sizes = [9, 9, 8], strides = [1, 1, 1]} : vector<10x10x8xf32> to vector<9x9x8xf32>
    %19 = vector.shape_cast %18 : vector<9x9x8xf32> to vector<81x8xf32>
    %c0_17 = arith.constant 0 : index
    %c1_18 = arith.constant 1 : index
    %c0_19 = arith.constant 0 : index
    %c0_20 = arith.constant 0 : index
    %c0_21 = arith.constant 0 : index
    %20 = vector.load %arg4[%c0_17, %c1_18, %c0_19, %c0_20, %c0_21] : memref<2x2x2x8x8xf32, #tpu.memory_space<vmem>>, vector<1x1x1x8x8xf32>
    %21 = vector.shape_cast %20 : vector<1x1x1x8x8xf32> to vector<8x8xf32>
    %cst_22 = arith.constant dense<0.000000e+00> : vector<81x8xf32>
    %22 = tpu.matmul %19, %21, %cst_22 {dimension_numbers = #tpu.dot_dimension_numbers<[1], [0], [0], [1], [0, 0, 1, 1], [], []>} : vector<81x8xf32>, vector<8x8xf32>, vector<81x8xf32> -> vector<81x8xf32>
    %23 = arith.addf %17, %22 : vector<81x8xf32>
    %24 = vector.extract_strided_slice %5 {offsets = [1, 1, 0], sizes = [9, 9, 8], strides = [1, 1, 1]} : vector<10x10x8xf32> to vector<9x9x8xf32>
    %25 = vector.shape_cast %24 : vector<9x9x8xf32> to vector<81x8xf32>
    %c0_23 = arith.constant 0 : index
    %c1_24 = arith.constant 1 : index
    %c1_25 = arith.constant 1 : index
    %c0_26 = arith.constant 0 : index
    %c0_27 = arith.constant 0 : index
    %26 = vector.load %arg4[%c0_23, %c1_24, %c1_25, %c0_26, %c0_27] : memref<2x2x2x8x8xf32, #tpu.memory_space<vmem>>, vector<1x1x1x8x8xf32>
    %27 = vector.shape_cast %26 : vector<1x1x1x8x8xf32> to vector<8x8xf32>
    %cst_28 = arith.constant dense<0.000000e+00> : vector<81x8xf32>
    %28 = tpu.matmul %25, %27, %cst_28 {dimension_numbers = #tpu.dot_dimension_numbers<[1], [0], [0], [1], [0, 0, 1, 1], [], []>} : vector<81x8xf32>, vector<8x8xf32>, vector<81x8xf32> -> vector<81x8xf32>
    %29 = arith.addf %23, %28 : vector<81x8xf32>
    %c0_29 = arith.constant 0 : index
    %c0_30 = arith.constant 0 : index
    %c0_31 = arith.constant 0 : index
    %c0_32 = arith.constant 0 : index
    %c0_33 = arith.constant 0 : index
    %30 = vector.load %arg3[%c0_29, %c0_30, %c0_31, %c0_32, %c0_33] : memref<1x1x10x10x8xf32, #tpu.memory_space<vmem>>, vector<1x1x10x10x8xf32>
    %31 = vector.shape_cast %30 : vector<1x1x10x10x8xf32> to vector<10x10x8xf32>
    %32 = vector.extract_strided_slice %31 {offsets = [0, 0, 0], sizes = [9, 9, 8], strides = [1, 1, 1]} : vector<10x10x8xf32> to vector<9x9x8xf32>
    %33 = vector.shape_cast %32 : vector<9x9x8xf32> to vector<81x8xf32>
    %c1_34 = arith.constant 1 : index
    %c0_35 = arith.constant 0 : index
    %c0_36 = arith.constant 0 : index
    %c0_37 = arith.constant 0 : index
    %c0_38 = arith.constant 0 : index
    %34 = vector.load %arg4[%c1_34, %c0_35, %c0_36, %c0_37, %c0_38] : memref<2x2x2x8x8xf32, #tpu.memory_space<vmem>>, vector<1x1x1x8x8xf32>
    %35 = vector.shape_cast %34 : vector<1x1x1x8x8xf32> to vector<8x8xf32>
    %cst_39 = arith.constant dense<0.000000e+00> : vector<81x8xf32>
    %36 = tpu.matmul %33, %35, %cst_39 {dimension_numbers = #tpu.dot_dimension_numbers<[1], [0], [0], [1], [0, 0, 1, 1], [], []>} : vector<81x8xf32>, vector<8x8xf32>, vector<81x8xf32> -> vector<81x8xf32>
    %37 = arith.addf %29, %36 : vector<81x8xf32>
    %38 = vector.extract_strided_slice %31 {offsets = [0, 1, 0], sizes = [9, 9, 8], strides = [1, 1, 1]} : vector<10x10x8xf32> to vector<9x9x8xf32>
    %39 = vector.shape_cast %38 : vector<9x9x8xf32> to vector<81x8xf32>
    %c1_40 = arith.constant 1 : index
    %c0_41 = arith.constant 0 : index
    %c1_42 = arith.constant 1 : index
    %c0_43 = arith.constant 0 : index
    %c0_44 = arith.constant 0 : index
    %40 = vector.load %arg4[%c1_40, %c0_41, %c1_42, %c0_43, %c0_44] : memref<2x2x2x8x8xf32, #tpu.memory_space<vmem>>, vector<1x1x1x8x8xf32>
    %41 = vector.shape_cast %40 : vector<1x1x1x8x8xf32> to vector<8x8xf32>
    %cst_45 = arith.constant dense<0.000000e+00> : vector<81x8xf32>
    %42 = tpu.matmul %39, %41, %cst_45 {dimension_numbers = #tpu.dot_dimension_numbers<[1], [0], [0], [1], [0, 0, 1, 1], [], []>} : vector<81x8xf32>, vector<8x8xf32>, vector<81x8xf32> -> vector<81x8xf32>
    %43 = arith.addf %37, %42 : vector<81x8xf32>
    %44 = vector.extract_strided_slice %31 {offsets = [1, 0, 0], sizes = [9, 9, 8], strides = [1, 1, 1]} : vector<10x10x8xf32> to vector<9x9x8xf32>
    %45 = vector.shape_cast %44 : vector<9x9x8xf32> to vector<81x8xf32>
    %c1_46 = arith.constant 1 : index
    %c1_47 = arith.constant 1 : index
    %c0_48 = arith.constant 0 : index
    %c0_49 = arith.constant 0 : index
    %c0_50 = arith.constant 0 : index
    %46 = vector.load %arg4[%c1_46, %c1_47, %c0_48, %c0_49, %c0_50] : memref<2x2x2x8x8xf32, #tpu.memory_space<vmem>>, vector<1x1x1x8x8xf32>
    %47 = vector.shape_cast %46 : vector<1x1x1x8x8xf32> to vector<8x8xf32>
    %cst_51 = arith.constant dense<0.000000e+00> : vector<81x8xf32>
    %48 = tpu.matmul %45, %47, %cst_51 {dimension_numbers = #tpu.dot_dimension_numbers<[1], [0], [0], [1], [0, 0, 1, 1], [], []>} : vector<81x8xf32>, vector<8x8xf32>, vector<81x8xf32> -> vector<81x8xf32>
    %49 = arith.addf %43, %48 : vector<81x8xf32>
    %50 = vector.extract_strided_slice %31 {offsets = [1, 1, 0], sizes = [9, 9, 8], strides = [1, 1, 1]} : vector<10x10x8xf32> to vector<9x9x8xf32>
    %51 = vector.shape_cast %50 : vector<9x9x8xf32> to vector<81x8xf32>
    %c1_52 = arith.constant 1 : index
    %c1_53 = arith.constant 1 : index
    %c1_54 = arith.constant 1 : index
    %c0_55 = arith.constant 0 : index
    %c0_56 = arith.constant 0 : index
    %52 = vector.load %arg4[%c1_52, %c1_53, %c1_54, %c0_55, %c0_56] : memref<2x2x2x8x8xf32, #tpu.memory_space<vmem>>, vector<1x1x1x8x8xf32>
    %53 = vector.shape_cast %52 : vector<1x1x1x8x8xf32> to vector<8x8xf32>
    %cst_57 = arith.constant dense<0.000000e+00> : vector<81x8xf32>
    %54 = tpu.matmul %51, %53, %cst_57 {dimension_numbers = #tpu.dot_dimension_numbers<[1], [0], [0], [1], [0, 0, 1, 1], [], []>} : vector<81x8xf32>, vector<8x8xf32>, vector<81x8xf32> -> vector<81x8xf32>
    %55 = arith.addf %49, %54 : vector<81x8xf32>
    %56 = vector.shape_cast %55 : vector<81x8xf32> to vector<1x1x9x9x8xf32>
    %c0_58 = arith.constant 0 : index
    %c0_59 = arith.constant 0 : index
    %c0_60 = arith.constant 0 : index
    %c0_61 = arith.constant 0 : index
    %c0_62 = arith.constant 0 : index
    %57 = vector.load %arg6[%c0_58, %c0_59, %c0_60, %c0_61, %c0_62] : memref<1x1x9x9x8xf32, #tpu.memory_space<vmem>>, vector<1x1x9x9x8xf32>
    tpu.vector_store %arg6[%c0_58, %c0_59, %c0_60, %c0_61, %c0_62], %56 {strides = array<i32>} : memref<1x1x9x9x8xf32, #tpu.memory_space<vmem>>, vector<1x1x9x9x8xf32>,
    %cst_63 = arith.constant dense<0.000000e+00> : vector<8xf32>
    %58 = vector.multi_reduction <add>, %55, %cst_63 [0] : vector<81x8xf32> to vector<8xf32>
    %59 = vector.shape_cast %58 : vector<8xf32> to vector<1x8xf32>
    %60 = arith.mulf %55, %55 : vector<81x8xf32>
    %cst_64 = arith.constant dense<0.000000e+00> : vector<8xf32>
    %61 = vector.multi_reduction <add>, %60, %cst_64 [0] : vector<81x8xf32> to vector<8xf32>
    %62 = vector.shape_cast %61 : vector<8xf32> to vector<1x8xf32>
    %cst_65 = arith.constant 0.000000e+00 : f32
    %63 = vector.broadcast %cst_65 : f32 to vector<6x8xf32>
    %64 = tpu.concatenate %59, %62, %63 in 0 : vector<1x8xf32>, vector<1x8xf32>, vector<6x8xf32> -> vector<8x8xf32>
    %65 = vector.shape_cast %64 : vector<8x8xf32> to vector<1x1x8x8xf32>
    %c0_66 = arith.constant 0 : index
    %c0_67 = arith.constant 0 : index
    %c0_68 = arith.constant 0 : index
    %c0_69 = arith.constant 0 : index
    %66 = vector.load %arg7[%c0_66, %c0_67, %c0_68, %c0_69] : memref<1x1x8x8xf32, #tpu.memory_space<vmem>>, vector<1x1x8x8xf32>
    tpu.vector_store %arg7[%c0_66, %c0_67, %c0_68, %c0_69], %65 {strides = array<i32>} : memref<1x1x8x8xf32, #tpu.memory_space<vmem>>, vector<1x1x8x8xf32>,
    return
  }
  func.func @transform_0(%arg0: i32, %arg1: i32) -> (i32, i32, i32, i32, i32) {
    %c0_i32 = arith.constant 0 : i32
    %0 = arith.subi %arg1, %c0_i32 : i32
    %c0_i32_0 = arith.constant 0 : i32
    %1 = arith.addi %0, %c0_i32_0 : i32
    %c0_i32_1 = arith.constant 0 : i32
    %c9_i32 = arith.constant 9 : i32
    %2 = arith.maxsi %c0_i32_1, %1 : i32
    %3 = arith.minsi %c9_i32, %2 : i32
    %c0_i32_2 = arith.constant 0 : i32
    %c0_i32_3 = arith.constant 0 : i32
    %c0_i32_4 = arith.constant 0 : i32
    %c0_i32_5 = arith.constant 0 : i32
    return %arg0, %3, %c0_i32_2, %c0_i32_3, %c0_i32_4 : i32, i32, i32, i32, i32
  }
  func.func @transform_1(%arg0: i32, %arg1: i32) -> (i32, i32, i32, i32, i32) {
    %c0_i32 = arith.constant 0 : i32
    %0 = arith.subi %arg1, %c0_i32 : i32
    %c1_i32 = arith.constant 1 : i32
    %1 = arith.addi %0, %c1_i32 : i32
    %c0_i32_0 = arith.constant 0 : i32
    %c9_i32 = arith.constant 9 : i32
    %2 = arith.maxsi %c0_i32_0, %1 : i32
    %3 = arith.minsi %c9_i32, %2 : i32
    %c0_i32_1 = arith.constant 0 : i32
    %c0_i32_2 = arith.constant 0 : i32
    %c0_i32_3 = arith.constant 0 : i32
    %c0_i32_4 = arith.constant 0 : i32
    return %arg0, %3, %c0_i32_1, %c0_i32_2, %c0_i32_3 : i32, i32, i32, i32, i32
  }
  func.func @transform_2(%arg0: i32, %arg1: i32) -> (i32, i32, i32, i32, i32) {
    %c0_i32 = arith.constant 0 : i32
    %c0_i32_0 = arith.constant 0 : i32
    %c0_i32_1 = arith.constant 0 : i32
    %c0_i32_2 = arith.constant 0 : i32
    %c0_i32_3 = arith.constant 0 : i32
    %c0_i32_4 = arith.constant 0 : i32
    return %c0_i32, %c0_i32_0, %c0_i32_1, %c0_i32_2, %c0_i32_3 : i32, i32, i32, i32, i32
  }
  func.func @transform_3(%arg0: i32, %arg1: i32) -> (i32, i32) {
    %c0_i32 = arith.constant 0 : i32
    %c0_i32_0 = arith.constant 0 : i32
    %c0_i32_1 = arith.constant 0 : i32
    return %c0_i32, %c0_i32_0 : i32, i32
  }
  func.func @transform_4(%arg0: i32, %arg1: i32) -> (i32, i32, i32, i32, i32) {
    %c0_i32 = arith.constant 0 : i32
    %c0_i32_0 = arith.constant 0 : i32
    %c0_i32_1 = arith.constant 0 : i32
    %c0_i32_2 = arith.constant 0 : i32
    return %arg0, %arg1, %c0_i32, %c0_i32_0, %c0_i32_1 : i32, i32, i32, i32, i32
  }
  func.func @transform_5(%arg0: i32, %arg1: i32) -> (i32, i32, i32, i32) {
    %c0_i32 = arith.constant 0 : i32
    %c0_i32_0 = arith.constant 0 : i32
    %c0_i32_1 = arith.constant 0 : i32
    return %arg0, %arg1, %c0_i32, %c0_i32_0 : i32, i32, i32, i32
  }
}

</mosaic_0001>

<bundles_post_ra>
// kernel: tpu_custom_call.1
= control target key start
LH: loop header
LB: loop body
LE: loop exit
PB: predicated region body
PF: predicated region fallthrough
CT: control target
= control target key end

     0   :  { %s8345_s18 = smov 0   ;;  %s8347_s19 = smov 0   ;;  %s10822_s0 = inlined_call_operand.vmem [shape: f32[2,10,10,10,8], index: 0, kind: input, shape index: {}]   ;;  %s10823_s1 = inlined_call_operand.vmem [shape: f32[2,10,10,10,8], index: 1, kind: input, shape index: {}]   ;;  %s10824_s2 = inlined_call_operand.vmem [shape: f32[2,2,2,8,8], index: 2, kind: input, shape index: {}]   ;;  %s10825_s3 = inlined_call_operand.vmem [shape: f32[1,8], index: 3, kind: input, shape index: {}]   ;;  %s10826_s4 = inlined_call_operand.vmem [shape: f32[2,9,9,9,8], index: 4, kind: output, shape index: {0}]   ;;  %s10827_s5 = inlined_call_operand.vmem [shape: f32[2,9,8,8], index: 5, kind: output, shape index: {1}]  }
   0x1   :  { %s8349_s20 = smov 0   ;;  %s8351_s21 = smov 0  }
   0x2   :  { %s8353_s22 = smov 0  }
   0x3 LB: > { %s25_s23 = sadd.s32 1, %s8302_s20  ;;  %s28_s24 = sadd.s32 1, %s8306_s21  ;;  %s8310_s22 = sphi %s8353_s22, %s16_s22   ;;  %s8306_s21 = sphi %s8351_s21, %s11373_s21   ;;  %s8302_s20 = sphi %s8349_s20, %s11372_s20   ;;  %s8298_s19 = sphi %s8347_s19, %s11371_s19   ;;  %s8294_s18 = sphi %s8345_s18, %s11370_s18  }
   0x4   : > { %p26_p0 = scmp.ge.s32.totalorder %s25_s23, 9  ;;  %p7473_p1 = scmp.ge.s32.totalorder %s8310_s22, 1 }
   0x5   : > { %p264_p2 = scmp.lt.s32.totalorder %s8310_s22, 19 }
   0x6   : > { %s11375_s23 = smov (%p26_p0, %s25_s23), 0  ;;  %s11377_s24 = smov (!%p26_p0, %s28_s24), %s8306_s21 }
   0x7   : > { %p265_p3 = pnand %p7473_p1, %p264_p2  ;;  %p30_p4 = scmp.ge.s32.totalorder %s11377_s24, 2 }
   0x9   : > { %s11379_s24 = smov (%p30_p4, %s11377_s24), 0  ;;  %268 = sbr.rel (%p265_p3) target bundleno = 622 (0x26e), region = 36 }
  0x10   : > { %v992_v0 = vld [vmem:[%s10824_s2] sm:$0xff]  ;;  %p326_p5 = scmp.gt.s32.totalorder %s8294_s18, 0  ;;  %p7474_p6 = scmp.lt.s32.totalorder %s8294_s18, 9  ;;  %v10828_v1 = vmov 0.0   ;;  %vm8313_vm0 = vmmov 0   ;;  %v429_v5 = vlaneseq  ;;  %vm1497_vm1 = vcmask 64512  }
  0x11   : > { %7764 = vmatprep.subr.mxu1 %v10828_v1  ;;  %7766 = vmatprep.mubr.msk.f32.mxu1 %vm8313_vm0, %v10828_v1  ;;  %p330_p7 = scmp.lt.s32.totalorder %s8298_s19, 1  ;;  %v7575_v2 = vld [vmem:[%s10824_s2 + $0x20] sm:$0xff]  ;;  %s343_s29 = sadd.s32 1, %s8294_s18  ;;  %v8314_v3 = vmov 1966171168   ;;  %vm7198_vm2 = vcmask 57344  }
  0x12   : > { %7765 = vmatpush3.msra.mxu1 %v992_v0  ;;  %7904 = vmatprep.subr.mxu0 %v10828_v1  ;;  %s327_s30 = scalar_select %p326_p5, %s8294_s18, 0  ;;  %v427_v4 = vunpack.c.l.s4 %v8314_v3  ;;  %v430_v7 = vshrl.u32 %v429_v5, 7  ;;  %vm7281_vm3 = vcmask 1040384   ;;  %vm7283_vm4 = vcmask 1041408  }
  0x13   : > { %7799 = vmatprep.subr.mxu1 %v10828_v1  ;;  %s11381_s19 = smov (!%p330_p7, %s8298_s19), 1  ;;  %7905 = vmatpush3.msra.mxu0 %v7575_v2  ;;  %p344_p8 = scmp.gt.s32.totalorder %s343_s29, 0 }
  0x14   : > { %s11383_s30 = smov (!%p7474_p6, %s327_s30), 9  ;;  %7906 = vmatprep.mubr.msk.f32.mxu0 %vm8313_vm0, %v10828_v1  ;;  %7939 = vmatprep.subr.mxu0 %v10828_v1  ;;  %s8199_s6 = smul.u32 200, %s11381_s19  ;;  %v428_v6 = vunpack.c.0.s8 %v427_v4 }
  0x15   : > { %p332_p9 = scmp.lt.s32.totalorder %s11383_s30, 9  ;;  %p7480_p10 = scmp.lt.s32.totalorder %s343_s29, 9 }
  0x16   : > { %s11385_s29 = smov (!%p344_p8, %s343_s29), 0  ;;  %v8402_v8 = vsub.s32 %v428_v6, %v430_v7  ;;  %p364_p12 = scmp.lt.s32.totalorder %s8294_s18, 8 }
  0x17   : > { %s11387_s30 = smov (!%p332_p9, %s11383_s30), 9  ;;  %s11389_s29 = smov (!%p7480_p10, %s11385_s29), 9 }
  0x18   : > { %s8198_s7 = smul.u32 20, %s11387_s30  ;;  %p350_p11 = scmp.lt.s32.totalorder %s11389_s29, 9 }
  0x19   : > { %s11393_s18 = smov (!%p364_p12, %s8294_s18), 8 }
  0x1a   : > { %s336_s8 = sadd.s32 %s8199_s6, %s8198_s7  ;;  %s11391_s29 = smov (!%p350_p11, %s11389_s29), 9 }
  0x1b   : > { %s7479_s9 = sshll.u32 %s336_s8, 3  ;;  %s8200_s13 = smul.u32 20, %s11391_s29 }
  0x1c   : > { %s8407_s12 = scalar_lea.vmem %s10822_s0, %s7479_s9  ;;  %s8201_s16 = smul.u32 18, %s11393_s18 }
  0x1d   : > { %v387_v9 = vld [vmem:[%s8407_s12] sm:$0xff]  ;;  %v8411_v10 = vld.sshfl [vmem:[%s8407_s12 + $0x8] sm:$0x11 pattern:$0x75316420]  ;;  %v389_v13 = vld [vmem:[%s8407_s12 + $0x10] sm:$0xff]  ;;  %s354_s14 = sadd.s32 %s8200_s13, %s8199_s6 }
  0x1e   : > { %v425_v11 = vcombine.high %v387_v9, %v387_v9  ;;  %v432_v12 = vrot.slane %v387_v9, %v8402_v8  ;;  %v488_v14 = vcombine.high %v389_v13, %v389_v13  ;;  %v495_v15 = vrot.slane %v389_v13, %v8402_v8  ;;  %v7490_v16 = vld.sshfl [vmem:[%s8407_s12 + $0x18] sm:$0x11 pattern:$0x75316420]  ;;  %v8426_v21 = vld [vmem:[%s8407_s12 + $0x20] sm:$0xff]  ;;  %s7485_s15 = sshll.u32 %s354_s14, 3 }
  0x1f   : > { %v8423_v20 = vrot.slane %v8411_v10, %v8402_v8  ;;  %v8443_v29 = vrot.slane %v7490_v16, %v8402_v8  ;;  %s8448_s25 = scalar_lea.vmem %s10823_s1, %s7485_s15  ;;  %v551_v33 = vcombine.high %v8426_v21, %v8426_v21  ;;  %v8498_v58 = vrot.slane %v8426_v21, %v8402_v8  ;;  %s8202_s15 = smul.u32 162, %s11381_s19 }
  0x20   : > { %v439_v17 = vrot.slane %v425_v11, %v8402_v8  ;;  %v440_v18 = vcombine.high %v432_v12, %v432_v12  ;;  %v8419_v19 = vrot.slane %v432_v12, %v8402_v8  ;;  %v502_v22 = vrot.slane %v488_v14, %v8402_v8  ;;  %v3242_v37 = vld [vmem:[%s8448_s25] sm:$0xff]  ;;  %s8203_s29 = smul.u32 9, %s11381_s19 }
  0x21   : > { %v503_v23 = vcombine.high %v495_v15, %v495_v15  ;;  %v8432_v24 = vrot.slane %v495_v15, %v8402_v8  ;;  %v3280_v39 = vcombine.high %v3242_v37, %v3242_v37  ;;  %v3287_v40 = vrot.slane %v3242_v37, %v8402_v8  ;;  %v7519_v15 = vld [vmem:[%s10824_s2 + $0x8] sm:$0xff]  ;;  %s10547_s17 = sadd.s32 %s8202_s15, %s8201_s16 }
  0x22   : > { %v441_v26 = vcombine.high %v439_v17, %v439_v17  ;;  %v8437_v27 = vrot.slane %v439_v17, %v8402_v8  ;;  %v8440_v28 = vrot.slane %v440_v18, %v8402_v8  ;;  %v504_v30 = vcombine.high %v502_v22, %v502_v22  ;;  %s376_s30 = sadd.s32 %s8203_s29, %s11393_s18 }
  0x23   : > { %v8451_v31 = vrot.slane %v502_v22, %v8402_v8  ;;  %v8454_v32 = vrot.slane %v503_v23, %v8402_v8  ;;  %v533_v38 = vcombine.high %v8432_v24, %v8432_v24  ;;  %v1042_v42 = vcombine.low %v8423_v20, %v8432_v24  ;;  %s7487_s6 = sshll.u32 %s376_s30, 3 }
  0x24   : > { %v8459_v34 = vrot.slane %v441_v26, %v8402_v8  ;;  %v993_v35 = vcombine.low %v8419_v19, %v8440_v28  ;;  %v7498_v36 = vcombine.high %v8419_v19, %v8440_v28  ;;  %v8470_v41 = vrot.slane %v504_v30, %v8402_v8  ;;  %v3244_v30 = vld [vmem:[%s8448_s25 + $0x10] sm:$0xff]  ;;  %s378_s8 = scalar_lea.vmem %s10827_s5, %s7487_s6 }
  0x25   : > { %v3294_v47 = vrot.slane %v3280_v39, %v8402_v8  ;;  %v3295_v48 = vcombine.high %v3287_v40, %v3287_v40  ;;  %v8482_v49 = vrot.slane %v3287_v40, %v8402_v8  ;;  %v534_v50 = vcombine.high %v8451_v31, %v8451_v31 }
  0x26   : > { %v995_v43 = vcombine.low %v8437_v27, %v8459_v34  ;;  %v7499_v44 = vcombine.high %v8437_v27, %v8459_v34  ;;  %v1003_v45 = vrot.slane %v993_v35, %v8402_v8  ;;  %v1010_v46 = vrot.slane %v7498_v36, %v8402_v8 }
  0x27   : > { %v535_v54 = vcombine.high %v8454_v32, %v8454_v32  ;;  %v3296_v55 = vcombine.high %v3294_v47, %v3294_v47  ;;  %v8491_v56 = vrot.slane %v3294_v47, %v8402_v8  ;;  %v8494_v57 = vrot.slane %v3295_v48, %v8402_v8 }
  0x28   : > { %v1017_v51 = vrot.slane %v995_v43, %v8402_v8  ;;  %v1024_v52 = vrot.slane %v7499_v44, %v8402_v8  ;;  %v1025_v53 = vcombine.low %v1003_v45, %v1010_v46  ;;  %v1043_v61 = vcombine.low %v8454_v32, %v533_v38  ;;  %v7566_v38 = vld.sshfl [vmem:[%s8448_s25 + $0x8] sm:$0x11 pattern:$0x75316420] }
  0x29   : > { %v1044_v62 = vcombine.low %v535_v54, %v8451_v31  ;;  %v8504_v63 = vrot.slane %v3296_v55, %v8402_v8  ;;  %v3849_v0 = vcombine.low %v8482_v49, %v8494_v57  ;;  %v7576_v2 = vcombine.high %v8482_v49, %v8494_v57 }
  0x2a   : > { %v1026_v59 = vcombine.low %v1017_v51, %v1024_v52  ;;  %v1033_v60 = vrot.slane %v1025_v53, %v8402_v8  ;;  %v1045_v3 = vcombine.low %v8470_v41, %v534_v50  ;;  %v1052_v5 = vrot.slane %v1042_v42, %v8402_v8 }
  0x2b   : > { %v8514_v6 = vrot.slane %v1043_v61, %v8402_v8  ;;  %v8517_v7 = vrot.slane %v1044_v62, %v8402_v8  ;;  %v3851_v9 = vcombine.low %v8491_v56, %v8504_v63  ;;  %v7577_v11 = vcombine.high %v8491_v56, %v8504_v63 }
  0x2c   : > { %v1040_v4 = vrot.slane %v1026_v59, %v8402_v8  ;;  %v3859_v12 = vrot.slane %v3849_v0, %v8402_v8  ;;  %v3866_v13 = vrot.slane %v7576_v2, %v8402_v8  ;;  %v473_v16 = vcombine.high %v8459_v34, %v8459_v34  ;;  %v7597_v59 = vld [vmem:[%s10824_s2 + $0x28] sm:$0xff] }
  0x2d   : > { %11038 = vst [vmem:[#allocation2_spill] sm:$0xff] %v8514_v6  ;;  %11039 = vst [vmem:[#allocation3_spill] sm:$0xff] %v8517_v7  ;;  %v8531_v17 = vrot.slane %v1045_v3, %v8402_v8  ;;  %v1074_v18 = vcombine.low %v1052_v5, %v8514_v6  ;;  %v3873_v21 = vrot.slane %v3851_v9, %v8402_v8 }
  0x2e   : > { %v1041_v14 = vcombine.low %v1033_v60, %v1040_v4  ;;  %v3880_v22 = vrot.slane %v7577_v11, %v8402_v8  ;;  %v3881_v23 = vcombine.low %v3859_v12, %v3866_v13  ;;  %v565_v39 = vrot.slane %v551_v33, %v8402_v8 }
  0x2f   : > { %11040 = vst [vmem:[#allocation4_spill] sm:$0xff] %v8531_v17  ;;  %v1075_v36 = vcombine.low %v8517_v7, %v8531_v17  ;;  %v1082_v37 = vrot.slane %v1074_v18, %v8402_v8  ;;  %v3328_v43 = vcombine.high %v8504_v63, %v8504_v63  ;;  %v8554_v45 = vcombine.low %v473_v16, %v8423_v20 }
  0x30   : > { %7767 = vmatmul.mubr.msk.f32.vlgmr.msra.gmra.mrb[0].mxu1 %vm1497_vm1, %v1041_v14  ;;  %v3882_v40 = vcombine.low %v3873_v21, %v3880_v22  ;;  %v3889_v42 = vrot.slane %v3881_v23, %v8402_v8  ;;  %v3343_v46 = vcombine.high %v3244_v30, %v3244_v30  ;;  %v3350_v47 = vrot.slane %v3244_v30, %v8402_v8 }
  0x31   : > { %7800 = vmatpush3.msra.mxu1 %v7519_v15  ;;  %7769 = vmatprep.mubr.msk.f32.mxu1 %vm8313_vm0, %v10828_v1  ;;  %v1089_v44 = vrot.slane %v1075_v36, %v8402_v8  ;;  %v3342_v48 = vrot.slane %v7566_v38, %v8402_v8  ;;  %v536_v50 = vcombine.high %v8470_v41, %v8470_v41  ;;  %v7567_v36 = vld.sshfl [vmem:[%s8448_s25 + $0x18] sm:$0x11 pattern:$0x75316420] }
  0x32   : > { %7834 = vmatprep.subr.mxu1 %v10828_v1  ;;  %v3896_v33 = vrot.slane %v3882_v40, %v8402_v8  ;;  %v566_v51 = vcombine.high %v8498_v58, %v8498_v58  ;;  %v3357_v53 = vrot.slane %v3343_v46, %v8402_v8  ;;  %v3358_v20 = vcombine.high %v3350_v47, %v3350_v47  ;;  %v3246_v40 = vld [vmem:[%s8448_s25 + $0x20] sm:$0xff] }
  0x33   : > { %v1090_v52 = vcombine.low %v1082_v37, %v1089_v44  ;;  %v8566_v54 = vrot.slane %v3350_v47, %v8402_v8  ;;  %v8571_v60 = vcombine.low %v3328_v43, %v3342_v48  ;;  %v567_v61 = vcombine.high %v565_v39, %v565_v39 }
  0x34   : > { %v3897_v55 = vcombine.low %v3889_v42, %v3896_v33  ;;  %v8575_v62 = vrot.slane %v8498_v58, %v8402_v8  ;;  %v3359_v0 = vcombine.high %v3357_v53, %v3357_v53  ;;  %v8579_v2 = vrot.slane %v3357_v53, %v8402_v8 }
  0x35   : > { %7770 = vmatmul.mubr.msk.f32.gmra.mrb[2].mxu1 %vm1497_vm1, %v1090_v52  ;;  %v8582_v3 = vrot.slane %v3358_v20, %v8402_v8  ;;  %v3388_v4 = vcombine.high %v8566_v54, %v8566_v54  ;;  %v3898_v5 = vcombine.low %v3342_v48, %v8566_v54  ;;  %v8591_v58 = vrot.slane %v565_v39, %v8402_v8 }
  0x36   : > { %7907 = vmatmul.mubr.msk.f32.vlgmr.msra.gmra.mrb[0].mxu0 %vm1497_vm1, %v3897_v55  ;;  %7772 = vmatprep.mubr.msk.f32.mxu1 %vm8313_vm0, %v10828_v1  ;;  %v8594_v9 = vrot.slane %v566_v51, %v8402_v8  ;;  %v8599_v11 = vrot.slane %v3359_v0, %v8402_v8  ;;  %v3389_v12 = vcombine.high %v8579_v2, %v8579_v2 }
  0x37   : > { %7940 = vmatpush3.msra.mxu0 %v7597_v59  ;;  %7909 = vmatprep.mubr.msk.f32.mxu0 %vm8313_vm0, %v10828_v1  ;;  %v3390_v13 = vcombine.high %v8582_v3, %v8582_v3  ;;  %v3899_v14 = vcombine.low %v8582_v3, %v3388_v4  ;;  %v3908_v15 = vrot.slane %v3898_v5, %v8402_v8 }
  0x38   : > { %11041 = vst [vmem:[#allocation5_spill] sm:$0xff] %v8594_v9  ;;  %v8608_v16 = vrot.slane %v567_v61, %v8402_v8  ;;  %v1091_v18 = vcombine.low %v536_v50, %v8443_v29  ;;  %7974 = vmatprep.subr.mxu0 %v10828_v1  ;;  %v3901_v22 = vcombine.low %v8599_v11, %v3389_v12 }
  0x39   : > { %v3900_v21 = vcombine.low %v3390_v13, %v8579_v2  ;;  %v1092_v23 = vcombine.low %v8575_v62, %v8594_v9  ;;  %v7500_v30 = vcombine.high %v8575_v62, %v8594_v9  ;;  %v8620_v37 = vrot.slane %v3899_v14, %v8402_v8 }
  0x3a   : > { %v1094_v38 = vcombine.low %v8591_v58, %v8608_v16  ;;  %v8625_v39 = vrot.slane %v1091_v18, %v8402_v8  ;;  %v3391_v42 = vcombine.high %v8599_v11, %v8599_v11  ;;  %v8634_v44 = vrot.slane %v3901_v22, %v8402_v8 }
  0x3b   : > { %11042 = vst [vmem:[#allocation6_spill] sm:$0xff] %v8620_v37  ;;  %v8631_v43 = vrot.slane %v3900_v21, %v8402_v8  ;;  %v1108_v46 = vrot.slane %v1092_v23, %v8402_v8  ;;  %v8638_v47 = vrot.slane %v7500_v30, %v8402_v8  ;;  %v3930_v33 = vcombine.low %v3908_v15, %v8620_v37  ;;  %v7491_v23 = vld.sshfl [vmem:[%s8407_s12 + $0x28] sm:$0x11 pattern:$0x75316420]  ;;  %v393_v30 = vld [vmem:[%s8407_s12 + $0x30] sm:$0xff] }
  0x3c   : > { %11043 = vst [vmem:[#allocation7_spill] sm:$0xff] %v8625_v39  ;;  %11045 = vst [vmem:[#allocation9_spill] sm:$0xff] %v8634_v44  ;;  %v8642_v48 = vrot.slane %v1094_v38, %v8402_v8  ;;  %v8647_v51 = vrot.slane %v7567_v36, %v8402_v8  ;;  %v3406_v55 = vcombine.high %v3246_v40, %v3246_v40 }
  0x3d   : > { %11044 = vst [vmem:[#allocation8_spill] sm:$0xff] %v8631_v43  ;;  %11046 = vst [vmem:[#allocation10_spill] sm:$0xff] %v8638_v47  ;;  %v3931_v52 = vcombine.low %v8631_v43, %v8634_v44  ;;  %v1123_v20 = vcombine.low %v8625_v39, %v1108_v46  ;;  %v3938_v61 = vrot.slane %v3930_v33, %v8402_v8  ;;  %v8806_v43 = vld.sshfl [vmem:[%s8448_s25 + $0x38] sm:$0x11 pattern:$0x75316420] }
  0x3e   : > { %11047 = vst [vmem:[#allocation11_spill] sm:$0xff] %v8642_v48  ;;  %v1124_v0 = vcombine.low %v8638_v47, %v8642_v48  ;;  %v3413_v4 = vrot.slane %v3246_v40, %v8402_v8  ;;  %v3420_v14 = vrot.slane %v3406_v55, %v8402_v8  ;;  %v3947_v22 = vcombine.low %v3391_v42, %v8647_v51  ;;  %v8776_v47 = vld [vmem:[%s8407_s12 + $0x40] sm:$0xff] }
  0x3f   : > { %v3945_v12 = vrot.slane %v3931_v52, %v8402_v8  ;;  %v1131_v13 = vrot.slane %v1123_v20, %v8402_v8  ;;  %v614_v55 = vcombine.high %v393_v30, %v393_v30  ;;  %11064 = vst [vmem:[#allocation27_spill] sm:$0xff] %v8806_v43 }
  0x40   : > { %v1138_v15 = vrot.slane %v1124_v0, %v8402_v8  ;;  %v3421_v18 = vcombine.high %v3413_v4, %v3413_v4  ;;  %v8667_v21 = vrot.slane %v3413_v4, %v8402_v8  ;;  %v3422_v40 = vcombine.high %v3420_v14, %v3420_v14 }
  0x41   : > { %v3946_v36 = vcombine.low %v3938_v61, %v3945_v12  ;;  %v8675_v46 = vrot.slane %v3420_v14, %v8402_v8  ;;  %v8681_v20 = vrot.slane %v3947_v22, %v8402_v8  ;;  %v8688_v61 = vrot.slane %v7491_v23, %v8402_v8  ;;  %v7568_v12 = vld.sshfl [vmem:[%s8448_s25 + $0x28] sm:$0x11 pattern:$0x75316420] }
  0x42   : > { %v1139_v33 = vcombine.low %v1131_v13, %v1138_v15  ;;  %v8678_v52 = vrot.slane %v3421_v18, %v8402_v8  ;;  %v8685_v42 = vrot.slane %v3422_v40, %v8402_v8  ;;  %v621_v0 = vrot.slane %v393_v30, %v8402_v8 }
  0x43   : > { %11049 = vst [vmem:[#allocation13_spill] sm:$0xff] %v8681_v20  ;;  %7910 = vmatmul.mubr.msk.f32.gmra.mrb[2].mxu0 %vm1497_vm1, %v3946_v36  ;;  %11050 = vst [vmem:[#allocation14_spill] sm:$0xff] %v8688_v61  ;;  %v7501_v4 = vcombine.high %v8591_v58, %v8608_v16  ;;  %v628_v22 = vrot.slane %v614_v55, %v8402_v8  ;;  %v3248_v36 = vld [vmem:[%s8448_s25 + $0x30] sm:$0xff]  ;;  %v8720_v53 = vrot.slane %v7568_v12, %v8402_v8 }
  0x44   : > { %11048 = vst [vmem:[#allocation12_spill] sm:$0xff] %v8678_v52  ;;  %7773 = vmatmul.mubr.msk.f32.gmra.mrb[4].mxu1 %vm1497_vm1, %v1139_v33  ;;  %7912 = vmatprep.mubr.msk.f32.mxu0 %vm8313_vm0, %v10828_v1  ;;  %v3948_v13 = vcombine.low %v8667_v21, %v8678_v52  ;;  %v7578_v14 = vcombine.high %v8667_v21, %v8678_v52 }
  0x45   : > { %v3950_v18 = vcombine.low %v8675_v46, %v8685_v42  ;;  %7775 = vmatprep.mubr.msk.f32.mxu1 %vm8313_vm0, %v10828_v1  ;;  %v629_v23 = vcombine.high %v621_v0, %v621_v0  ;;  %v8709_v30 = vrot.slane %v621_v0, %v8402_v8  ;;  %v8717_v15 = vrot.slane %v7501_v4, %v8402_v8 }
  0x46   : > { %v3964_v40 = vrot.slane %v3948_v13, %v8402_v8  ;;  %v8714_v33 = vrot.slane %v7578_v14, %v8402_v8  ;;  %11053 = vst [vmem:[#allocation17_spill] sm:$0xff] %v8720_v53  ;;  %v8726_v55 = vrot.slane %v628_v22, %v8402_v8  ;;  %v3469_v26 = vcombine.high %v3248_v36, %v3248_v36 }
  0x47   : > { %11052 = vst [vmem:[#allocation16_spill] sm:$0xff] %v8717_v15  ;;  %v8723_v50 = vrot.slane %v3950_v18, %v8402_v8  ;;  %v8729_v0 = vrot.slane %v629_v23, %v8402_v8  ;;  %v659_v13 = vcombine.high %v8709_v30, %v8709_v30  ;;  %v1141_v4 = vcombine.low %v8688_v61, %v8709_v30 }
  0x48   : > { %11051 = vst [vmem:[#allocation15_spill] sm:$0xff] %v8714_v33  ;;  %v3979_v14 = vcombine.low %v8681_v20, %v3964_v40  ;;  %v3476_v12 = vrot.slane %v3248_v36, %v8402_v8  ;;  %v7579_v25 = vcombine.high %v8675_v46, %v8685_v42  ;;  %v3483_v59 = vrot.slane %v3469_v26, %v8402_v8 }
  0x49   : > { %11054 = vst [vmem:[#allocation18_spill] sm:$0xff] %v8723_v50  ;;  %v3980_v18 = vcombine.low %v8714_v33, %v8723_v50  ;;  %v661_v38 = vcombine.high %v8729_v0, %v8729_v0  ;;  %v1142_v23 = vcombine.low %v8729_v0, %v659_v13  ;;  %v1157_v5 = vrot.slane %v1141_v4, %v8402_v8 }
  0x4a   : > { %v3987_v40 = vrot.slane %v3979_v14, %v8402_v8  ;;  %v3484_v36 = vcombine.high %v3476_v12, %v3476_v12  ;;  %v8753_v13 = vrot.slane %v3476_v12, %v8402_v8  ;;  %v8757_v14 = vrot.slane %v3483_v59, %v8402_v8 }
  0x4b   : > { %v3994_v35 = vrot.slane %v3980_v18, %v8402_v8  ;;  %v1143_v1 = vcombine.low %v661_v38, %v8726_v55  ;;  %v8750_v33 = vrot.slane %v1142_v23, %v8402_v8  ;;  %v1172_v50 = vcombine.low %v8717_v15, %v1157_v5  ;;  %v8766_v18 = vld.sshfl [vmem:[%s8407_s12 + $0x38] sm:$0x11 pattern:$0x75316420] }
  0x4c   : > { %11056 = vst [vmem:[#allocation20_spill] sm:$0xff] %v8753_v13  ;;  %11057 = vst [vmem:[#allocation21_spill] sm:$0xff] %v8757_v14  ;;  %v8760_v4 = vrot.slane %v3484_v36, %v8402_v8  ;;  %v8763_v26 = vrot.slane %v7579_v25, %v8402_v8  ;;  %v3514_v12 = vcombine.high %v8753_v13, %v8753_v13  ;;  %v11062_v20 = vmov 0.0  }
  0x4d   : > { %11055 = vst [vmem:[#allocation19_spill] sm:$0xff] %v8750_v33  ;;  %11059 = vst [vmem:[#allocation23_spill] sm:$0xff] %v8766_v18  ;;  %v3995_v38 = vcombine.low %v3987_v40, %v3994_v35  ;;  %v8769_v23 = vrot.slane %v1143_v1, %v8402_v8  ;;  %v3997_v5 = vcombine.low %v8720_v53, %v8753_v13 }
  0x4e   : > { %11058 = vst [vmem:[#allocation22_spill] sm:$0xff] %v8763_v26  ;;  %v1180_v36 = vrot.slane %v1172_v50, %v8402_v8  ;;  %v3516_v25 = vcombine.high %v8760_v4, %v8760_v4  ;;  %v630_v48 = vcombine.high %v628_v22, %v628_v22  ;;  %v660_v35 = vcombine.high %v8726_v55, %v8726_v55 }
  0x4f   : > { %11060 = vst [vmem:[#allocation24_spill] sm:$0xff] %v8769_v23  ;;  %7913 = vmatmul.mubr.msk.f32.gmra.mrb[4].mxu0 %vm1497_vm1, %v3995_v38  ;;  %v1173_v1 = vcombine.low %v8750_v33, %v8769_v23  ;;  %v3998_v40 = vcombine.low %v8760_v4, %v3514_v12  ;;  %v4013_v15 = vrot.slane %v3997_v5, %v8402_v8 }
  0x50   : > { %v8790_v50 = vrot.slane %v8766_v18, %v8402_v8  ;;  %7915 = vmatprep.mubr.msk.f32.mxu0 %vm8313_vm0, %v11062_v20  ;;  %v3999_v22 = vcombine.low %v3516_v25, %v8757_v14  ;;  %v8796_v44 = vrot.slane %v630_v48, %v8402_v8  ;;  %v684_v38 = vrot.slane %v8776_v47, %v8402_v8 }
  0x51   : > { %v3485_v33 = vcombine.high %v3483_v59, %v3483_v59  ;;  %v1187_v12 = vrot.slane %v1173_v1, %v8402_v8  ;;  %v8802_v5 = vrot.slane %v3998_v40, %v8402_v8  ;;  %v4028_v23 = vcombine.low %v8763_v26, %v4013_v15  ;;  %v3250_v1 = vld [vmem:[%s8448_s25 + $0x40] sm:$0xff] }
  0x52   : > { %11061 = vst [vmem:[#allocation25_spill] sm:$0xff] %v8790_v50  ;;  %v3515_v37 = vcombine.high %v8757_v14, %v8757_v14  ;;  %v8811_v25 = vrot.slane %v3999_v22, %v8402_v8  ;;  %v662_v48 = vcombine.high %v8796_v44, %v8796_v44  ;;  %v692_v39 = vcombine.high %v684_v38, %v684_v38  ;;  %v401_v14 = vld [vmem:[%s8407_s12 + $0x70] sm:$0xff] }
  0x53   : > { %11063 = vst [vmem:[#allocation26_spill] sm:$0xff] %v8802_v5  ;;  %v8816_v59 = vrot.slane %v684_v38, %v8402_v8  ;;  %v1188_v40 = vcombine.low %v1180_v36, %v1187_v12  ;;  %v4036_v17 = vrot.slane %v4028_v23, %v8402_v8  ;;  %v1189_v15 = vcombine.low %v8796_v44, %v660_v35 }
  0x54   : > { %11065 = vst [vmem:[#allocation28_spill] sm:$0xff] %v8811_v25  ;;  %v8822_v26 = vrot.slane %v3485_v33, %v8402_v8  ;;  %v4029_v22 = vcombine.low %v8802_v5, %v8811_v25  ;;  %v8827_v7 = vrot.slane %v692_v39, %v8402_v8  ;;  %v1190_v6 = vcombine.low %v662_v48, %v8790_v50 }
  0x55   : > { %11066 = vst [vmem:[#allocation29_spill] sm:$0xff] %v8816_v59  ;;  %v8832_v38 = vrot.slane %v8806_v43, %v8402_v8  ;;  %7776 = vmatmul.mubr.msk.f32.gmra.mrb[6].mxu1 %vm1497_vm1, %v1188_v40  ;;  %v8836_v23 = vrot.slane %v1189_v15, %v8402_v8  ;;  %v3539_v36 = vrot.slane %v3250_v1, %v8402_v8  ;;  %v8853_v15 = vld.sshfl [vmem:[%s8407_s12 + $0x48] sm:$0x11 pattern:$0x75316420]  ;;  %v8863_v43 = vld [vmem:[%s8407_s12 + $0x50] sm:$0xff] }
  0x56   : > { %11067 = vst [vmem:[#allocation30_spill] sm:$0xff] %v8822_v26  ;;  %11068 = vst [vmem:[#allocation31_spill] sm:$0xff] %v8827_v7  ;;  %v3517_v33 = vcombine.high %v8822_v26, %v8822_v26  ;;  %v4045_v39 = vcombine.low %v8822_v26, %v3515_v37  ;;  %v4043_v35 = vrot.slane %v4029_v22, %v8402_v8  ;;  %7778 = vmatprep.mubr.msk.f32.mxu1 %vm8313_vm0, %v11062_v20 }
  0x57   : > { %11069 = vst [vmem:[#allocation32_spill] sm:$0xff] %v8832_v38  ;;  %11070 = vst [vmem:[#allocation33_spill] sm:$0xff] %v8836_v23  ;;  %v1191_v12 = vcombine.low %v8816_v59, %v8827_v7  ;;  %v7502_v48 = vcombine.high %v8816_v59, %v8827_v7  ;;  %v8850_v40 = vrot.slane %v1190_v6, %v8402_v8 }
  0x58   : > { %11072 = vst [vmem:[#allocation35_spill] sm:$0xff] %v8853_v15  ;;  %v3547_v5 = vcombine.high %v3539_v36, %v3539_v36  ;;  %v8856_v25 = vrot.slane %v3539_v36, %v8402_v8  ;;  %v4046_v37 = vcombine.low %v3517_v33, %v8832_v38  ;;  %v8860_v22 = vrot.slane %v4045_v39, %v8402_v8 }
  0x59   : > { %11071 = vst [vmem:[#allocation34_spill] sm:$0xff] %v8850_v40  ;;  %v4044_v50 = vcombine.low %v4036_v17, %v4043_v35  ;;  %v1213_v18 = vrot.slane %v1191_v12, %v8402_v8  ;;  %v8867_v7 = vrot.slane %v7502_v48, %v8402_v8  ;;  %v1221_v6 = vcombine.low %v8836_v23, %v8850_v40 }
  0x5a   : > { %11073 = vst [vmem:[#allocation36_spill] sm:$0xff] %v8856_v25  ;;  %11074 = vst [vmem:[#allocation37_spill] sm:$0xff] %v8860_v22  ;;  %v8872_v59 = vrot.slane %v3547_v5, %v8402_v8  ;;  %v8875_v36 = vrot.slane %v4046_v37, %v8402_v8  ;;  %v677_v33 = vcombine.high %v8776_v47, %v8776_v47 }
  0x5b   : > { %11075 = vst [vmem:[#allocation38_spill] sm:$0xff] %v8867_v7  ;;  %v8881_v17 = vrot.slane %v8853_v15, %v8402_v8  ;;  %7916 = vmatmul.mubr.msk.f32.gmra.mrb[6].mxu0 %vm1497_vm1, %v4044_v50  ;;  %v1222_v39 = vcombine.low %v1213_v18, %v8867_v7  ;;  %v1229_v35 = vrot.slane %v1221_v6, %v8402_v8 }
  0x5c   : > { %11076 = vst [vmem:[#allocation39_spill] sm:$0xff] %v8872_v59  ;;  %11077 = vst [vmem:[#allocation40_spill] sm:$0xff] %v8875_v36  ;;  %v747_v5 = vrot.slane %v8863_v43, %v8402_v8  ;;  %v3532_v12 = vcombine.high %v3250_v1, %v3250_v1  ;;  %7918 = vmatprep.mubr.msk.f32.mxu0 %vm8313_vm0, %v11062_v20  ;;  %v4047_v47 = vcombine.low %v8856_v25, %v8872_v59 }
  0x5d   : > { %11078 = vst [vmem:[#allocation41_spill] sm:$0xff] %v8881_v17  ;;  %v7580_v48 = vcombine.high %v8856_v25, %v8872_v59  ;;  %v4077_v18 = vcombine.low %v8860_v22, %v8875_v36  ;;  %v691_v50 = vrot.slane %v677_v33, %v8402_v8  ;;  %v1236_v37 = vrot.slane %v1222_v39, %v8402_v8  ;;  %v8908_v59 = vld.sshfl [vmem:[%s8448_s25 + $0x48] sm:$0x11 pattern:$0x75316420]  ;;  %v8911_v36 = vld [vmem:[%s8448_s25 + $0x50] sm:$0xff] }
  0x5e   : > { %v755_v6 = vcombine.high %v747_v5, %v747_v5  ;;  %v8899_v40 = vrot.slane %v747_v5, %v8402_v8  ;;  %v3546_v1 = vrot.slane %v3532_v12, %v8402_v8  ;;  %v4069_v7 = vrot.slane %v4047_v47, %v8402_v8  ;;  %11081 = vst [vmem:[#allocation44_spill] sm:$0xff] %v8908_v59 }
  0x5f   : > { %v8904_v23 = vrot.slane %v7580_v48, %v8402_v8  ;;  %v4085_v15 = vrot.slane %v4077_v18, %v8402_v8  ;;  %v693_v38 = vcombine.high %v691_v50, %v691_v50  ;;  %v1237_v33 = vcombine.low %v1229_v35, %v1236_v37 }
  0x60   : > { %11079 = vst [vmem:[#allocation42_spill] sm:$0xff] %v8899_v40  ;;  %v8914_v39 = vrot.slane %v691_v50, %v8402_v8  ;;  %v8917_v5 = vrot.slane %v755_v6, %v8402_v8  ;;  %v785_v12 = vcombine.high %v8899_v40, %v8899_v40  ;;  %v1240_v18 = vcombine.low %v8881_v17, %v8899_v40 }
  0x61   : > { %11080 = vst [vmem:[#allocation43_spill] sm:$0xff] %v8904_v23  ;;  %v4078_v47 = vcombine.low %v4069_v7, %v8904_v23  ;;  %v8923_v48 = vrot.slane %v693_v38, %v8402_v8  ;;  %v3548_v22 = vcombine.high %v3546_v1, %v3546_v1  ;;  %7779 = vmatmul.mubr.msk.f32.gmra.mrb[8].mxu1 %vm1497_vm1, %v1237_v33 }
  0x62   : > { %11082 = vst [vmem:[#allocation45_spill] sm:$0xff] %v8914_v39  ;;  %11083 = vst [vmem:[#allocation46_spill] sm:$0xff] %v8917_v5  ;;  %v1241_v35 = vcombine.low %v8917_v5, %v785_v12  ;;  %v8930_v50 = vrot.slane %v3546_v1, %v8402_v8  ;;  %v8934_v37 = vrot.slane %v8908_v59, %v8402_v8  ;;  %7781 = vmatprep.mubr.msk.f32.mxu1 %vm8313_vm0, %v11062_v20 }
  0x63   : > { %11084 = vst [vmem:[#allocation47_spill] sm:$0xff] %v8923_v48  ;;  %v3602_v7 = vrot.slane %v8911_v36, %v8402_v8  ;;  %v4092_v38 = vrot.slane %v4078_v47, %v8402_v8  ;;  %v1238_v6 = vcombine.low %v8914_v39, %v8923_v48  ;;  %v7503_v33 = vcombine.high %v8914_v39, %v8923_v48 }
  0x64   : > { %11085 = vst [vmem:[#allocation48_spill] sm:$0xff] %v8930_v50  ;;  %11086 = vst [vmem:[#allocation49_spill] sm:$0xff] %v8934_v37  ;;  %v1262_v1 = vrot.slane %v1240_v18, %v8402_v8  ;;  %v8947_v12 = vrot.slane %v1241_v35, %v8402_v8  ;;  %v8950_v23 = vrot.slane %v3548_v22, %v8402_v8 }
  0x65   : > { %v3610_v47 = vcombine.high %v3602_v7, %v3602_v7  ;;  %v8953_v59 = vrot.slane %v3602_v7, %v8402_v8  ;;  %v4093_v40 = vcombine.low %v4085_v15, %v4092_v38  ;;  %v8956_v17 = vrot.slane %v1238_v6, %v8402_v8  ;;  %v8979_v6 = vld.sshfl [vmem:[%s8407_s12 + $0x58] sm:$0x11 pattern:$0x75316420] }
  0x66   : > { %11087 = vst [vmem:[#allocation50_spill] sm:$0xff] %v8947_v12  ;;  %11088 = vst [vmem:[#allocation51_spill] sm:$0xff] %v8950_v23  ;;  %v8959_v48 = vrot.slane %v7503_v33, %v8402_v8  ;;  %v740_v18 = vcombine.high %v8863_v43, %v8863_v43  ;;  %v1271_v35 = vcombine.low %v1262_v1, %v8947_v12  ;;  %v399_v33 = vld [vmem:[%s8407_s12 + $0x60] sm:$0xff] }
  0x67   : > { %11089 = vst [vmem:[#allocation52_spill] sm:$0xff] %v8953_v59  ;;  %11090 = vst [vmem:[#allocation53_spill] sm:$0xff] %v8956_v17  ;;  %v8965_v22 = vrot.slane %v3610_v47, %v8402_v8  ;;  %v3640_v25 = vcombine.high %v8953_v59, %v8953_v59  ;;  %v4094_v15 = vcombine.low %v8930_v50, %v8950_v23  ;;  %7919 = vmatmul.mubr.msk.f32.gmra.mrb[8].mxu0 %vm1497_vm1, %v4093_v40 }
  0x68   : > { %11091 = vst [vmem:[#allocation54_spill] sm:$0xff] %v8959_v48  ;;  %v1270_v7 = vcombine.low %v8956_v17, %v8959_v48  ;;  %v7581_v38 = vcombine.high %v8930_v50, %v8950_v23  ;;  %v4096_v43 = vcombine.low %v8934_v37, %v8953_v59  ;;  %11093 = vst [vmem:[#allocation56_spill] sm:$0xff] %v8979_v6  ;;  %7921 = vmatprep.mubr.msk.f32.mxu0 %vm8313_vm0, %v11062_v20 }
  0x69   : > { %11092 = vst [vmem:[#allocation55_spill] sm:$0xff] %v8965_v22  ;;  %v754_v1 = vrot.slane %v740_v18, %v8402_v8  ;;  %v1285_v47 = vrot.slane %v1271_v35, %v8402_v8  ;;  %v4097_v40 = vcombine.low %v8965_v22, %v3640_v25  ;;  %v8988_v12 = vrot.slane %v4094_v15, %v8402_v8 }
  0x6a   : > { %v787_v48 = vcombine.high %v8917_v5, %v8917_v5  ;;  %v1278_v17 = vrot.slane %v1270_v7, %v8402_v8  ;;  %v8994_v59 = vrot.slane %v7581_v38, %v8402_v8  ;;  %v4118_v18 = vrot.slane %v4096_v43, %v8402_v8 }
  0x6b   : > { %11094 = vst [vmem:[#allocation57_spill] sm:$0xff] %v8988_v12  ;;  %v756_v37 = vcombine.high %v754_v1, %v754_v1  ;;  %v8998_v35 = vrot.slane %v4097_v40, %v8402_v8  ;;  %v9001_v25 = vrot.slane %v754_v1, %v8402_v8  ;;  %v9005_v15 = vrot.slane %v8979_v6, %v8402_v8 }
  0x6c   : > { %11095 = vst [vmem:[#allocation58_spill] sm:$0xff] %v8994_v59  ;;  %v810_v23 = vrot.slane %v399_v33, %v8402_v8  ;;  %v1286_v7 = vcombine.low %v1278_v17, %v1285_v47  ;;  %v4126_v38 = vcombine.low %v8988_v12, %v8994_v59  ;;  %v3595_v40 = vcombine.high %v8911_v36, %v8911_v36  ;;  %v9027_v59 = vld.sshfl [vmem:[%s8448_s25 + $0x58] sm:$0x11 pattern:$0x75316420] }
  0x6d   : > { %11096 = vst [vmem:[#allocation59_spill] sm:$0xff] %v8998_v35  ;;  %11097 = vst [vmem:[#allocation60_spill] sm:$0xff] %v9001_v25  ;;  %v9011_v43 = vrot.slane %v756_v37, %v8402_v8  ;;  %v4127_v1 = vcombine.low %v4118_v18, %v8998_v35  ;;  %v786_v5 = vcombine.high %v9001_v25, %v9001_v25 }
  0x6e   : > { %11098 = vst [vmem:[#allocation61_spill] sm:$0xff] %v9005_v15  ;;  %v818_v6 = vcombine.high %v810_v23, %v810_v23  ;;  %v9019_v50 = vrot.slane %v810_v23, %v8402_v8  ;;  %7782 = vmatmul.mubr.msk.f32.gmra.mrb[10].mxu1 %vm1497_vm1, %v1286_v7  ;;  %v4134_v17 = vrot.slane %v4126_v38, %v8402_v8  ;;  %11100 = vst [vmem:[#allocation63_spill] sm:$0xff] %v9027_v59  ;;  %v3254_v38 = vld [vmem:[%s8448_s25 + $0x60] sm:$0xff] }
  0x6f   : > { %11099 = vst [vmem:[#allocation62_spill] sm:$0xff] %v9011_v43  ;;  %v788_v37 = vcombine.high %v9011_v43, %v9011_v43  ;;  %v1287_v47 = vcombine.low %v787_v48, %v9001_v25  ;;  %v3609_v36 = vrot.slane %v3595_v40, %v8402_v8  ;;  %v4141_v18 = vrot.slane %v4127_v1, %v8402_v8 }
  0x70   : > { %7784 = vmatprep.mubr.msk.f32.mxu1 %vm8313_vm0, %v11062_v20  ;;  %v9034_v23 = vrot.slane %v818_v6, %v8402_v8  ;;  %v1288_v7 = vcombine.low %v9011_v43, %v786_v5  ;;  %v3642_v35 = vcombine.high %v8965_v22, %v8965_v22  ;;  %v9054_v43 = vrot.slane %v9027_v59, %v8402_v8 }
  0x71   : > { %v1289_v48 = vcombine.low %v788_v37, %v9005_v15  ;;  %v9042_v12 = vrot.slane %v1287_v47, %v8402_v8  ;;  %v3611_v40 = vcombine.high %v3609_v36, %v3609_v36  ;;  %v9045_v1 = vrot.slane %v3609_v36, %v8402_v8 }
  0x72   : > { %11101 = vst [vmem:[#allocation64_spill] sm:$0xff] %v9034_v23  ;;  %v4142_v25 = vcombine.low %v4134_v17, %v4141_v18  ;;  %v1290_v6 = vcombine.low %v9019_v50, %v9034_v23  ;;  %v9050_v5 = vrot.slane %v1288_v7, %v8402_v8  ;;  %11105 = vst [vmem:[#allocation68_spill] sm:$0xff] %v9054_v43 }
  0x73   : > { %11102 = vst [vmem:[#allocation65_spill] sm:$0xff] %v9042_v12  ;;  %11103 = vst [vmem:[#allocation66_spill] sm:$0xff] %v9045_v1  ;;  %v9057_v37 = vrot.slane %v1289_v48, %v8402_v8  ;;  %v9060_v47 = vrot.slane %v3611_v40, %v8402_v8  ;;  %v3641_v36 = vcombine.high %v9045_v1, %v9045_v1  ;;  %v9071_v48 = vld.sshfl [vmem:[%s8407_s12 + $0x68] sm:$0x11 pattern:$0x75316420] }
  0x74   : > { %11104 = vst [vmem:[#allocation67_spill] sm:$0xff] %v9050_v5  ;;  %v3665_v17 = vrot.slane %v3254_v38, %v8402_v8  ;;  %7922 = vmatmul.mubr.msk.f32.gmra.mrb[10].mxu0 %vm1497_vm1, %v4142_v25  ;;  %v1318_v18 = vrot.slane %v1290_v6, %v8402_v8  ;;  %v1319_v7 = vcombine.low %v9042_v12, %v9050_v5  ;;  %11108 = vst [vmem:[#allocation71_spill] sm:$0xff] %v9071_v48 }
  0x75   : > { %11106 = vst [vmem:[#allocation69_spill] sm:$0xff] %v9057_v37  ;;  %11107 = vst [vmem:[#allocation70_spill] sm:$0xff] %v9060_v47  ;;  %v4143_v59 = vcombine.low %v3642_v35, %v9045_v1  ;;  %v803_v15 = vcombine.high %v399_v33, %v399_v33  ;;  %7924 = vmatprep.mubr.msk.f32.mxu0 %vm8313_vm0, %v11062_v20  ;;  %v3643_v40 = vcombine.high %v9060_v47, %v9060_v47 }
  0x76   : > { %v3673_v22 = vcombine.high %v3665_v17, %v3665_v17  ;;  %v9078_v25 = vrot.slane %v3665_v17, %v8402_v8  ;;  %v4144_v6 = vcombine.low %v9060_v47, %v3641_v36  ;;  %v1320_v5 = vcombine.low %v9057_v37, %v1318_v18 }
  0x77   : > { %v1327_v12 = vrot.slane %v1319_v7, %v8402_v8  ;;  %v9084_v35 = vrot.slane %v4143_v59, %v8402_v8  ;;  %v817_v33 = vrot.slane %v803_v15, %v8402_v8  ;;  %v4145_v39 = vcombine.low %v3643_v40, %v9054_v43 }
  0x78   : > { %11109 = vst [vmem:[#allocation72_spill] sm:$0xff] %v9078_v25  ;;  %v9088_v1 = vrot.slane %v3673_v22, %v8402_v8  ;;  %v9092_v17 = vrot.slane %v4144_v6, %v8402_v8  ;;  %v9097_v36 = vrot.slane %v9071_v48, %v8402_v8  ;;  %v1334_v18 = vrot.slane %v1320_v5, %v8402_v8  ;;  %v9114_v5 = vld.sshfl [vmem:[%s8448_s25 + $0x68] sm:$0x11 pattern:$0x75316420] }
  0x79   : > { %11110 = vst [vmem:[#allocation73_spill] sm:$0xff] %v9084_v35  ;;  %v819_v7 = vcombine.high %v817_v33, %v817_v33  ;;  %v9101_v59 = vrot.slane %v817_v33, %v8402_v8  ;;  %v873_v15 = vrot.slane %v401_v14, %v8402_v8  ;;  %v9107_v40 = vrot.slane %v4145_v39, %v8402_v8 }
  0x7a   : > { %11111 = vst [vmem:[#allocation74_spill] sm:$0xff] %v9088_v1  ;;  %11112 = vst [vmem:[#allocation75_spill] sm:$0xff] %v9092_v17  ;;  %v4146_v22 = vcombine.low %v9078_v25, %v9088_v1  ;;  %v4175_v6 = vcombine.low %v9084_v35, %v9092_v17  ;;  %v7504_v37 = vcombine.high %v9019_v50, %v9034_v23 }
  0x7b   : > { %11113 = vst [vmem:[#allocation76_spill] sm:$0xff] %v9097_v36  ;;  %11114 = vst [vmem:[#allocation77_spill] sm:$0xff] %v9101_v59  ;;  %v1335_v48 = vcombine.low %v1327_v12, %v1334_v18  ;;  %v9117_v33 = vrot.slane %v819_v7, %v8402_v8  ;;  %v881_v43 = vcombine.high %v873_v15, %v873_v15 }
  0x7c   : > { %11115 = vst [vmem:[#allocation78_spill] sm:$0xff] %v9107_v40  ;;  %11116 = vst [vmem:[#allocation79_spill] sm:$0xff] %v9114_v5  ;;  %v9120_v47 = vrot.slane %v873_v15, %v8402_v8  ;;  %v4174_v39 = vrot.slane %v4146_v22, %v8402_v8  ;;  %v4183_v26 = vrot.slane %v4175_v6, %v8402_v8  ;;  %v3256_v15 = vld [vmem:[%s8448_s25 + $0x70] sm:$0xff] }
  0x7d   : > { %11117 = vst [vmem:[#allocation80_spill] sm:$0xff] %v9117_v33  ;;  %v9125_v13 = vrot.slane %v7504_v37, %v8402_v8  ;;  %v3658_v17 = vcombine.high %v3254_v38, %v3254_v38  ;;  %7785 = vmatmul.mubr.msk.f32.gmra.mrb[12].mxu1 %vm1497_vm1, %v1335_v48  ;;  %v1337_v12 = vcombine.low %v9101_v59, %v9117_v33 }
  0x7e   : > { %11118 = vst [vmem:[#allocation81_spill] sm:$0xff] %v9120_v47  ;;  %v7505_v18 = vcombine.high %v9101_v59, %v9117_v33  ;;  %v1339_v7 = vcombine.low %v9097_v36, %v9120_v47  ;;  %v9137_v22 = vrot.slane %v9114_v5, %v8402_v8  ;;  %v4176_v37 = vcombine.low %v9107_v40, %v4174_v39 }
  0x7f   : > { %11119 = vst [vmem:[#allocation82_spill] sm:$0xff] %v9125_v13  ;;  %7787 = vmatprep.mubr.msk.f32.mxu1 %vm8313_vm0, %v11062_v20  ;;  %v3672_v38 = vrot.slane %v3658_v17, %v8402_v8  ;;  %v3728_v48 = vrot.slane %v3256_v15, %v8402_v8  ;;  %v7582_v6 = vcombine.high %v9078_v25, %v9088_v1 }
  0x80   : > { %11120 = vst [vmem:[#allocation83_spill] sm:$0xff] %v9137_v22  ;;  %v9147_v35 = vrot.slane %v1337_v12, %v8402_v8  ;;  %v9150_v36 = vrot.slane %v7505_v18, %v8402_v8  ;;  %v1367_v5 = vrot.slane %v1339_v7, %v8402_v8  ;;  %v866_v39 = vcombine.high %v401_v14, %v401_v14 }
  0x81   : > { %v4190_v40 = vrot.slane %v4176_v37, %v8402_v8  ;;  %v3674_v33 = vcombine.high %v3672_v38, %v3672_v38  ;;  %v9155_v17 = vrot.slane %v3672_v38, %v8402_v8  ;;  %v3736_v59 = vcombine.high %v3728_v48, %v3728_v48  ;;  %v9170_v37 = vld.sshfl [vmem:[%s8407_s12 + $0x78] sm:$0x11 pattern:$0x75316420] }
  0x82   : > { %11121 = vst [vmem:[#allocation84_spill] sm:$0xff] %v9147_v35  ;;  %11122 = vst [vmem:[#allocation85_spill] sm:$0xff] %v9150_v36  ;;  %v1368_v23 = vcombine.low %v9125_v13, %v9147_v35  ;;  %v1369_v1 = vcombine.low %v9150_v36, %v1367_v5  ;;  %v9161_v12 = vrot.slane %v3728_v48, %v8402_v8 }
  0x83   : > { %v9164_v18 = vrot.slane %v7582_v6, %v8402_v8  ;;  %v4191_v7 = vcombine.low %v4183_v26, %v4190_v40  ;;  %v9167_v14 = vrot.slane %v3674_v33, %v8402_v8  ;;  %11125 = vst [vmem:[#allocation88_spill] sm:$0xff] %v9170_v37  ;;  %v880_v38 = vrot.slane %v866_v39, %v8402_v8 }
  0x84   : > { %11123 = vst [vmem:[#allocation86_spill] sm:$0xff] %v9161_v12  ;;  %v9174_v25 = vrot.slane %v881_v43, %v8402_v8  ;;  %v1376_v35 = vrot.slane %v1368_v23, %v8402_v8  ;;  %v1383_v5 = vrot.slane %v1369_v1, %v8402_v8  ;;  %v4195_v48 = vcombine.low %v9137_v22, %v9161_v12 }
  0x85   : > { %11124 = vst [vmem:[#allocation87_spill] sm:$0xff] %v9164_v18  ;;  %v911_v26 = vcombine.high %v9120_v47, %v9120_v47  ;;  %7925 = vmatmul.mubr.msk.f32.gmra.mrb[12].mxu0 %vm1497_vm1, %v4191_v7  ;;  %v4193_v40 = vcombine.low %v9155_v17, %v9167_v14  ;;  %v7583_v33 = vcombine.high %v9155_v17, %v9167_v14 }
  0x86   : > { %v882_v43 = vcombine.high %v880_v38, %v880_v38  ;;  %v9188_v6 = vrot.slane %v880_v38, %v8402_v8  ;;  %v1384_v23 = vcombine.low %v1376_v35, %v1383_v5  ;;  %7927 = vmatprep.mubr.msk.f32.mxu0 %vm8313_vm0, %v11062_v20  ;;  %v4223_v1 = vrot.slane %v4195_v48, %v8402_v8 }
  0x87   : > { %v913_v39 = vcombine.high %v9174_v25, %v9174_v25  ;;  %v9197_v7 = vrot.slane %v9170_v37, %v8402_v8  ;;  %v9200_v36 = vrot.slane %v4193_v40, %v8402_v8  ;;  %v9203_v38 = vrot.slane %v7583_v33, %v8402_v8 }
  0x88   : > { %11126 = vst [vmem:[#allocation89_spill] sm:$0xff] %v9188_v6  ;;  %v9206_v35 = vrot.slane %v882_v43, %v8402_v8  ;;  %v912_v5 = vcombine.high %v9188_v6, %v9188_v6  ;;  %7788 = vmatmul.mubr.msk.f32.gmra.mrb[14].mxu1 %vm1497_vm1, %v1384_v23  ;;  %v1385_v48 = vcombine.low %v9174_v25, %v911_v26 }
  0x89   : > { %11127 = vst [vmem:[#allocation90_spill] sm:$0xff] %v9197_v7  ;;  %11128 = vst [vmem:[#allocation91_spill] sm:$0xff] %v9200_v36  ;;  %v1386_v13 = vcombine.low %v913_v39, %v9188_v6  ;;  %v3721_v47 = vcombine.high %v3256_v15, %v3256_v15  ;;  %v9214_v40 = vrot.slane %v3736_v59, %v8402_v8  ;;  %7790 = vmatprep.mubr.msk.f32.mxu1 %vm8313_vm0, %v11062_v20  ;;  %v9231_v15 = vld.sshfl [vmem:[%s8448_s25 + $0x78] sm:$0x11 pattern:$0x75316420] }
  0x8a   : > { %11129 = vst [vmem:[#allocation92_spill] sm:$0xff] %v9203_v38  ;;  %11130 = vst [vmem:[#allocation93_spill] sm:$0xff] %v9206_v35  ;;  %v4224_v33 = vcombine.low %v9164_v18, %v9200_v36  ;;  %v4225_v37 = vcombine.low %v9203_v38, %v4223_v1  ;;  %v914_v43 = vcombine.high %v9206_v35, %v9206_v35 }
  0x8b   : > { %11131 = vst [vmem:[#allocation94_spill] sm:$0xff] %v9214_v40  ;;  %v1387_v26 = vcombine.low %v9206_v35, %v912_v5  ;;  %v9225_v23 = vrot.slane %v1385_v48, %v8402_v8  ;;  %v9228_v59 = vrot.slane %v1386_v13, %v8402_v8  ;;  %11134 = vst [vmem:[#allocation97_spill] sm:$0xff] %v9231_v15 }
  0x8c   : > { %v3735_v1 = vrot.slane %v3721_v47, %v8402_v8  ;;  %v3766_v39 = vcombine.high %v9161_v12, %v9161_v12  ;;  %v4232_v36 = vrot.slane %v4224_v33, %v8402_v8  ;;  %v4239_v38 = vrot.slane %v4225_v37, %v8402_v8  ;;  %v403_v12 = vld [vmem:[%s8407_s12 + $0x80] sm:$0xff] }
  0x8d   : > { %11132 = vst [vmem:[#allocation95_spill] sm:$0xff] %v9225_v23  ;;  %11133 = vst [vmem:[#allocation96_spill] sm:$0xff] %v9228_v59  ;;  %v1388_v5 = vcombine.low %v914_v43, %v9197_v7  ;;  %v9240_v48 = vrot.slane %v1387_v26, %v8402_v8  ;;  %v1417_v13 = vcombine.low %v9225_v23, %v9228_v59  ;;  %v3258_v26 = vld [vmem:[%s8448_s25 + $0x80] sm:$0xff] }
  0x8e   : > { %v3737_v18 = vcombine.high %v3735_v1, %v3735_v1  ;;  %v9245_v6 = vrot.slane %v3735_v1, %v8402_v8  ;;  %v3768_v47 = vcombine.high %v9214_v40, %v9214_v40  ;;  %v4240_v35 = vcombine.low %v4232_v36, %v4239_v38 }
  0x8f   : > { %11135 = vst [vmem:[#allocation98_spill] sm:$0xff] %v9240_v48  ;;  %v9251_v33 = vrot.slane %v1388_v5, %v8402_v8  ;;  %v9255_v37 = vrot.slane %v9231_v15, %v8402_v8  ;;  %v4241_v43 = vcombine.low %v9214_v40, %v3766_v39  ;;  %v1425_v59 = vrot.slane %v1417_v13, %v8402_v8 }
  0x90   : > { %11136 = vst [vmem:[#allocation99_spill] sm:$0xff] %v9245_v6  ;;  %v9261_v1 = vrot.slane %v3737_v18, %v8402_v8  ;;  %v3767_v23 = vcombine.high %v9245_v6, %v9245_v6  ;;  %v4242_v36 = vcombine.low %v3768_v47, %v9245_v6  ;;  %7928 = vmatmul.mubr.msk.f32.gmra.mrb[14].mxu0 %vm1497_vm1, %v4240_v35 }
  0x91   : > { %11137 = vst [vmem:[#allocation100_spill] sm:$0xff] %v9251_v33  ;;  %11138 = vst [vmem:[#allocation101_spill] sm:$0xff] %v9255_v37  ;;  %v1418_v38 = vcombine.low %v9240_v48, %v9251_v33  ;;  %v9270_v5 = vrot.slane %v4241_v43, %v8402_v8  ;;  %v929_v39 = vcombine.high %v403_v12, %v403_v12  ;;  %7930 = vmatprep.mubr.msk.f32.mxu0 %vm8313_vm0, %v11062_v20 }
  0x92   : > { %11139 = vst [vmem:[#allocation102_spill] sm:$0xff] %v9261_v1  ;;  %v936_v15 = vrot.slane %v403_v12, %v8402_v8  ;;  %v3769_v18 = vcombine.high %v9261_v1, %v9261_v1  ;;  %v4243_v13 = vcombine.low %v9261_v1, %v3767_v23  ;;  %v9279_v47 = vrot.slane %v4242_v36, %v8402_v8 }
  0x93   : > { %11140 = vst [vmem:[#allocation103_spill] sm:$0xff] %v9270_v5  ;;  %v3784_v35 = vcombine.high %v3258_v26, %v3258_v26  ;;  %v1432_v33 = vrot.slane %v1418_v38, %v8402_v8  ;;  %v943_v43 = vrot.slane %v929_v39, %v8402_v8  ;;  %v3791_v36 = vrot.slane %v3258_v26, %v8402_v8 }
  0x94   : > { %11141 = vst [vmem:[#allocation104_spill] sm:$0xff] %v9279_v47  ;;  %v944_v48 = vcombine.high %v936_v15, %v936_v15  ;;  %v9284_v6 = vrot.slane %v936_v15, %v8402_v8  ;;  %v4244_v12 = vcombine.low %v3769_v18, %v9255_v37  ;;  %v9288_v7 = vrot.slane %v4243_v13, %v8402_v8 }
  0x95   : > { %v4273_v23 = vcombine.low %v9270_v5, %v9279_v47  ;;  %v1433_v1 = vcombine.low %v1425_v59, %v1432_v33  ;;  %v945_v40 = vcombine.high %v943_v43, %v943_v43  ;;  %v9294_v38 = vrot.slane %v943_v43, %v8402_v8 }
  0x96   : > { %11142 = vst [vmem:[#allocation105_spill] sm:$0xff] %v9288_v7  ;;  %v9297_v39 = vrot.slane %v944_v48, %v8402_v8  ;;  %v9300_v15 = vrot.slane %v4244_v12, %v8402_v8  ;;  %v3798_v13 = vrot.slane %v3784_v35, %v8402_v8  ;;  %v3799_v37 = vcombine.high %v3791_v36, %v3791_v36  ;;  %v9326_v12 = vld.sshfl [vmem:[%s8407_s12 + $0x88] sm:$0x11 pattern:$0x75316420] }
  0x97   : > { %11143 = vst [vmem:[#allocation106_spill] sm:$0xff] %v9294_v38  ;;  %v4281_v18 = vrot.slane %v4273_v23, %v8402_v8  ;;  %7791 = vmatmul.mubr.msk.f32.gmra.mrb[16].mxu1 %vm1497_vm1, %v1433_v1  ;;  %v9306_v59 = vrot.slane %v945_v40, %v8402_v8  ;;  %v9313_v26 = vrot.slane %v3791_v36, %v8402_v8  ;;  %11150 = vst [vmem:[#allocation113_spill] sm:$0xff] %v9326_v12 }
  0x98   : > { %11144 = vst [vmem:[#allocation107_spill] sm:$0xff] %v9297_v39  ;;  %11145 = vst [vmem:[#allocation108_spill] sm:$0xff] %v9300_v15  ;;  %v1434_v33 = vcombine.low %v9284_v6, %v9297_v39  ;;  %v7506_v48 = vcombine.high %v9284_v6, %v9297_v39  ;;  %v4274_v43 = vcombine.low %v9288_v7, %v9300_v15  ;;  %7793 = vmatprep.mubr.msk.f32.mxu1 %vm8313_vm0, %v11062_v20 }
  0x99   : > { %11146 = vst [vmem:[#allocation109_spill] sm:$0xff] %v9306_v59  ;;  %11147 = vst [vmem:[#allocation110_spill] sm:$0xff] %v9313_v26  ;;  %v3800_v35 = vcombine.high %v3798_v13, %v3798_v13  ;;  %v9320_v40 = vrot.slane %v3798_v13, %v8402_v8  ;;  %v9323_v1 = vrot.slane %v3799_v37, %v8402_v8 }
  0x9a   : > { %v1436_v23 = vcombine.low %v9294_v38, %v9306_v59  ;;  %v7507_v36 = vcombine.high %v9294_v38, %v9306_v59  ;;  %v1444_v15 = vrot.slane %v1434_v33, %v8402_v8  ;;  %v9334_v47 = vrot.slane %v7506_v48, %v8402_v8 }
  0x9b   : > { %11148 = vst [vmem:[#allocation111_spill] sm:$0xff] %v9320_v40  ;;  %11149 = vst [vmem:[#allocation112_spill] sm:$0xff] %v9323_v1  ;;  %v4288_v7 = vrot.slane %v4274_v43, %v8402_v8  ;;  %v9338_v13 = vrot.slane %v3800_v35, %v8402_v8  ;;  %v4290_v37 = vcombine.low %v9313_v26, %v9323_v1  ;;  %v9356_v43 = vld.sshfl [vmem:[%s8448_s25 + $0x88] sm:$0x11 pattern:$0x75316420] }
  0x9c   : > { %11151 = vst [vmem:[#allocation114_spill] sm:$0xff] %v9334_v47  ;;  %v7584_v5 = vcombine.high %v9313_v26, %v9323_v1  ;;  %v9345_v39 = vrot.slane %v1436_v23, %v8402_v8  ;;  %v9348_v59 = vrot.slane %v7507_v36, %v8402_v8  ;;  %v1466_v33 = vcombine.low %v1444_v15, %v9334_v47 }
  0x9d   : > { %11152 = vst [vmem:[#allocation115_spill] sm:$0xff] %v9338_v13  ;;  %v9353_v48 = vrot.slane %v9326_v12, %v8402_v8  ;;  %11156 = vst [vmem:[#allocation119_spill] sm:$0xff] %v9356_v43  ;;  %v4289_v35 = vcombine.low %v4281_v18, %v4288_v7  ;;  %v4292_v38 = vcombine.low %v9320_v40, %v9338_v13 }
  0x9e   : > { %11153 = vst [vmem:[#allocation116_spill] sm:$0xff] %v9345_v39  ;;  %11154 = vst [vmem:[#allocation117_spill] sm:$0xff] %v9348_v59  ;;  %v7585_v1 = vcombine.high %v9320_v40, %v9338_v13  ;;  %v4300_v23 = vrot.slane %v4290_v37, %v8402_v8  ;;  %v1467_v36 = vcombine.low %v9345_v39, %v9348_v59 }
  0x9f   : > { %11155 = vst [vmem:[#allocation118_spill] sm:$0xff] %v9353_v48  ;;  %v1474_v15 = vrot.slane %v1466_v33, %v8402_v8  ;;  %v9367_v47 = vrot.slane %v7584_v5, %v8402_v8  ;;  %v1489_v12 = vrot.slane %v9353_v48, %v8402_v8  ;;  %7931 = vmatmul.mubr.msk.f32.gmra.mrb[16].mxu0 %vm1497_vm1, %v4289_v35 }
  0xa0   : > { %v9373_v7 = vrot.slane %v4292_v38, %v8402_v8  ;;  %v9376_v18 = vrot.slane %v7585_v1, %v8402_v8  ;;  %v9380_v37 = vrot.slane %v9356_v43, %v8402_v8  ;;  %v471_v33 = vcombine.high %v8437_v27, %v8437_v27  ;;  %7933 = vmatprep.mubr.msk.f32.mxu0 %vm8313_vm0, %v11062_v20 }
  0xa1   : > { %11157 = vst [vmem:[#allocation120_spill] sm:$0xff] %v9367_v47  ;;  %v1481_v5 = vrot.slane %v1467_v36, %v8402_v8  ;;  %v4322_v35 = vcombine.low %v4300_v23, %v9367_v47  ;;  %v1496_v38 = vrot.slane %v1489_v12, %v8402_v8  ;;  %v472_v1 = vcombine.high %v8440_v28, %v8440_v28 }
  0xa2   : > { %11158 = vst [vmem:[#allocation121_spill] sm:$0xff] %v9373_v7  ;;  %11159 = vst [vmem:[#allocation122_spill] sm:$0xff] %v9376_v18  ;;  %v4323_v59 = vcombine.low %v9373_v7, %v9376_v18  ;;  %v4345_v39 = vrot.slane %v9380_v37, %v8402_v8  ;;  %v11161_v43 = vcombine.high %v8419_v19, %v8419_v19 }
  0xa3   : > { %11160 = vst [vmem:[#allocation123_spill] sm:$0xff] %v9380_v37  ;;  %v1727_v13 = vcombine.low %v8459_v34, %v471_v33  ;;  %v1482_v40 = vcombine.low %v1474_v15, %v1481_v5  ;;  %v4330_v23 = vrot.slane %v4322_v35, %v8402_v8  ;;  %v1726_v12 = vcombine.low %v472_v1, %v8437_v27 }
  0xa4   : > { %v1725_v36 = vcombine.low %v8440_v28, %v11161_v43  ;;  %v3326_v47 = vcombine.high %v8491_v56, %v8491_v56  ;;  %v4337_v18 = vrot.slane %v4323_v59, %v8402_v8  ;;  %v4352_v7 = vrot.slane %v4345_v39, %v8402_v8 }
  0xa5   : > { %v1749_v19 = vrot.slane %v1727_v13, %v8402_v8  ;;  %7794 = vmatmul.mubr.msk.f32.gmra.mrb[18].mxu1 %vm1497_vm1, %v1482_v40  ;;  %v1742_v28 = vrot.slane %v1726_v12, %v8402_v8  ;;  %v3327_v34 = vcombine.high %v8494_v57, %v8494_v57  ;;  %v11162_v27 = vcombine.high %v8482_v49, %v8482_v49 }
  0xa6   : > { %v1735_v37 = vrot.slane %v1725_v36, %v8402_v8  ;;  %v4582_v59 = vcombine.low %v8504_v63, %v3326_v47  ;;  %v4338_v15 = vcombine.low %v4330_v23, %v4337_v18  ;;  %7796 = vmatprep.mubr.msk.f32.mxu1 %vm8313_vm0, %v11062_v20  ;;  %v11163_v39 = vrot.slane %v8554_v45, %v8402_v8 }
  0xa7   : > { %v4580_v43 = vcombine.low %v8494_v57, %v11162_v27  ;;  %v11164_v13 = vcombine.high %v8411_v10, %v8411_v10  ;;  %v7520_v49 = vcombine.high %v8432_v24, %v8454_v32  ;;  %v4581_v57 = vcombine.low %v3327_v34, %v8491_v56 }
  0xa8   : > { %v1758_v40 = vcombine.low %v1749_v19, %v11163_v39  ;;  %v1757_v5 = vcombine.low %v1735_v37, %v1742_v28  ;;  %v4604_v47 = vrot.slane %v4582_v59, %v8402_v8  ;;  %7934 = vmatmul.mubr.msk.f32.gmra.mrb[18].mxu0 %vm1497_vm1, %v4338_v15  ;;  %v1776_v10 = vcombine.low %v8451_v31, %v8470_v41  ;;  %v7540_v19 = vld [vmem:[%s10824_s2 + $0x10] sm:$0xff]  ;;  %v8267_v59 = vld.sshfl [vmem:[%s8448_s25 + $0x8] sm:$0x11 pattern:$0x75316420] }
  0xa9   : > { %v1658_v33 = vrot.slane %v11164_v13, %v8402_v8  ;;  %v4590_v63 = vrot.slane %v4580_v43, %v8402_v8  ;;  %v7521_v35 = vcombine.high %v8451_v31, %v8470_v41  ;;  %7797 = vmatmul.mubr.msk.f32.gmra.mrb[20].mxu1 %vm1497_vm1, %v1496_v38  ;;  %7936 = vmatprep.mubr.msk.f32.mxu0 %vm8313_vm0, %v11062_v20 }
  0xaa   : > { %v1772_v45 = vrot.slane %v1758_v40, %v8402_v8  ;;  %v1765_v56 = vrot.slane %v1757_v5, %v8402_v8  ;;  %v4597_v37 = vrot.slane %v4581_v57, %v8402_v8  ;;  %v11165_v1 = vrot.slane %v8571_v60, %v8402_v8  ;;  %7801 = vmatprep.mubr.msk.f32.mxu1 %vm8313_vm0, %v11062_v20  ;;  %v7618_v5 = vld [vmem:[%s10824_s2 + $0x30] sm:$0xff] }
  0xab   : > { %v1774_v18 = vcombine.low %v1658_v33, %v8454_v32  ;;  %v1791_v31 = vrot.slane %v7520_v49, %v8402_v8  ;;  %v1798_v41 = vrot.slane %v1776_v10, %v8402_v8  ;;  %v1805_v38 = vrot.slane %v7521_v35, %v8402_v8 }
  0xac   : > { %v4613_v36 = vcombine.low %v4604_v47, %v11165_v1  ;;  %v1773_v12 = vcombine.low %v1765_v56, %v1772_v45  ;;  %v4612_v28 = vcombine.low %v4590_v63, %v4597_v37  ;;  %v2449_v34 = vcombine.low %v8432_v24, %v8454_v32  ;;  %7937 = vmatmul.mubr.msk.f32.gmra.mrb[20].mxu0 %vm1497_vm1, %v4352_v7 }
  0xad   : > { %v1784_v23 = vrot.slane %v1774_v18, %v8402_v8  ;;  %v1807_v43 = vcombine.low %v1798_v41, %v1805_v38  ;;  %v4506_v15 = vcombine.high %v8267_v59, %v8267_v59  ;;  %v7598_v39 = vcombine.high %v8566_v54, %v8582_v3  ;;  %7941 = vmatprep.mubr.msk.f32.mxu0 %vm8313_vm0, %v11062_v20 }
  0xae   : > { %v4627_v60 = vrot.slane %v4613_v36, %v8402_v8  ;;  %7802 = vmatmul.mubr.msk.f32.vlgmr.msra.gmra.mrb[0].mxu1 %vm1497_vm1, %v1773_v12  ;;  %v4620_v40 = vrot.slane %v4612_v28, %v8402_v8  ;;  %v2456_v13 = vrot.slane %v2449_v34, %v8402_v8  ;;  %v4631_v24 = vcombine.low %v8579_v2, %v8599_v11 }
  0xaf   : > { %v1806_v27 = vcombine.low %v1784_v23, %v1791_v31  ;;  %7835 = vmatpush3.msra.mxu1 %v7540_v19  ;;  %7804 = vmatprep.mubr.msk.f32.mxu1 %vm8313_vm0, %v11062_v20  ;;  %v9473_v7 = vrot.slane %v1807_v43, %v8402_v8  ;;  %v4513_v33 = vrot.slane %v4506_v15, %v8402_v8 }
  0xb0   : > { %v4628_v49 = vcombine.low %v4620_v40, %v4627_v60  ;;  %v2457_v57 = vcombine.low %v2456_v13, %v1791_v31  ;;  %v7599_v63 = vcombine.high %v8579_v2, %v8599_v11  ;;  %v4646_v47 = vrot.slane %v7598_v39, %v8402_v8  ;;  %7869 = vmatprep.subr.mxu1 %v11062_v20  ;;  %v8268_v31 = vld.sshfl [vmem:[%s8407_s12 + $0x18] sm:$0x11 pattern:$0x75316420] }
  0xb1   : > { %v1814_v32 = vrot.slane %v1806_v27, %v8402_v8  ;;  %v4629_v18 = vcombine.low %v4513_v33, %v8582_v3  ;;  %v4653_v10 = vrot.slane %v4631_v24, %v8402_v8  ;;  %v5304_v35 = vcombine.low %v8566_v54, %v8582_v3 }
  0xb2   : > { %7942 = vmatmul.mubr.msk.f32.vlgmr.msra.gmra.mrb[0].mxu0 %vm1497_vm1, %v4628_v49  ;;  %v9490_v56 = vrot.slane %v2457_v57, %v8402_v8  ;;  %v4660_v2 = vrot.slane %v7599_v63, %v8402_v8  ;;  %v596_v11 = vcombine.high %v8575_v62, %v8575_v62  ;;  %v597_v37 = vcombine.high %v8591_v58, %v8591_v58 }
  0xb3   : > { %v1822_v45 = vcombine.low %v1814_v32, %v9473_v7  ;;  %7975 = vmatpush3.msra.mxu0 %v7618_v5  ;;  %v4639_v1 = vrot.slane %v4629_v18, %v8402_v8  ;;  %v5311_v54 = vrot.slane %v5304_v35, %v8402_v8  ;;  %v598_v3 = vcombine.high %v8594_v9, %v8594_v9  ;;  %v8269_v5 = vld.sshfl [vmem:[%s8448_s25 + $0x18] sm:$0x11 pattern:$0x75316420] }
  0xb4   : > { %7944 = vmatprep.mubr.msk.f32.mxu0 %vm8313_vm0, %v11062_v20  ;;  %v4662_v23 = vcombine.low %v4653_v10, %v4660_v2  ;;  %v1659_v41 = vcombine.high %v8268_v31, %v8268_v31  ;;  %v1824_v19 = vcombine.low %v8594_v9, %v596_v11  ;;  %8009 = vmatprep.subr.mxu0 %v11062_v20 }
  0xb5   : > { %7805 = vmatmul.mubr.msk.f32.gmra.mrb[2].mxu1 %vm1497_vm1, %v1822_v45  ;;  %v4661_v38 = vcombine.low %v4639_v1, %v4646_v47  ;;  %v5312_v12 = vcombine.low %v5311_v54, %v4646_v47  ;;  %v1825_v28 = vcombine.low %v598_v3, %v8591_v58  ;;  %v1826_v27 = vcombine.low %v8608_v16, %v597_v37  ;;  %v8270_v37 = vld.sshfl [vmem:[%s8407_s12 + $0x28] sm:$0x11 pattern:$0x75316420] }
  0xb6   : > { %7807 = vmatprep.mubr.msk.f32.mxu1 %vm8313_vm0, %v11062_v20  ;;  %v9513_v60 = vrot.slane %v4662_v23, %v8402_v8  ;;  %v9516_v34 = vrot.slane %v1659_v41, %v8402_v8  ;;  %v3451_v43 = vcombine.high %v8667_v21, %v8667_v21  ;;  %v9526_v58 = vrot.slane %v1824_v19, %v8402_v8 }
  0xb7   : > { %v4669_v59 = vrot.slane %v4661_v38, %v8402_v8  ;;  %v9523_v15 = vrot.slane %v5312_v12, %v8402_v8  ;;  %v1847_v39 = vrot.slane %v1825_v28, %v8402_v8  ;;  %v1854_v13 = vrot.slane %v1826_v27, %v8402_v8 }
  0xb8   : > { %11166 = vst [vmem:[#allocation124_spill] sm:$0xff] %v9513_v60  ;;  %11167 = vst [vmem:[#allocation125_spill] sm:$0xff] %v9516_v34  ;;  %v1823_v40 = vcombine.low %v8443_v29, %v9516_v34  ;;  %v3452_v24 = vcombine.high %v8675_v46, %v8675_v46  ;;  %v3453_v32 = vcombine.high %v8678_v52, %v8678_v52 }
  0xb9   : > { %11168 = vst [vmem:[#allocation126_spill] sm:$0xff] %v9523_v15  ;;  %v4677_v33 = vcombine.low %v4669_v59, %v9513_v60  ;;  %v4514_v57 = vcombine.high %v8269_v5, %v8269_v5  ;;  %v4679_v63 = vcombine.low %v8678_v52, %v3451_v43  ;;  %v1856_v45 = vcombine.low %v1847_v39, %v1854_v13  ;;  %v11206_v52 = vld [vmem:[#allocation60_spill] sm:$0xff]  ;;  %v11215_v60 = vld [vmem:[#allocation66_spill] sm:$0xff] }
  0xba   : > { %v1833_v47 = vrot.slane %v1823_v40, %v8402_v8  ;;  %v4680_v18 = vcombine.low %v3453_v32, %v8675_v46  ;;  %v4681_v10 = vcombine.low %v8685_v42, %v3452_v24  ;;  %v599_v11 = vcombine.high %v8608_v16, %v8608_v16 }
  0xbb   : > { %7945 = vmatmul.mubr.msk.f32.gmra.mrb[2].mxu0 %vm1497_vm1, %v4677_v33  ;;  %v9546_v35 = vrot.slane %v4514_v57, %v8402_v8  ;;  %v9549_v2 = vrot.slane %v4679_v63, %v8402_v8  ;;  %v1667_v1 = vcombine.high %v8270_v37, %v8270_v37  ;;  %v9556_v3 = vrot.slane %v1856_v45, %v8402_v8  ;;  %v8271_v33 = vld.sshfl [vmem:[%s8448_s25 + $0x28] sm:$0x11 pattern:$0x75316420]  ;;  %v11174_v37 = vld [vmem:[#allocation21_spill] sm:$0xff] }
  0xbc   : > { %v1855_v54 = vcombine.low %v1833_v47, %v9526_v58  ;;  %7947 = vmatprep.mubr.msk.f32.mxu0 %vm8313_vm0, %v11062_v20  ;;  %v4702_v46 = vrot.slane %v4680_v18, %v8402_v8  ;;  %v4709_v23 = vrot.slane %v4681_v10, %v8402_v8  ;;  %v1872_v41 = vcombine.low %v599_v11, %v8688_v61  ;;  %v11171_v47 = vld [vmem:[#allocation20_spill] sm:$0xff]  ;;  %v11173_v11 = vld [vmem:[#allocation30_spill] sm:$0xff] }
  0xbd   : > { %11169 = vst [vmem:[#allocation127_spill] sm:$0xff] %v9546_v35  ;;  %v4678_v31 = vcombine.low %v8647_v51, %v9546_v35  ;;  %v9565_v16 = vrot.slane %v1667_v1, %v8402_v8  ;;  %v7522_v38 = vcombine.high %v8709_v30, %v8729_v0  ;;  %v1875_v28 = vcombine.low %v8726_v55, %v8796_v44 }
  0xbe   : > { %v1863_v12 = vrot.slane %v1855_v54, %v8402_v8  ;;  %v4711_v19 = vcombine.low %v4702_v46, %v4709_v23  ;;  %v3454_v27 = vcombine.high %v8685_v42, %v8685_v42  ;;  %v9579_v39 = vrot.slane %v1872_v41, %v8402_v8  ;;  %v11175_v54 = vld [vmem:[#allocation29_spill] sm:$0xff] }
  0xbf   : > { %11170 = vst [vmem:[#allocation128_spill] sm:$0xff] %v9565_v16  ;;  %v4688_v43 = vrot.slane %v4678_v31, %v8402_v8  ;;  %v1873_v59 = vcombine.low %v9565_v16, %v8729_v0  ;;  %v1896_v40 = vrot.slane %v7522_v38, %v8402_v8  ;;  %v1903_v32 = vrot.slane %v1875_v28, %v8402_v8  ;;  %v11199_v16 = vld [vmem:[#allocation55_spill] sm:$0xff] }
  0xc0   : > { %v1871_v13 = vcombine.low %v1863_v12, %v9556_v3  ;;  %v9584_v24 = vrot.slane %v4711_v19, %v8402_v8  ;;  %v4522_v5 = vcombine.high %v8271_v33, %v8271_v33  ;;  %v4727_v63 = vcombine.low %v3454_v27, %v8720_v53  ;;  %v11176_v27 = vld [vmem:[#allocation31_spill] sm:$0xff] }
  0xc1   : > { %v4710_v42 = vcombine.low %v4688_v43, %v9549_v2  ;;  %v1889_v57 = vrot.slane %v1873_v59, %v8402_v8  ;;  %v7600_v45 = vcombine.high %v11171_v47, %v8760_v4  ;;  %v1905_v18 = vcombine.low %v1896_v40, %v1903_v32 }
  0xc2   : > { %7808 = vmatmul.mubr.msk.f32.gmra.mrb[4].mxu1 %vm1497_vm1, %v1871_v13  ;;  %v9595_v10 = vrot.slane %v4522_v5, %v8402_v8  ;;  %v4730_v1 = vcombine.low %v11174_v37, %v11173_v11  ;;  %v722_v46 = vcombine.high %v11175_v54, %v11175_v54  ;;  %v9606_v41 = vrot.slane %v4727_v63, %v8402_v8  ;;  %v11177_v13 = vld [vmem:[#allocation23_spill] sm:$0xff]  ;;  %v11178_v63 = vld [vmem:[#allocation45_spill] sm:$0xff] }
  0xc3   : > { %v4718_v23 = vrot.slane %v4710_v42, %v8402_v8  ;;  %7810 = vmatprep.mubr.msk.f32.mxu1 %vm8313_vm0, %v11062_v20  ;;  %v1904_v31 = vcombine.low %v9579_v39, %v1889_v57  ;;  %v4751_v38 = vrot.slane %v7600_v45, %v8402_v8  ;;  %v9610_v12 = vrot.slane %v1905_v18, %v8402_v8 }
  0xc4   : > { %11172 = vst [vmem:[#allocation20_spill] sm:$0xff] %v9595_v10  ;;  %v4728_v19 = vcombine.low %v9595_v10, %v8760_v4  ;;  %v4758_v28 = vrot.slane %v4730_v1, %v8402_v8  ;;  %v724_v43 = vcombine.high %v11176_v27, %v11176_v27  ;;  %v1675_v32 = vcombine.high %v11177_v13, %v11177_v13  ;;  %v11183_v13 = vld [vmem:[#allocation27_spill] sm:$0xff] }
  0xc5   : > { %v4726_v59 = vcombine.low %v4718_v23, %v9584_v24  ;;  %v1912_v40 = vrot.slane %v1904_v31, %v8402_v8  ;;  %v7523_v33 = vcombine.high %v8726_v55, %v8796_v44  ;;  %v1923_v57 = vcombine.low %v11176_v27, %v722_v46  ;;  %v11180_v31 = vld [vmem:[#allocation36_spill] sm:$0xff]  ;;  %v11192_v27 = vld [vmem:[#allocation42_spill] sm:$0xff] }
  0xc6   : > { %v4744_v5 = vrot.slane %v4728_v19, %v8402_v8  ;;  %v4760_v42 = vcombine.low %v4751_v38, %v4758_v28  ;;  %v1924_v45 = vcombine.low %v724_v43, %v11178_v63  ;;  %v9629_v1 = vrot.slane %v1675_v32, %v8402_v8  ;;  %v11181_v28 = vld [vmem:[#allocation25_spill] sm:$0xff] }
  0xc7   : > { %7948 = vmatmul.mubr.msk.f32.gmra.mrb[4].mxu0 %vm1497_vm1, %v4726_v59  ;;  %v1920_v18 = vcombine.low %v1912_v40, %v9610_v12  ;;  %v9632_v23 = vrot.slane %v7523_v33, %v8402_v8  ;;  %v3577_v44 = vcombine.high %v11180_v31, %v11180_v31  ;;  %v1945_v38 = vrot.slane %v1923_v57, %v8402_v8  ;;  %v11182_v59 = vld [vmem:[#allocation39_spill] sm:$0xff] }
  0xc8   : > { %11179 = vst [vmem:[#allocation30_spill] sm:$0xff] %v9629_v1  ;;  %7950 = vmatprep.mubr.msk.f32.mxu0 %vm8313_vm0, %v11062_v20  ;;  %v4759_v55 = vcombine.low %v9606_v41, %v4744_v5  ;;  %v9640_v46 = vrot.slane %v4760_v42, %v8402_v8  ;;  %v1952_v19 = vrot.slane %v1924_v45, %v8402_v8 }
  0xc9   : > { %7811 = vmatmul.mubr.msk.f32.gmra.mrb[6].mxu1 %vm1497_vm1, %v1920_v18  ;;  %v1922_v43 = vcombine.low %v11181_v28, %v9629_v1  ;;  %v3579_v40 = vcombine.high %v11182_v59, %v11182_v59  ;;  %v4530_v32 = vcombine.high %v11183_v13, %v11183_v13  ;;  %v7601_v33 = vcombine.high %v11174_v37, %v11173_v11  ;;  %v11185_v13 = vld [vmem:[#allocation48_spill] sm:$0xff] }
  0xca   : > { %v4767_v5 = vrot.slane %v4759_v55, %v8402_v8  ;;  %7813 = vmatprep.mubr.msk.f32.mxu1 %vm8313_vm0, %v11062_v20  ;;  %v1954_v42 = vcombine.low %v1945_v38, %v1952_v19  ;;  %v4778_v57 = vcombine.low %v11182_v59, %v3577_v44  ;;  %v723_v45 = vcombine.high %v11178_v63, %v11178_v63  ;;  %v11187_v38 = vld [vmem:[#allocation47_spill] sm:$0xff] }
  0xcb   : > { %v1938_v18 = vrot.slane %v1922_v43, %v8402_v8  ;;  %v9661_v49 = vrot.slane %v4530_v32, %v8402_v8  ;;  %v4779_v36 = vcombine.low %v3579_v40, %v11185_v13  ;;  %v9665_v11 = vrot.slane %v7601_v33, %v8402_v8  ;;  %v11188_v43 = vld [vmem:[#allocation32_spill] sm:$0xff]  ;;  %v11189_v59 = vld [vmem:[#allocation35_spill] sm:$0xff] }
  0xcc   : > { %v4775_v37 = vcombine.low %v4767_v5, %v9640_v46  ;;  %v9669_v55 = vrot.slane %v1954_v42, %v8402_v8  ;;  %v4800_v44 = vrot.slane %v4778_v57, %v8402_v8  ;;  %v725_v63 = vcombine.high %v11187_v38, %v11187_v38  ;;  %v11190_v42 = vld [vmem:[#allocation41_spill] sm:$0xff]  ;;  %v11191_v57 = vld [vmem:[#allocation46_spill] sm:$0xff] }
  0xcd   : > { %11184 = vst [vmem:[#allocation21_spill] sm:$0xff] %v9661_v49  ;;  %v1953_v19 = vcombine.low %v9632_v23, %v1938_v18  ;;  %v4777_v32 = vcombine.low %v11188_v43, %v9661_v49  ;;  %v4807_v40 = vrot.slane %v4779_v36, %v8402_v8  ;;  %v1683_v33 = vcombine.high %v11189_v59, %v11189_v59  ;;  %v11195_v49 = vld [vmem:[#allocation51_spill] sm:$0xff] }
  0xce   : > { %11186 = vst [vmem:[#allocation29_spill] sm:$0xff] %v9669_v55  ;;  %7951 = vmatmul.mubr.msk.f32.gmra.mrb[6].mxu0 %vm1497_vm1, %v4775_v37  ;;  %v1970_v5 = vcombine.low %v11187_v38, %v723_v45  ;;  %v1971_v1 = vcombine.low %v725_v63, %v11190_v42  ;;  %v7524_v53 = vcombine.high %v11192_v27, %v11191_v57 }
  0xcf   : > { %v3578_v18 = vcombine.high %v11185_v13, %v11185_v13  ;;  %v1961_v10 = vrot.slane %v1953_v19, %v8402_v8  ;;  %7953 = vmatprep.mubr.msk.f32.mxu0 %vm8313_vm0, %v11062_v20  ;;  %v4793_v36 = vrot.slane %v4777_v32, %v8402_v8  ;;  %v4809_v59 = vcombine.low %v4800_v44, %v4807_v40 }
  0xd0   : > { %v9692_v37 = vrot.slane %v1683_v33, %v8402_v8  ;;  %v1980_v45 = vrot.slane %v1970_v5, %v8402_v8  ;;  %v1987_v38 = vrot.slane %v1971_v1, %v8402_v8  ;;  %v9697_v63 = vrot.slane %v7524_v53, %v8402_v8  ;;  %v11197_v33 = vld [vmem:[#allocation44_spill] sm:$0xff]  ;;  %v11198_v5 = vld [vmem:[#allocation49_spill] sm:$0xff] }
  0xd1   : > { %v3580_v13 = vcombine.high %v11195_v49, %v11195_v49  ;;  %v1969_v19 = vcombine.low %v1961_v10, %v9669_v55  ;;  %v4808_v42 = vcombine.low %v9665_v11, %v4793_v36  ;;  %v9704_v32 = vrot.slane %v4809_v59, %v8402_v8  ;;  %v11200_v59 = vld [vmem:[#allocation52_spill] sm:$0xff] }
  0xd2   : > { %11193 = vst [vmem:[#allocation23_spill] sm:$0xff] %v9692_v37  ;;  %11194 = vst [vmem:[#allocation45_spill] sm:$0xff] %v9697_v63  ;;  %v1972_v44 = vcombine.low %v9692_v37, %v11191_v57  ;;  %v2002_v40 = vcombine.low %v1980_v45, %v1987_v38  ;;  %v4538_v1 = vcombine.high %v11197_v33, %v11197_v33 }
  0xd3   : > { %11196 = vst [vmem:[#allocation36_spill] sm:$0xff] %v9704_v32  ;;  %v4825_v53 = vcombine.low %v11195_v49, %v3578_v18  ;;  %v4826_v61 = vcombine.low %v3580_v13, %v11198_v5  ;;  %7814 = vmatmul.mubr.msk.f32.gmra.mrb[8].mxu1 %vm1497_vm1, %v1969_v19  ;;  %v4816_v10 = vrot.slane %v4808_v42, %v8402_v8 }
  0xd4   : > { %v1994_v36 = vrot.slane %v1972_v44, %v8402_v8  ;;  %v7602_v35 = vcombine.high %v11200_v59, %v11199_v16  ;;  %v848_v37 = vcombine.high %v9019_v50, %v9019_v50  ;;  %7816 = vmatprep.mubr.msk.f32.mxu1 %vm8313_vm0, %v11062_v20  ;;  %v9722_v45 = vrot.slane %v2002_v40, %v8402_v8  ;;  %v11204_v44 = vld [vmem:[#allocation56_spill] sm:$0xff] }
  0xd5   : > { %v9725_v49 = vrot.slane %v4538_v1, %v8402_v8  ;;  %v4835_v18 = vrot.slane %v4825_v53, %v8402_v8  ;;  %v4842_v42 = vrot.slane %v4826_v61, %v8402_v8  ;;  %v4824_v38 = vcombine.low %v4816_v10, %v9704_v32  ;;  %v11205_v1 = vld [vmem:[#allocation62_spill] sm:$0xff]  ;;  %v11208_v10 = vld [vmem:[#allocation64_spill] sm:$0xff] }
  0xd6   : > { %11201 = vst [vmem:[#allocation25_spill] sm:$0xff] %v9722_v45  ;;  %v2003_v13 = vcombine.low %v1994_v36, %v9697_v63  ;;  %v9732_v19 = vrot.slane %v7602_v35, %v8402_v8  ;;  %v1691_v33 = vcombine.high %v11204_v44, %v11204_v44  ;;  %v2019_v34 = vcombine.low %v11206_v52, %v11205_v1  ;;  %v11209_v44 = vld [vmem:[#allocation72_spill] sm:$0xff] }
  0xd7   : > { %11202 = vst [vmem:[#allocation27_spill] sm:$0xff] %v9725_v49  ;;  %v4827_v40 = vcombine.low %v9725_v49, %v11199_v16  ;;  %v4857_v5 = vcombine.low %v4835_v18, %v4842_v42  ;;  %v7525_v61 = vcombine.high %v11206_v52, %v11205_v1  ;;  %7954 = vmatmul.mubr.msk.f32.gmra.mrb[8].mxu0 %vm1497_vm1, %v4824_v38  ;;  %v11213_v49 = vld [vmem:[#allocation63_spill] sm:$0xff] }
  0xd8   : > { %11203 = vst [vmem:[#allocation48_spill] sm:$0xff] %v9732_v19  ;;  %v2017_v53 = vrot.slane %v2003_v13, %v8402_v8  ;;  %v9745_v35 = vrot.slane %v1691_v33, %v8402_v8  ;;  %v2022_v36 = vcombine.low %v11208_v10, %v848_v37  ;;  %v3703_v9 = vcombine.high %v11209_v44, %v11209_v44  ;;  %v11211_v33 = vld [vmem:[#allocation61_spill] sm:$0xff] }
  0xd9   : > { %7956 = vmatprep.mubr.msk.f32.mxu0 %vm8313_vm0, %v11062_v20  ;;  %v4849_v18 = vrot.slane %v4827_v40, %v8402_v8  ;;  %v9754_v42 = vrot.slane %v4857_v5, %v8402_v8  ;;  %v2029_v52 = vrot.slane %v2019_v34, %v8402_v8  ;;  %v2036_v38 = vrot.slane %v7525_v61, %v8402_v8  ;;  %v11214_v5 = vld [vmem:[#allocation70_spill] sm:$0xff] }
  0xda   : > { %11207 = vst [vmem:[#allocation47_spill] sm:$0xff] %v9745_v35  ;;  %v2018_v13 = vcombine.low %v9722_v45, %v2017_v53  ;;  %v2021_v37 = vcombine.low %v11211_v33, %v9745_v35  ;;  %v9762_v1 = vrot.slane %v2022_v36, %v8402_v8  ;;  %v4546_v32 = vcombine.high %v11213_v49, %v11213_v49  ;;  %v11217_v36 = vld [vmem:[#allocation74_spill] sm:$0xff]  ;;  %v11218_v45 = vld [vmem:[#allocation77_spill] sm:$0xff] }
  0xdb   : > { %11210 = vst [vmem:[#allocation32_spill] sm:$0xff] %v9754_v42  ;;  %v4858_v40 = vcombine.low %v4849_v18, %v9732_v19  ;;  %v2051_v55 = vcombine.low %v2029_v52, %v2036_v38  ;;  %v4874_v15 = vcombine.low %v11215_v60, %v11214_v5  ;;  %v7603_v34 = vcombine.high %v11215_v60, %v11214_v5 }
  0xdc   : > { %11212 = vst [vmem:[#allocation35_spill] sm:$0xff] %v9762_v1  ;;  %7817 = vmatmul.mubr.msk.f32.gmra.mrb[10].mxu1 %vm1497_vm1, %v2018_v13  ;;  %v2043_v61 = vrot.slane %v2021_v37, %v8402_v8  ;;  %v9774_v53 = vrot.slane %v4546_v32, %v8402_v8  ;;  %v4877_v35 = vcombine.low %v11217_v36, %v3703_v9  ;;  %v11220_v13 = vld [vmem:[#allocation68_spill] sm:$0xff] }
  0xdd   : > { %v849_v49 = vcombine.high %v11218_v45, %v11218_v45  ;;  %v4872_v18 = vrot.slane %v4858_v40, %v8402_v8  ;;  %7819 = vmatprep.mubr.msk.f32.mxu1 %vm8313_vm0, %v11062_v20  ;;  %v9783_v52 = vrot.slane %v2051_v55, %v8402_v8  ;;  %v4884_v60 = vrot.slane %v4874_v15, %v8402_v8  ;;  %v11221_v55 = vld [vmem:[#allocation80_spill] sm:$0xff]  ;;  %v11222_v15 = vld [vmem:[#allocation71_spill] sm:$0xff] }
  0xde   : > { %11216 = vst [vmem:[#allocation46_spill] sm:$0xff] %v9774_v53  ;;  %v4891_v38 = vrot.slane %v7603_v34, %v8402_v8  ;;  %v2052_v32 = vcombine.low %v2043_v61, %v9762_v1  ;;  %v4876_v9 = vcombine.low %v11220_v13, %v9774_v53  ;;  %v9791_v37 = vrot.slane %v4877_v35, %v8402_v8 }
  0xdf   : > { %11219 = vst [vmem:[#allocation42_spill] sm:$0xff] %v9783_v52  ;;  %v850_v40 = vcombine.high %v11208_v10, %v11208_v10  ;;  %v4873_v5 = vcombine.low %v9754_v42, %v4872_v18  ;;  %v851_v63 = vcombine.high %v11221_v55, %v11221_v55  ;;  %v1699_v34 = vcombine.high %v11222_v15, %v11222_v15  ;;  %v11244_v42 = vld [vmem:[#allocation99_spill] sm:$0xff] }
  0xe0   : > { %v4906_v19 = vcombine.low %v4884_v60, %v4891_v38  ;;  %v2066_v61 = vrot.slane %v2052_v32, %v8402_v8  ;;  %v4898_v1 = vrot.slane %v4876_v9, %v8402_v8  ;;  %v2069_v35 = vcombine.low %v11221_v55, %v849_v49  ;;  %v11225_v60 = vld [vmem:[#allocation76_spill] sm:$0xff] }
  0xe1   : > { %v2068_v53 = vcombine.low %v850_v40, %v11218_v45  ;;  %7957 = vmatmul.mubr.msk.f32.gmra.mrb[10].mxu0 %vm1497_vm1, %v4873_v5  ;;  %v9809_v18 = vrot.slane %v1699_v34, %v8402_v8  ;;  %v2070_v38 = vcombine.low %v851_v63, %v11225_v60  ;;  %v3704_v15 = vcombine.high %v9155_v17, %v9155_v17 }
  0xe2   : > { %v9806_v10 = vrot.slane %v4906_v19, %v8402_v8  ;;  %v2067_v32 = vcombine.low %v9783_v52, %v2066_v61  ;;  %7959 = vmatprep.mubr.msk.f32.mxu0 %vm8313_vm0, %v11062_v20  ;;  %v4907_v45 = vcombine.low %v4898_v1, %v9791_v37  ;;  %v2085_v19 = vrot.slane %v2069_v35, %v8402_v8 }
  0xe3   : > { %11224 = vst [vmem:[#allocation44_spill] sm:$0xff] %v9809_v18  ;;  %v2078_v49 = vrot.slane %v2068_v53, %v8402_v8  ;;  %v2071_v9 = vcombine.low %v9809_v18, %v9174_v25  ;;  %v9823_v40 = vrot.slane %v2070_v38, %v8402_v8  ;;  %v3705_v63 = vcombine.high %v11217_v36, %v11217_v36  ;;  %v11227_v53 = vld [vmem:[#allocation79_spill] sm:$0xff]  ;;  %v11228_v18 = vld [vmem:[#allocation88_spill] sm:$0xff] }
  0xe4   : > { %11223 = vst [vmem:[#allocation51_spill] sm:$0xff] %v9806_v10  ;;  %v3706_v5 = vcombine.high %v9167_v14, %v9167_v14  ;;  %7820 = vmatmul.mubr.msk.f32.gmra.mrb[12].mxu1 %vm1497_vm1, %v2067_v32  ;;  %v4921_v1 = vrot.slane %v4907_v45, %v8402_v8  ;;  %v4554_v34 = vcombine.high %v11227_v53, %v11227_v53  ;;  %v11235_v53 = vld [vmem:[#allocation93_spill] sm:$0xff] }
  0xe5   : > { %11226 = vst [vmem:[#allocation55_spill] sm:$0xff] %v9823_v40  ;;  %v2100_v55 = vcombine.low %v2078_v49, %v2085_v19  ;;  %v4924_v61 = vcombine.low %v9167_v14, %v3704_v15  ;;  %7822 = vmatprep.mubr.msk.f32.mxu1 %vm8313_vm0, %v11062_v20  ;;  %v2099_v35 = vrot.slane %v2071_v9, %v8402_v8 }
  0xe6   : > { %v4923_v38 = vcombine.low %v3705_v63, %v9155_v17  ;;  %v4925_v60 = vcombine.low %v3706_v5, %v9137_v22  ;;  %v1707_v32 = vcombine.high %v11228_v18, %v11228_v18  ;;  %v4922_v45 = vcombine.low %v9806_v10, %v4921_v1  ;;  %v11233_v18 = vld [vmem:[#allocation94_spill] sm:$0xff]  ;;  %v11234_v1 = vld [vmem:[#allocation81_spill] sm:$0xff] }
  0xe7   : > { %v9843_v49 = vrot.slane %v2100_v55, %v8402_v8  ;;  %v9846_v19 = vrot.slane %v4554_v34, %v8402_v8  ;;  %v4940_v14 = vrot.slane %v4924_v61, %v8402_v8  ;;  %v2101_v15 = vcombine.low %v9823_v40, %v2099_v35  ;;  %v11236_v34 = vld [vmem:[#allocation89_spill] sm:$0xff]  ;;  %v11249_v40 = vld [vmem:[#allocation107_spill] sm:$0xff] }
  0xe8   : > { %v4933_v9 = vrot.slane %v4923_v38, %v8402_v8  ;;  %v9852_v17 = vrot.slane %v4925_v60, %v8402_v8  ;;  %v9855_v63 = vrot.slane %v1707_v32, %v8402_v8  ;;  %7960 = vmatmul.mubr.msk.f32.gmra.mrb[12].mxu0 %vm1497_vm1, %v4922_v45  ;;  %v7526_v55 = vcombine.high %v11234_v1, %v9174_v25  ;;  %v11237_v32 = vld [vmem:[#allocation90_spill] sm:$0xff]  ;;  %v11238_v22 = vld [vmem:[#allocation97_spill] sm:$0xff] }
  0xe9   : > { %11229 = vst [vmem:[#allocation52_spill] sm:$0xff] %v9843_v49  ;;  %11230 = vst [vmem:[#allocation56_spill] sm:$0xff] %v9846_v19  ;;  %v4926_v5 = vcombine.low %v9846_v19, %v11233_v18  ;;  %v2118_v61 = vcombine.low %v11236_v34, %v11235_v53  ;;  %v7527_v35 = vcombine.high %v11236_v34, %v11235_v53  ;;  %7962 = vmatprep.mubr.msk.f32.mxu0 %vm8313_vm0, %v11062_v20 }
  0xea   : > { %11231 = vst [vmem:[#allocation62_spill] sm:$0xff] %v9852_v17  ;;  %11232 = vst [vmem:[#allocation60_spill] sm:$0xff] %v9855_v63  ;;  %v2115_v60 = vrot.slane %v2101_v15, %v8402_v8  ;;  %v4955_v38 = vcombine.low %v4933_v9, %v4940_v14  ;;  %v2120_v45 = vcombine.low %v11237_v32, %v9855_v63 }
  0xeb   : > { %v4562_v19 = vcombine.high %v11238_v22, %v11238_v22  ;;  %v4954_v36 = vrot.slane %v4926_v5, %v8402_v8  ;;  %v2127_v10 = vrot.slane %v7526_v55, %v8402_v8  ;;  %v2134_v52 = vrot.slane %v2118_v61, %v8402_v8  ;;  %v11242_v55 = vld [vmem:[#allocation86_spill] sm:$0xff] }
  0xec   : > { %v9877_v53 = vrot.slane %v7527_v35, %v8402_v8  ;;  %v2116_v15 = vcombine.low %v9843_v49, %v2115_v60  ;;  %v9881_v34 = vrot.slane %v4955_v38, %v8402_v8  ;;  %v2148_v14 = vrot.slane %v2120_v45, %v8402_v8  ;;  %v11243_v61 = vld [vmem:[#allocation102_spill] sm:$0xff]  ;;  %v11245_v45 = vld [vmem:[#allocation101_spill] sm:$0xff] }
  0xed   : > { %v9885_v9 = vrot.slane %v4562_v19, %v8402_v8  ;;  %v4956_v22 = vcombine.low %v9852_v17, %v4954_v36  ;;  %v2149_v5 = vcombine.low %v2127_v10, %v2134_v52  ;;  %v7604_v63 = vcombine.high %v11242_v55, %v11233_v18  ;;  %v11248_v49 = vld [vmem:[#allocation106_spill] sm:$0xff] }
  0xee   : > { %11239 = vst [vmem:[#allocation72_spill] sm:$0xff] %v9877_v53  ;;  %11240 = vst [vmem:[#allocation61_spill] sm:$0xff] %v9881_v34  ;;  %v4973_v35 = vcombine.low %v11244_v42, %v11243_v61  ;;  %7823 = vmatmul.mubr.msk.f32.gmra.mrb[14].mxu1 %vm1497_vm1, %v2116_v15  ;;  %v2150_v60 = vcombine.low %v9877_v53, %v2148_v14  ;;  %v7605_v38 = vcombine.high %v11244_v42, %v11243_v61 }
  0xef   : > { %11241 = vst [vmem:[#allocation63_spill] sm:$0xff] %v9885_v9  ;;  %v4975_v19 = vcombine.low %v11245_v45, %v9885_v9  ;;  %v974_v36 = vcombine.high %v9284_v6, %v9284_v6  ;;  %v4970_v10 = vrot.slane %v4956_v22, %v8402_v8  ;;  %7825 = vmatprep.mubr.msk.f32.mxu1 %vm8313_vm0, %v11062_v20  ;;  %v11250_v45 = vld [vmem:[#allocation109_spill] sm:$0xff] }
  0xf0   : > { %v9904_v52 = vrot.slane %v2149_v5, %v8402_v8  ;;  %v4982_v15 = vrot.slane %v7604_v63, %v8402_v8  ;;  %v4989_v14 = vrot.slane %v4973_v35, %v8402_v8  ;;  %v2164_v42 = vrot.slane %v2150_v60, %v8402_v8 }
  0xf1   : > { %v9910_v61 = vrot.slane %v7605_v38, %v8402_v8  ;;  %v5003_v9 = vrot.slane %v4975_v19, %v8402_v8  ;;  %v975_v22 = vcombine.high %v11248_v49, %v11248_v49  ;;  %v4971_v53 = vcombine.low %v9881_v34, %v4970_v10  ;;  %v11256_v34 = vld [vmem:[#allocation123_spill] sm:$0xff] }
  0xf2   : > { %11246 = vst [vmem:[#allocation70_spill] sm:$0xff] %v9904_v52  ;;  %v5004_v17 = vcombine.low %v4982_v15, %v4989_v14  ;;  %v976_v5 = vcombine.high %v11249_v40, %v11249_v40  ;;  %v977_v63 = vcombine.high %v11250_v45, %v11250_v45  ;;  %v2165_v35 = vcombine.low %v9904_v52, %v2164_v42 }
  0xf3   : > { %11247 = vst [vmem:[#allocation66_spill] sm:$0xff] %v9910_v61  ;;  %v5005_v60 = vcombine.low %v9910_v61, %v5003_v9  ;;  %v2166_v38 = vcombine.low %v11249_v40, %v974_v36  ;;  %v2168_v19 = vcombine.low %v11250_v45, %v975_v22  ;;  %7963 = vmatmul.mubr.msk.f32.gmra.mrb[14].mxu0 %vm1497_vm1, %v4971_v53  ;;  %v11252_v36 = vld [vmem:[#allocation111_spill] sm:$0xff]  ;;  %v11253_v22 = vld [vmem:[#allocation112_spill] sm:$0xff] }
  0xf4   : > { %v9926_v32 = vrot.slane %v5004_v17, %v8402_v8  ;;  %v2167_v10 = vcombine.low %v976_v5, %v11248_v49  ;;  %v2169_v15 = vcombine.low %v977_v63, %v9353_v48  ;;  %v3829_v14 = vcombine.high %v9313_v26, %v9313_v26  ;;  %7826 = vmatmul.mubr.msk.f32.gmra.mrb[16].mxu1 %vm1497_vm1, %v2165_v35  ;;  %v11254_v35 = vld [vmem:[#allocation115_spill] sm:$0xff] }
  0xf5   : > { %7965 = vmatprep.mubr.msk.f32.mxu0 %vm8313_vm0, %v11062_v20  ;;  %v5019_v9 = vrot.slane %v5005_v60, %v8402_v8  ;;  %v2176_v45 = vrot.slane %v2166_v38, %v8402_v8  ;;  %v2190_v53 = vrot.slane %v2168_v19, %v8402_v8  ;;  %7828 = vmatprep.mubr.msk.f32.mxu1 %vm8313_vm0, %v11062_v20  ;;  %v11255_v19 = vld [vmem:[#allocation113_spill] sm:$0xff]  ;;  %v11257_v26 = vld [vmem:[#allocation119_spill] sm:$0xff] }
  0xf6   : > { %11251 = vst [vmem:[#allocation77_spill] sm:$0xff] %v9926_v32  ;;  %v2183_v49 = vrot.slane %v2167_v10, %v8402_v8  ;;  %v2197_v17 = vrot.slane %v2169_v15, %v8402_v8  ;;  %v3830_v42 = vcombine.high %v11252_v36, %v11252_v36  ;;  %v3831_v5 = vcombine.high %v11253_v22, %v11253_v22 }
  0xf7   : > { %v5020_v63 = vcombine.low %v9926_v32, %v5019_v9  ;;  %v3832_v60 = vcombine.high %v11254_v35, %v11254_v35  ;;  %v5021_v38 = vcombine.low %v11253_v22, %v3829_v14  ;;  %v1715_v40 = vcombine.high %v11255_v19, %v11255_v19 }
  0xf8   : > { %v2198_v48 = vcombine.low %v2176_v45, %v2183_v49  ;;  %v2199_v10 = vcombine.low %v2190_v53, %v2197_v17  ;;  %v5022_v15 = vcombine.low %v3831_v5, %v11252_v36  ;;  %v5023_v52 = vcombine.low %v11254_v35, %v3830_v42 }
  0xf9   : > { %7966 = vmatmul.mubr.msk.f32.gmra.mrb[16].mxu0 %vm1497_vm1, %v5020_v63  ;;  %v5024_v61 = vcombine.low %v3832_v60, %v11256_v34  ;;  %v5031_v9 = vrot.slane %v5021_v38, %v8402_v8  ;;  %v9958_v32 = vrot.slane %v1715_v40, %v8402_v8  ;;  %v4570_v14 = vcombine.high %v11257_v26, %v11257_v26 }
  0xfa   : > { %v2206_v19 = vrot.slane %v2198_v48, %v8402_v8  ;;  %v2213_v45 = vrot.slane %v2199_v10, %v8402_v8  ;;  %7968 = vmatprep.mubr.msk.f32.mxu0 %vm8313_vm0, %v11062_v20  ;;  %v5038_v53 = vrot.slane %v5022_v15, %v8402_v8  ;;  %v5045_v49 = vrot.slane %v5023_v52, %v8402_v8 }
  0xfb   : > { %v5052_v17 = vrot.slane %v5024_v61, %v8402_v8  ;;  %v2221_v40 = vrot.slane %v9958_v32, %v8402_v8  ;;  %v9972_v36 = vrot.slane %v4570_v14, %v8402_v8  ;;  %v2466_v42 = vcombine.low %v8443_v29, %v8575_v62 }
  0xfc   : > { %v9974_v26 = vcombine.low %v2206_v19, %v2213_v45  ;;  %v5053_v48 = vcombine.low %v5031_v9, %v5038_v53  ;;  %v5321_v5 = vcombine.low %v8647_v51, %v8667_v21  ;;  %v2483_v29 = vcombine.low %v8709_v30, %v8729_v0 }
  0xfd   : > { %v5054_v63 = vcombine.low %v5045_v49, %v5052_v17  ;;  %v2228_v52 = vrot.slane %v2221_v40, %v8402_v8  ;;  %v5076_v61 = vrot.slane %v9972_v36, %v8402_v8  ;;  %v2473_v60 = vrot.slane %v2466_v42, %v8402_v8  ;;  %v11261_v42 = vld [vmem:[#allocation126_spill] sm:$0xff] }
  0xfe   : > { %7829 = vmatmul.mubr.msk.f32.gmra.mrb[18].mxu1 %vm1497_vm1, %v9974_v26  ;;  %v5061_v35 = vrot.slane %v5053_v48, %v8402_v8  ;;  %v5328_v38 = vrot.slane %v5321_v5, %v8402_v8  ;;  %v5338_v51 = vcombine.low %v11171_v47, %v8760_v4  ;;  %v2500_v21 = vcombine.low %v11181_v28, %v11175_v54  ;;  %v11262_v5 = vld [vmem:[#allocation124_spill] sm:$0xff] }
  0xff   : > { %v5068_v62 = vrot.slane %v5054_v63, %v8402_v8  ;;  %7831 = vmatprep.mubr.msk.f32.mxu1 %vm8313_vm0, %v11062_v20  ;;  %v2474_v10 = vcombine.low %v2473_v60, %v9526_v58  ;;  %v2490_v9 = vrot.slane %v2483_v29, %v8402_v8  ;;  %v5355_v30 = vcombine.low %v11188_v43, %v11180_v31  ;;  %v7554_v43 = vld [vmem:[%s10824_s2 + $0x18] sm:$0xff]  ;;  %v11267_v29 = vld [vmem:[#allocation3_spill] sm:$0xff] }
 0x100   : > { %v5329_v15 = vcombine.low %v5328_v38, %v9549_v2  ;;  %v5345_v14 = vrot.slane %v5338_v51, %v8402_v8  ;;  %v2507_v19 = vrot.slane %v2500_v21, %v8402_v8  ;;  %v2517_v4 = vcombine.low %v11192_v27, %v11191_v57  ;;  %v11266_v38 = vld [vmem:[#allocation2_spill] sm:$0xff]  ;;  %v11269_v21 = vld [vmem:[#allocation4_spill] sm:$0xff] }
 0x101   : > { %v10002_v0 = vcombine.low %v5061_v35, %v5068_v62  ;;  %v5083_v58 = vrot.slane %v5076_v61, %v8402_v8  ;;  %v2481_v2 = vrot.slane %v2474_v10, %v8402_v8  ;;  %v2491_v54 = vcombine.low %v9579_v39, %v2490_v9  ;;  %v11265_v35 = vld [vmem:[#allocation90_spill] sm:$0xff]  ;;  %v11270_v10 = vld [vmem:[#allocation7_spill] sm:$0xff] }
 0x102   : > { %7832 = vmatmul.mubr.msk.f32.gmra.mrb[20].mxu1 %vm1497_vm1, %v2228_v52  ;;  %v5336_v47 = vrot.slane %v5329_v15, %v8402_v8  ;;  %v5346_v31 = vcombine.low %v9606_v41, %v5345_v14  ;;  %v5362_v27 = vrot.slane %v5355_v30, %v8402_v8  ;;  %v2524_v28 = vrot.slane %v2517_v4, %v8402_v8  ;;  %v11273_v4 = vld [vmem:[#allocation110_spill] sm:$0xff] }
 0x103   : > { %7969 = vmatmul.mubr.msk.f32.gmra.mrb[18].mxu0 %vm1497_vm1, %v10002_v0  ;;  %7836 = vmatprep.mubr.msk.f32.mxu1 %vm8313_vm0, %v11062_v20  ;;  %v2498_v57 = vrot.slane %v2491_v54, %v8402_v8  ;;  %v2508_v41 = vcombine.low %v9632_v23, %v2507_v19  ;;  %v5372_v53 = vcombine.low %v11200_v59, %v11199_v16  ;;  %v3260_v54 = vld [vmem:[%s8448_s25 + $0x90] sm:$0xff] }
 0x104   : > { %7971 = vmatprep.mubr.msk.f32.mxu0 %vm8313_vm0, %v11062_v20  ;;  %v5337_v39 = vcombine.low %v5336_v47, %v9584_v24  ;;  %v10028_v45 = vrot.slane %v5346_v31, %v8402_v8  ;;  %v11258_v49 = vcombine.low %v9490_v56, %v9473_v7  ;;  %v2482_v17 = vcombine.low %v2481_v2, %v9556_v3  ;;  %v11259_v56 = vld [vmem:[#allocation45_spill] sm:$0xff]  ;;  %v11275_v31 = vld [vmem:[#allocation36_spill] sm:$0xff] }
 0x105   : > { %v2499_v40 = vcombine.low %v2498_v57, %v9610_v12  ;;  %v2534_v24 = vcombine.low %v11211_v33, %v9019_v50  ;;  %v5389_v48 = vcombine.low %v11220_v13, %v11209_v44  ;;  %v5363_v7 = vcombine.low %v9665_v11, %v5362_v27  ;;  %v7632_v12 = vld [vmem:[%s10824_s2 + $0x38] sm:$0xff]  ;;  %v11260_v33 = vld [vmem:[#allocation48_spill] sm:$0xff] }
 0x106   : > { %7837 = vmatmul.mubr.msk.f32.vlgmr.msra.gmra.mrb[0].mxu1 %vm1497_vm1, %v11258_v49  ;;  %v5354_v16 = vcombine.low %v10028_v45, %v9640_v46  ;;  %v2525_v23 = vcombine.low %v2524_v28, %v11259_v56  ;;  %v5379_v50 = vrot.slane %v5372_v53, %v8402_v8  ;;  %v2551_v11 = vcombine.low %v11234_v1, %v9174_v25  ;;  %v11264_v1 = vld [vmem:[#allocation35_spill] sm:$0xff]  ;;  %v11276_v28 = vld [vmem:[#allocation25_spill] sm:$0xff]  ;;  %v11279_v56 = vld [vmem:[#allocation32_spill] sm:$0xff] }
 0x107   : > { %7972 = vmatmul.mubr.msk.f32.gmra.mrb[20].mxu0 %vm1497_vm1, %v5083_v58  ;;  %7870 = vmatpush3.msra.mxu1 %v7554_v43  ;;  %v2541_v3 = vrot.slane %v2534_v24, %v8402_v8  ;;  %v5396_v46 = vrot.slane %v5389_v48, %v8402_v8  ;;  %v5406_v59 = vcombine.low %v11242_v55, %v11233_v18  ;;  %v405_v55 = vld [vmem:[%s8407_s12 + $0x90] sm:$0xff]  ;;  %v11274_v58 = vld [vmem:[#allocation101_spill] sm:$0xff]  ;;  %v11277_v49 = vld [vmem:[#allocation55_spill] sm:$0xff] }
 0x108   : > { %7976 = vmatprep.mubr.msk.f32.mxu0 %vm8313_vm0, %v11062_v20  ;;  %7839 = vmatprep.mubr.msk.f32.mxu1 %vm8313_vm0, %v11062_v20  ;;  %v2515_v44 = vrot.slane %v2508_v41, %v8402_v8  ;;  %v5380_v13 = vcombine.low %v5379_v50, %v11260_v33  ;;  %v11263_v63 = vcombine.low %v11261_v42, %v11262_v5 }
 0x109   : > { %v5370_v52 = vrot.slane %v5363_v7, %v8402_v8  ;;  %v2532_v25 = vrot.slane %v2525_v23, %v8402_v8  ;;  %v2542_v18 = vcombine.low %v2541_v3, %v11264_v1  ;;  %v5397_v61 = vcombine.low %v5396_v46, %v9791_v37  ;;  %v11272_v37 = vld [vmem:[#allocation29_spill] sm:$0xff] }
 0x10a   : > { %7840 = vmatmul.mubr.msk.f32.gmra.mrb[2].mxu1 %vm1497_vm1, %v2482_v17  ;;  %v2568_v60 = vcombine.low %v11265_v35, %v9284_v6  ;;  %v11268_v62 = vcombine.low %v11266_v38, %v11267_v29  ;;  %v11271_v15 = vcombine.low %v11269_v21, %v11270_v10  ;;  %v2558_v30 = vrot.slane %v2551_v11, %v8402_v8  ;;  %v11283_v21 = vld [vmem:[#allocation8_spill] sm:$0xff] }
 0x10b   : > { %7977 = vmatmul.mubr.msk.f32.vlgmr.msra.gmra.mrb[0].mxu0 %vm1497_vm1, %v11263_v63  ;;  %7842 = vmatprep.mubr.msk.f32.mxu1 %vm8313_vm0, %v11062_v20  ;;  %v5413_v14 = vrot.slane %v5406_v59, %v8402_v8  ;;  %v2516_v6 = vcombine.low %v2515_v44, %v11272_v37  ;;  %v5387_v19 = vrot.slane %v5380_v13, %v8402_v8  ;;  %v11280_v44 = vld [vmem:[#allocation42_spill] sm:$0xff]  ;;  %v11281_v63 = vld [vmem:[#allocation72_spill] sm:$0xff] }
 0x10c   : > { %8010 = vmatpush3.msra.mxu0 %v7632_v12  ;;  %7979 = vmatprep.mubr.msk.f32.mxu0 %vm8313_vm0, %v11062_v20  ;;  %v10084_v51 = vrot.slane %v11268_v62, %v8402_v8  ;;  %v10090_v9 = vrot.slane %v11271_v15, %v8402_v8  ;;  %v5423_v2 = vcombine.low %v11274_v58, %v11273_v4  ;;  %v11282_v62 = vld [vmem:[#allocation6_spill] sm:$0xff] }
 0x10d   : > { %v2384_v47 = vcombine.high %v405_v55, %v405_v55  ;;  %v5371_v27 = vcombine.low %v5370_v52, %v11275_v31  ;;  %v2533_v43 = vcombine.low %v11276_v28, %v2532_v25  ;;  %v2549_v57 = vrot.slane %v2542_v18, %v8402_v8  ;;  %v11290_v31 = vld [vmem:[#allocation66_spill] sm:$0xff] }
 0x10e   : > { %7843 = vmatmul.mubr.msk.f32.gmra.mrb[4].mxu1 %vm1497_vm1, %v2499_v40  ;;  %v10109_v45 = vrot.slane %v5397_v61, %v8402_v8  ;;  %v2575_v41 = vrot.slane %v2568_v60, %v8402_v8  ;;  %v2391_v53 = vrot.slane %v405_v55, %v8402_v8  ;;  %v2559_v17 = vcombine.low %v11277_v49, %v2558_v30  ;;  %v11278_v40 = vld [vmem:[#allocation62_spill] sm:$0xff]  ;;  %v11285_v30 = vld [vmem:[#allocation9_spill] sm:$0xff] }
 0x10f   : > { %7980 = vmatmul.mubr.msk.f32.gmra.mrb[2].mxu0 %vm1497_vm1, %v5337_v39  ;;  %7845 = vmatprep.mubr.msk.f32.mxu1 %vm8313_vm0, %v11062_v20  ;;  %v2398_v39 = vrot.slane %v2384_v47, %v8402_v8  ;;  %v5414_v24 = vcombine.low %v11278_v40, %v5413_v14  ;;  %v5239_v48 = vcombine.high %v3260_v54, %v3260_v54  ;;  %v11286_v14 = vld [vmem:[#allocation13_spill] sm:$0xff] }
 0x110   : > { %7982 = vmatprep.mubr.msk.f32.mxu0 %vm8313_vm0, %v11062_v20  ;;  %v5246_v7 = vrot.slane %v3260_v54, %v8402_v8  ;;  %v5388_v23 = vcombine.low %v11279_v56, %v5387_v19  ;;  %v5430_v50 = vrot.slane %v5423_v2, %v8402_v8  ;;  %v2399_v3 = vcombine.high %v2391_v53, %v2391_v53  ;;  %v11288_v19 = vld [vmem:[#allocation51_spill] sm:$0xff]  ;;  %v11289_v2 = vld [vmem:[#allocation52_spill] sm:$0xff] }
 0x111   : > { %v2400_v12 = vcombine.high %v2398_v39, %v2398_v39  ;;  %v10124_v46 = vrot.slane %v2391_v53, %v8402_v8  ;;  %v10127_v11 = vrot.slane %v2398_v39, %v8402_v8  ;;  %v5253_v59 = vrot.slane %v5239_v48, %v8402_v8 }
 0x112   : > { %7846 = vmatmul.mubr.msk.f32.gmra.mrb[6].mxu1 %vm1497_vm1, %v2516_v6  ;;  %v2550_v33 = vcombine.low %v11280_v44, %v2549_v57  ;;  %v10134_v13 = vrot.slane %v2399_v3, %v8402_v8  ;;  %v5254_v42 = vcombine.high %v5246_v7, %v5246_v7  ;;  %v2566_v5 = vrot.slane %v2559_v17, %v8402_v8  ;;  %v11291_v17 = vld [vmem:[#allocation61_spill] sm:$0xff] }
 0x113   : > { %7983 = vmatmul.mubr.msk.f32.gmra.mrb[4].mxu0 %vm1497_vm1, %v5354_v16  ;;  %7848 = vmatprep.mubr.msk.f32.mxu1 %vm8313_vm0, %v11062_v20  ;;  %v10137_v16 = vrot.slane %v2400_v12, %v8402_v8  ;;  %v2576_v52 = vcombine.low %v11281_v63, %v2575_v41  ;;  %v5255_v25 = vcombine.high %v5253_v59, %v5253_v59 }
 0x114   : > { %7985 = vmatprep.mubr.msk.f32.mxu0 %vm8313_vm0, %v11062_v20  ;;  %v10142_v1 = vrot.slane %v5246_v7, %v8402_v8  ;;  %v2585_v18 = vcombine.low %v10124_v46, %v10134_v13  ;;  %v7541_v55 = vcombine.high %v10124_v46, %v10134_v13  ;;  %v10157_v60 = vrot.slane %v5253_v59, %v8402_v8 }
 0x115   : > { %v2587_v61 = vcombine.low %v10127_v11, %v10137_v16  ;;  %v7542_v35 = vcombine.high %v10127_v11, %v10137_v16  ;;  %v10160_v38 = vrot.slane %v5254_v42, %v8402_v8  ;;  %v10163_v29 = vrot.slane %v5255_v25, %v8402_v8  ;;  %v10219_v42 = vld.sshfl [vmem:[%s8407_s12 + $0x98] sm:$0x11 pattern:$0x75316420] }
 0x116   : > { %7849 = vmatmul.mubr.msk.f32.gmra.mrb[8].mxu1 %vm1497_vm1, %v2533_v43  ;;  %v11284_v10 = vcombine.low %v11282_v62, %v11283_v21  ;;  %v11287_v37 = vcombine.low %v11285_v30, %v11286_v14  ;;  %v5405_v4 = vcombine.low %v11288_v19, %v10109_v45  ;;  %v5421_v58 = vrot.slane %v5414_v24, %v8402_v8  ;;  %v11292_v24 = vld [vmem:[#allocation70_spill] sm:$0xff]  ;;  %v11293_v25 = vld [vmem:[#allocation5_spill] sm:$0xff]  ;;  %v11296_v30 = vld [vmem:[#allocation12_spill] sm:$0xff] }
 0x117   : > { %7986 = vmatmul.mubr.msk.f32.gmra.mrb[6].mxu0 %vm1497_vm1, %v5371_v27  ;;  %7851 = vmatprep.mubr.msk.f32.mxu1 %vm8313_vm0, %v11062_v20  ;;  %v2567_v47 = vcombine.low %v11289_v2, %v2566_v5  ;;  %v2583_v54 = vrot.slane %v2576_v52, %v8402_v8  ;;  %v5431_v27 = vcombine.low %v11290_v31, %v5430_v50  ;;  %v11297_v14 = vld [vmem:[#allocation127_spill] sm:$0xff]  ;;  %v11298_v19 = vld [vmem:[#allocation128_spill] sm:$0xff] }
 0x118   : > { %v10169_v15 = vrot.slane %v11284_v10, %v8402_v8  ;;  %v10175_v6 = vrot.slane %v11287_v37, %v8402_v8  ;;  %7988 = vmatprep.mubr.msk.f32.mxu0 %vm8313_vm0, %v11062_v20  ;;  %v2595_v28 = vrot.slane %v2585_v18, %v8402_v8  ;;  %v2602_v43 = vrot.slane %v7541_v55, %v8402_v8  ;;  %v11294_v18 = vld [vmem:[#allocation125_spill] sm:$0xff] }
 0x119   : > { %v2609_v57 = vrot.slane %v2587_v61, %v8402_v8  ;;  %v2616_v41 = vrot.slane %v7542_v35, %v8402_v8  ;;  %v5440_v45 = vcombine.low %v10142_v1, %v10160_v38  ;;  %v7619_v53 = vcombine.high %v10142_v1, %v10160_v38  ;;  %v11295_v61 = vld [vmem:[#allocation77_spill] sm:$0xff] }
 0x11a   : > { %7852 = vmatmul.mubr.msk.f32.gmra.mrb[10].mxu1 %vm1497_vm1, %v2550_v33  ;;  %v5442_v39 = vcombine.low %v10157_v60, %v10163_v29  ;;  %v7620_v49 = vcombine.high %v10157_v60, %v10163_v29  ;;  %v5422_v40 = vcombine.low %v11291_v17, %v5421_v58  ;;  %v2584_v48 = vcombine.low %v11292_v24, %v2583_v54  ;;  %v10237_v10 = vld.sshfl [vmem:[%s8448_s25 + $0x98] sm:$0x11 pattern:$0x75316420]  ;;  %s7486_s25 = sshll.u32 %s10547_s17, 3 }
 0x11b   : > { %7989 = vmatmul.mubr.msk.f32.gmra.mrb[8].mxu0 %vm1497_vm1, %v5388_v23  ;;  %7854 = vmatprep.mubr.msk.f32.mxu1 %vm8313_vm0, %v11062_v20  ;;  %v5438_v7 = vrot.slane %v5431_v27, %v8402_v8  ;;  %v2825_v56 = vcombine.low %v10084_v51, %v10090_v9  ;;  %v2617_v23 = vcombine.low %v2595_v28, %v2602_v43  ;;  %v11300_v43 = vld [vmem:[#allocation118_spill] sm:$0xff]  ;;  %v11304_v24 = vld [vmem:[#allocation17_spill] sm:$0xff]  ;;  %s10566_s28 = scalar_lea.vmem %s10826_s4, %s7486_s25 }
 0x11c   : > { %7991 = vmatprep.mubr.msk.f32.mxu0 %vm8313_vm0, %v11062_v20  ;;  %v2618_v50 = vcombine.low %v2609_v57, %v2616_v41  ;;  %v5450_v3 = vrot.slane %v5440_v45, %v8402_v8  ;;  %v5680_v12 = vcombine.low %v10169_v15, %v10175_v6  ;;  %v5457_v59 = vrot.slane %v7619_v53, %v8402_v8  ;;  %v11301_v45 = vld [vmem:[#allocation16_spill] sm:$0xff]  ;;  %v11302_v53 = vld [vmem:[#allocation11_spill] sm:$0xff]  ;;  %v11332_v9 = vld [vmem:[#allocation54_spill] sm:$0xff] }
 0x11d   : > { %v5464_v44 = vrot.slane %v5442_v39, %v8402_v8  ;;  %v5471_v33 = vrot.slane %v7620_v49, %v8402_v8  ;;  %v2625_v5 = vrot.slane %v2617_v23, %v8402_v8  ;;  %v2446_v52 = vrot.slane %v10219_v42, %v8402_v8  ;;  %v11345_v15 = vld [vmem:[#allocation82_spill] sm:$0xff] }
 0x11e   : > { %7855 = vmatmul.mubr.msk.f32.gmra.mrb[12].mxu1 %vm1497_vm1, %v2567_v47  ;;  %v2632_v63 = vrot.slane %v2618_v50, %v8402_v8  ;;  %v2826_v55 = vcombine.low %v11294_v18, %v11293_v25  ;;  %v5439_v35 = vcombine.low %v11295_v61, %v5438_v7  ;;  %v5472_v62 = vcombine.low %v5450_v3, %v5457_v59  ;;  %v11305_v50 = vld [vmem:[#allocation10_spill] sm:$0xff]  ;;  %v11306_v59 = vld [vmem:[#allocation31_spill] sm:$0xff] }
 0x11f   : > { %7992 = vmatmul.mubr.msk.f32.gmra.mrb[10].mxu0 %vm1497_vm1, %v5405_v4  ;;  %7857 = vmatprep.mubr.msk.f32.mxu1 %vm8313_vm0, %v11062_v20  ;;  %v5473_v21 = vcombine.low %v5464_v44, %v5471_v33  ;;  %v5681_v37 = vcombine.low %v11297_v14, %v11296_v30  ;;  %v11299_v4 = vld [vmem:[#allocation14_spill] sm:$0xff]  ;;  %v2432_v47 = vcombine.high %v10137_v16, %v10137_v16  ;;  %v11313_v14 = vld [vmem:[#allocation41_spill] sm:$0xff] }
 0x120   : > { %7994 = vmatprep.mubr.msk.f32.mxu0 %vm8313_vm0, %v11062_v20  ;;  %v2851_v58 = vcombine.low %v11299_v4, %v11298_v19  ;;  %v2633_v2 = vcombine.low %v2625_v5, %v2632_v63  ;;  %v2640_v54 = vrot.slane %v2446_v52, %v8402_v8  ;;  %v2833_v31 = vrot.slane %v2826_v55, %v8402_v8  ;;  %v11307_v44 = vld [vmem:[#allocation30_spill] sm:$0xff] }
 0x121   : > { %v5480_v27 = vrot.slane %v5472_v62, %v8402_v8  ;;  %v5487_v28 = vrot.slane %v5473_v21, %v8402_v8  ;;  %v3001_v57 = vcombine.low %v11300_v43, %v9958_v32  ;;  %v5287_v41 = vcombine.high %v10163_v29, %v10163_v29  ;;  %v11308_v55 = vld [vmem:[#allocation22_spill] sm:$0xff]  ;;  %v11310_v62 = vld [vmem:[#allocation33_spill] sm:$0xff]  ;;  %v11311_v21 = vld [vmem:[#allocation24_spill] sm:$0xff] }
 0x122   : > { %7858 = vmatmul.mubr.msk.f32.gmra.mrb[14].mxu1 %vm1497_vm1, %v2584_v48  ;;  %v2835_v39 = vcombine.low %v11302_v53, %v11301_v45  ;;  %v5688_v49 = vrot.slane %v5681_v37, %v8402_v8  ;;  %v2858_v17 = vrot.slane %v2851_v58, %v8402_v8  ;;  %v5856_v7 = vcombine.low %v11256_v34, %v9972_v36  ;;  %v11309_v61 = vld [vmem:[#allocation18_spill] sm:$0xff]  ;;  %v11315_v58 = vld [vmem:[#allocation19_spill] sm:$0xff]  ;;  %v11319_v45 = vld [vmem:[#allocation21_spill] sm:$0xff] }
 0x123   : > { %7995 = vmatmul.mubr.msk.f32.gmra.mrb[12].mxu0 %vm1497_vm1, %v5422_v40  ;;  %7860 = vmatprep.mubr.msk.f32.mxu1 %vm8313_vm0, %v11062_v20  ;;  %v11303_v40 = vld [vmem:[#allocation20_spill] sm:$0xff]  ;;  %v2647_v23 = vrot.slane %v2640_v54, %v8402_v8  ;;  %v2834_v3 = vcombine.low %v2833_v31, %v11305_v50  ;;  %v2876_v33 = vcombine.low %v11307_v44, %v11306_v59  ;;  %v11316_v31 = vld [vmem:[#allocation37_spill] sm:$0xff] }
 0x124   : > { %7997 = vmatprep.mubr.msk.f32.mxu0 %vm8313_vm0, %v11062_v20  ;;  %v5706_v48 = vcombine.low %v11304_v24, %v11303_v40  ;;  %v5488_v5 = vcombine.low %v5480_v27, %v5487_v28  ;;  %v10279_v63 = vcombine.low %v2432_v47, %v2446_v52  ;;  %v2860_v30 = vcombine.low %v11311_v21, %v11310_v62  ;;  %v11314_v52 = vld [vmem:[#allocation15_spill] sm:$0xff]  ;;  %v11317_v27 = vld [vmem:[#allocation28_spill] sm:$0xff]  ;;  %v11327_v21 = vld [vmem:[#allocation74_spill] sm:$0xff] }
 0x125   : > { %v2849_v19 = vrot.slane %v2835_v39, %v8402_v8  ;;  %v5689_v4 = vcombine.low %v5688_v49, %v11314_v52  ;;  %v2842_v54 = vrot.slane %v2834_v3, %v8402_v8  ;;  %v5715_v28 = vcombine.low %v11317_v27, %v11316_v31  ;;  %v11320_v49 = vld [vmem:[#allocation53_spill] sm:$0xff]  ;;  %v11322_v24 = vld [vmem:[#allocation27_spill] sm:$0xff]  ;;  %v11324_v44 = vld [vmem:[#allocation64_spill] sm:$0xff] }
 0x126   : > { %7861 = vmatmul.mubr.msk.f32.gmra.mrb[16].mxu1 %vm1497_vm1, %v9974_v26  ;;  %v5301_v26 = vrot.slane %v10237_v10, %v8402_v8  ;;  %v5713_v47 = vrot.slane %v5706_v48, %v8402_v8  ;;  %v11323_v48 = vld [vmem:[#allocation49_spill] sm:$0xff]  ;;  %v2874_v3 = vrot.slane %v2860_v30, %v8402_v8  ;;  %v5285_v32 = vcombine.high %v10157_v60, %v10157_v60 }
 0x127   : > { %7998 = vmatmul.mubr.msk.f32.gmra.mrb[14].mxu0 %vm1497_vm1, %v5439_v35  ;;  %7863 = vmatprep.mubr.msk.f32.mxu1 %vm8313_vm0, %v11062_v20  ;;  %v5690_v35 = vcombine.low %v11309_v61, %v11308_v55  ;;  %v11326_v61 = vld [vmem:[#allocation26_spill] sm:$0xff]  ;;  %v5729_v30 = vrot.slane %v5715_v28, %v8402_v8  ;;  %v5286_v43 = vcombine.high %v10160_v38, %v10160_v38 }
 0x128   : > { %8000 = vmatprep.mubr.msk.f32.mxu0 %vm8313_vm0, %v11062_v20  ;;  %v5495_v25 = vrot.slane %v5301_v26, %v8402_v8  ;;  %v10284_v18 = vcombine.low %v5287_v41, %v5301_v26  ;;  %v2883_v26 = vrot.slane %v2876_v33, %v8402_v8  ;;  %v11318_v41 = vld [vmem:[#allocation39_spill] sm:$0xff]  ;;  %v5714_v62 = vcombine.low %v5713_v47, %v11326_v61 }
 0x129   : > { %v5731_v53 = vcombine.low %v11319_v45, %v11318_v41  ;;  %v5704_v50 = vrot.slane %v5690_v35, %v8402_v8  ;;  %v11325_v33 = vld [vmem:[#allocation47_spill] sm:$0xff]  ;;  %v2850_v35 = vcombine.low %v2842_v54, %v2849_v19  ;;  %v11333_v19 = vld [vmem:[#allocation65_spill] sm:$0xff]  ;;  %v11334_v54 = vld [vmem:[#allocation50_spill] sm:$0xff]  ;;  %v5882_v34 = vcombine.low %v5286_v43, %v10157_v60 }
 0x12a   : > { %7864 = vmatmul.mubr.msk.f32.gmra.mrb[18].mxu1 %vm1497_vm1, %v2633_v2  ;;  %v2859_v2 = vcombine.low %v2858_v17, %v11315_v58  ;;  %v5502_v39 = vrot.slane %v5495_v25, %v8402_v8  ;;  %v11321_v17 = vld [vmem:[#allocation38_spill] sm:$0xff]  ;;  %v5697_v25 = vrot.slane %v5689_v4, %v8402_v8  ;;  %v11331_v47 = vld [vmem:[#allocation43_spill] sm:$0xff]  ;;  %v2910_v27 = vcombine.low %v11334_v54, %v11333_v19  ;;  %v11336_v41 = vld [vmem:[#allocation76_spill] sm:$0xff] }
 0x12b   : > { %8001 = vmatmul.mubr.msk.f32.gmra.mrb[16].mxu0 %vm1497_vm1, %v10002_v0  ;;  %7866 = vmatprep.mubr.msk.f32.mxu1 %vm8313_vm0, %v11062_v20  ;;  %v11312_v0 = vld [vmem:[#allocation23_spill] sm:$0xff]  ;;  %v2885_v40 = vcombine.low %v11321_v17, %v11320_v49  ;;  %v5738_v58 = vrot.slane %v5731_v53, %v8402_v8  ;;  %v5722_v49 = vrot.slane %v5714_v62, %v8402_v8 }
 0x12c   : > { %8003 = vmatprep.mubr.msk.f32.mxu0 %vm8313_vm0, %v11062_v20  ;;  %v2901_v37 = vcombine.low %v11313_v14, %v11312_v0  ;;  %v2867_v55 = vrot.slane %v2859_v2, %v8402_v8  ;;  %v11328_v0 = vld [vmem:[#allocation46_spill] sm:$0xff]  ;;  %v11330_v2 = vld [vmem:[#allocation57_spill] sm:$0xff]  ;;  %v5705_v53 = vcombine.low %v5697_v25, %v5704_v50  ;;  %v11344_v62 = vld [vmem:[#allocation67_spill] sm:$0xff]  ;;  %v5883_v36 = vcombine.low %v10163_v29, %v5285_v32 }
 0x12d   : > { %v5781_v14 = vcombine.low %v11328_v0, %v11327_v21  ;;  %v2899_v4 = vrot.slane %v2885_v40, %v8402_v8  ;;  %v5740_v31 = vcombine.low %v11331_v47, %v11330_v2  ;;  %v11348_v2 = vld [vmem:[#allocation87_spill] sm:$0xff] }
 0x12e   : > { %7867 = vmatmul.mubr.msk.f32.gmra.mrb[20].mxu1 %vm1497_vm1, %v2647_v23  ;;  %v5756_v23 = vcombine.low %v11323_v48, %v11322_v24  ;;  %v2908_v59 = vrot.slane %v2901_v37, %v8402_v8  ;;  %v11329_v37 = vld [vmem:[#allocation34_spill] sm:$0xff]  ;;  %v11337_v24 = vld [vmem:[#allocation40_spill] sm:$0xff] }
 0x12f   : > { %8004 = vmatmul.mubr.msk.f32.gmra.mrb[18].mxu0 %vm1497_vm1, %v5488_v5  ;;  %7871 = vmatprep.mubr.msk.f32.mxu1 %vm8313_vm0, %v11062_v20  ;;  %v2926_v5 = vcombine.low %v11325_v33, %v11324_v44  ;;  %v2884_v52 = vcombine.low %v11329_v37, %v2883_v26  ;;  %v11335_v26 = vld [vmem:[#allocation44_spill] sm:$0xff]  ;;  %v5788_v17 = vrot.slane %v5781_v14, %v8402_v8  ;;  %v11346_v37 = vld [vmem:[#allocation78_spill] sm:$0xff] }
 0x130   : > { %8006 = vmatprep.mubr.msk.f32.mxu0 %vm8313_vm0, %v11062_v20  ;;  %v5763_v51 = vrot.slane %v5756_v23, %v8402_v8  ;;  %v2951_v45 = vcombine.low %v11336_v41, %v11335_v26  ;;  %v5739_v48 = vcombine.low %v11337_v24, %v5738_v58  ;;  %v11338_v23 = vld [vmem:[#allocation73_spill] sm:$0xff]  ;;  %v11340_v33 = vld [vmem:[#allocation56_spill] sm:$0xff]  ;;  %v5754_v50 = vrot.slane %v5740_v31, %v8402_v8  ;;  %v11349_v31 = vld [vmem:[#allocation107_spill] sm:$0xff] }
 0x131   : > { %v2933_v28 = vrot.slane %v2926_v5, %v8402_v8  ;;  %v2892_v40 = vrot.slane %v2884_v52, %v8402_v8  ;;  %v11341_v5 = vld [vmem:[#allocation83_spill] sm:$0xff]  ;;  %v2924_v14 = vrot.slane %v2910_v27, %v8402_v8  ;;  %v5790_v47 = vcombine.low %v5788_v17, %v11348_v2  ;;  %v11351_v26 = vld [vmem:[#allocation85_spill] sm:$0xff]  ;;  %v11352_v41 = vld [vmem:[#allocation84_spill] sm:$0xff] }
 0x132   : > { %7872 = vmatmul.mubr.msk.f32.vlgmr.msra.gmra.mrb[0].mxu1 %vm1497_vm1, %v2825_v56  ;;  %v2909_v56 = vcombine.low %v11332_v9, %v2908_v59  ;;  %v11339_v59 = vld [vmem:[#allocation59_spill] sm:$0xff]  ;;  %v5806_v61 = vcombine.low %v11341_v5, %v11340_v33 }
 0x133   : > { %8007 = vmatmul.mubr.msk.f32.gmra.mrb[20].mxu0 %vm1497_vm1, %v5502_v39  ;;  %7874 = vmatprep.mubr.msk.f32.mxu1 %vm8313_vm0, %v11062_v20  ;;  %v2875_v39 = vcombine.low %v2867_v55, %v2874_v3  ;;  %v5765_v44 = vcombine.low %v11339_v59, %v11338_v23  ;;  %v11342_v3 = vld [vmem:[#allocation58_spill] sm:$0xff]  ;;  %v11343_v55 = vld [vmem:[#allocation69_spill] sm:$0xff]  ;;  %v2935_v6 = vcombine.low %v2933_v28, %v11345_v15  ;;  %v11347_v52 = vld [vmem:[#allocation75_spill] sm:$0xff] }
 0x134   : > { %8011 = vmatprep.mubr.msk.f32.mxu0 %vm8313_vm0, %v11062_v20  ;;  %v5764_v25 = vcombine.low %v11342_v3, %v5763_v51  ;;  %v2934_v21 = vcombine.low %v11344_v62, %v11343_v55  ;;  %v2917_v0 = vrot.slane %v2909_v56, %v8402_v8  ;;  %v5789_v58 = vcombine.low %v11347_v52, %v11346_v37  ;;  %v11350_v51 = vld [vmem:[#allocation60_spill] sm:$0xff]  ;;  %v11356_v59 = vld [vmem:[#allocation91_spill] sm:$0xff] }
 0x135   : > { %v2976_v9 = vcombine.low %v11350_v51, %v11349_v31  ;;  %v2900_v19 = vcombine.low %v2892_v40, %v2899_v4  ;;  %v5747_v56 = vrot.slane %v5739_v48, %v8402_v8  ;;  %v5779_v54 = vrot.slane %v5765_v44, %v8402_v8  ;;  %v11355_v23 = vld [vmem:[#allocation92_spill] sm:$0xff]  ;;  %v11357_v5 = vld [vmem:[#allocation103_spill] sm:$0xff] }
 0x136   : > { %7875 = vmatmul.mubr.msk.f32.gmra.mrb[2].mxu1 %vm1497_vm1, %v2850_v35  ;;  %v5730_v35 = vcombine.low %v5722_v49, %v5729_v30  ;;  %v5813_v27 = vrot.slane %v5806_v61, %v8402_v8  ;;  %v5772_v30 = vrot.slane %v5764_v25, %v8402_v8  ;;  %v2942_v28 = vrot.slane %v2934_v21, %v8402_v8  ;;  %v11353_v49 = vld [vmem:[#allocation95_spill] sm:$0xff]  ;;  %v11359_v15 = vld [vmem:[#allocation96_spill] sm:$0xff] }
 0x137   : > { %8012 = vmatmul.mubr.msk.f32.vlgmr.msra.gmra.mrb[0].mxu0 %vm1497_vm1, %v5680_v12  ;;  %7877 = vmatprep.mubr.msk.f32.mxu1 %vm8313_vm0, %v11062_v20  ;;  %v2958_v12 = vrot.slane %v2951_v45, %v8402_v8  ;;  %v2959_v45 = vcombine.low %v11352_v41, %v11351_v26  ;;  %v2925_v4 = vcombine.low %v2917_v0, %v2924_v14  ;;  %v11358_v14 = vld [vmem:[#allocation98_spill] sm:$0xff]  ;;  %v11360_v37 = vld [vmem:[#allocation100_spill] sm:$0xff]  ;;  %v11366_v26 = vld [vmem:[#allocation117_spill] sm:$0xff] }
 0x138   : > { %8014 = vmatprep.mubr.msk.f32.mxu0 %vm8313_vm0, %v11062_v20  ;;  %v10393_v24 = vrot.slane %v5789_v58, %v8402_v8  ;;  %v10396_v48 = vrot.slane %v5790_v47, %v8402_v8  ;;  %v5814_v44 = vcombine.low %v11356_v59, %v11355_v23  ;;  %v2983_v33 = vrot.slane %v2976_v9, %v8402_v8 }
 0x139   : > { %v2960_v17 = vcombine.low %v2958_v12, %v11353_v49  ;;  %v5815_v61 = vcombine.low %v5813_v27, %v11357_v5  ;;  %v2429_v3 = vcombine.high %v10124_v46, %v10124_v46  ;;  %v2431_v25 = vcombine.high %v10134_v13, %v10134_v13 }
 0x13a   : > { %7878 = vmatmul.mubr.msk.f32.gmra.mrb[4].mxu1 %vm1497_vm1, %v2875_v39  ;;  %v2949_v39 = vrot.slane %v2935_v6, %v8402_v8  ;;  %v5755_v55 = vcombine.low %v5747_v56, %v5754_v50  ;;  %v5780_v62 = vcombine.low %v5772_v30, %v5779_v54  ;;  %v2967_v21 = vrot.slane %v2959_v45, %v8402_v8  ;;  %v11363_v56 = vld [vmem:[#allocation108_spill] sm:$0xff]  ;;  %v11365_v30 = vld [vmem:[#allocation114_spill] sm:$0xff] }
 0x13b   : > { %8015 = vmatmul.mubr.msk.f32.gmra.mrb[2].mxu0 %vm1497_vm1, %v5705_v53  ;;  %7880 = vmatprep.mubr.msk.f32.mxu1 %vm8313_vm0, %v11062_v20  ;;  %v11354_v53 = vld [vmem:[#allocation63_spill] sm:$0xff]  ;;  %v2974_v46 = vrot.slane %v2960_v17, %v8402_v8  ;;  %v2984_v6 = vcombine.low %v11359_v15, %v11358_v14  ;;  %v5805_v50 = vcombine.low %v10393_v24, %v10396_v48  ;;  %v11368_v48 = vld [vmem:[#allocation120_spill] sm:$0xff] }
 0x13c   : > { %8017 = vmatprep.mubr.msk.f32.mxu0 %vm8313_vm0, %v11062_v20  ;;  %v5831_v40 = vcombine.low %v11354_v53, %v11253_v22  ;;  %v2430_v22 = vcombine.high %v10127_v11, %v10127_v11  ;;  %v2950_v0 = vcombine.low %v2942_v28, %v2949_v39  ;;  %v2985_v52 = vcombine.low %v11360_v37, %v2983_v33  ;;  %v11369_v33 = vld [vmem:[#allocation122_spill] sm:$0xff] }
 0x13d   : > { %v3008_v58 = vrot.slane %v3001_v57, %v8402_v8  ;;  %v5829_v2 = vrot.slane %v5815_v61, %v8402_v8  ;;  %v3026_v47 = vcombine.low %v10134_v13, %v2429_v3  ;;  %v3027_v31 = vcombine.low %v2431_v25, %v10127_v11  ;;  %v11362_v57 = vld [vmem:[#allocation104_spill] sm:$0xff] }
 0x13e   : > { %7881 = vmatmul.mubr.msk.f32.gmra.mrb[6].mxu1 %vm1497_vm1, %v2900_v19  ;;  %v5838_v12 = vrot.slane %v5831_v40, %v8402_v8  ;;  %v3028_v51 = vcombine.low %v10137_v16, %v2430_v22  ;;  %v5284_v9 = vcombine.high %v10142_v1, %v10142_v1  ;;  %v2975_v11 = vcombine.low %v2967_v21, %v2974_v46  ;;  %v11361_v16 = vld [vmem:[#allocation105_spill] sm:$0xff]  ;;  %v11364_v1 = vld [vmem:[#allocation116_spill] sm:$0xff] }
 0x13f   : > { %8018 = vmatmul.mubr.msk.f32.gmra.mrb[4].mxu0 %vm1497_vm1, %v5730_v35  ;;  %7883 = vmatprep.mubr.msk.f32.mxu1 %vm8313_vm0, %v11062_v20  ;;  %v5822_v35 = vrot.slane %v5814_v44, %v8402_v8  ;;  %v2992_v13 = vrot.slane %v2984_v6, %v8402_v8  ;;  %v5839_v19 = vcombine.low %v11362_v57, %v11361_v16 }
 0x140   : > { %8020 = vmatprep.mubr.msk.f32.mxu0 %vm8313_vm0, %v11062_v20  ;;  %v5840_v54 = vcombine.low %v11363_v56, %v5838_v12  ;;  %v2999_v27 = vrot.slane %v2985_v52, %v8402_v8  ;;  %v3009_v28 = vcombine.low %v11365_v30, %v11364_v1  ;;  %v3010_v41 = vcombine.low %v11366_v26, %v3008_v58 }
 0x141   : > { %v5863_v45 = vrot.slane %v5856_v7, %v8402_v8  ;;  %v3043_v39 = vrot.slane %v3027_v31, %v8402_v8  ;;  %v3050_v49 = vrot.slane %v3028_v51, %v8402_v8  ;;  %v3057_v17 = vrot.slane %v10279_v63, %v8402_v8  ;;  %v11367_v63 = vld [vmem:[#allocation121_spill] sm:$0xff] }
 0x142   : > { %7884 = vmatmul.mubr.msk.f32.gmra.mrb[8].mxu1 %vm1497_vm1, %v2925_v4  ;;  %v3036_v4 = vrot.slane %v3026_v47, %v8402_v8  ;;  %v5881_v53 = vcombine.low %v10160_v38, %v5284_v9  ;;  %v5830_v7 = vcombine.low %v5822_v35, %v5829_v2  ;;  %v5847_v40 = vrot.slane %v5839_v19, %v8402_v8  ;;  %v10529_v9 = vld [vmem:[%s10825_s3] ss:$0 sm:$0xff] }
 0x143   : > { %8021 = vmatmul.mubr.msk.f32.gmra.mrb[6].mxu0 %vm1497_vm1, %v5755_v55  ;;  %7886 = vmatprep.mubr.msk.f32.mxu1 %vm8313_vm0, %v11062_v20  ;;  %v5854_v24 = vrot.slane %v5840_v54, %v8402_v8  ;;  %v5864_v23 = vcombine.low %v11368_v48, %v11367_v63  ;;  %v3000_v59 = vcombine.low %v2992_v13, %v2999_v27 }
 0x144   : > { %8023 = vmatprep.mubr.msk.f32.mxu0 %vm8313_vm0, %v11062_v20  ;;  %v3017_v44 = vrot.slane %v3009_v28, %v8402_v8  ;;  %v3024_v38 = vrot.slane %v3010_v41, %v8402_v8  ;;  %v5865_v60 = vcombine.low %v11369_v33, %v5863_v45  ;;  %v3058_v29 = vcombine.low %v3036_v4, %v3043_v39 }
 0x145   : > { %v3059_v5 = vcombine.low %v3050_v49, %v3057_v17  ;;  %v5912_v61 = vrot.slane %v10284_v18, %v8402_v8  ;;  %v2799_v3 = vcombine.high %v10219_v42, %v10219_v42  ;;  %v5891_v22 = vrot.slane %v5881_v53, %v8402_v8 }
 0x146   : > { %7887 = vmatmul.mubr.msk.f32.gmra.mrb[10].mxu1 %vm1497_vm1, %v2950_v0  ;;  %v5898_v25 = vrot.slane %v5882_v34, %v8402_v8  ;;  %v5905_v55 = vrot.slane %v5883_v36, %v8402_v8  ;;  %v5872_v18 = vrot.slane %v5864_v23, %v8402_v8  ;;  %v5879_v21 = vrot.slane %v5865_v60, %v8402_v8 }
 0x147   : > { %8024 = vmatmul.mubr.msk.f32.gmra.mrb[8].mxu0 %vm1497_vm1, %v5780_v62  ;;  %7889 = vmatprep.mubr.msk.f32.mxu1 %vm8313_vm0, %v11062_v20  ;;  %v5855_v62 = vcombine.low %v5847_v40, %v5854_v24  ;;  %v3025_v42 = vcombine.low %v3017_v44, %v3024_v38  ;;  %v3066_v0 = vrot.slane %v3058_v29, %v8402_v8 }
 0x148   : > { %8026 = vmatprep.mubr.msk.f32.mxu0 %vm8313_vm0, %v11062_v20  ;;  %v3073_v46 = vrot.slane %v3059_v5, %v8402_v8  ;;  %v2806_v14 = vrot.slane %v2799_v3, %v8402_v8  ;;  %v5913_v15 = vcombine.low %v5891_v22, %v5898_v25  ;;  %v5914_v6 = vcombine.low %v5905_v55, %v5912_v61 }
 0x149   : > { %v5654_v12 = vcombine.high %v10237_v10, %v10237_v10 }
 0x14a   : > { %7890 = vmatmul.mubr.msk.f32.gmra.mrb[12].mxu1 %vm1497_vm1, %v2975_v11  ;;  %v3074_v35 = vcombine.low %v3066_v0, %v3073_v46  ;;  %v3081_v37 = vrot.slane %v2806_v14, %v8402_v8  ;;  %v5921_v52 = vrot.slane %v5913_v15, %v8402_v8  ;;  %v5928_v58 = vrot.slane %v5914_v6, %v8402_v8 }
 0x14b   : > { %8027 = vmatmul.mubr.msk.f32.gmra.mrb[10].mxu0 %vm1497_vm1, %v5805_v50  ;;  %7892 = vmatprep.mubr.msk.f32.mxu1 %vm8313_vm0, %v11062_v20  ;;  %v5880_v50 = vcombine.low %v5872_v18, %v5879_v21  ;;  %v5661_v10 = vrot.slane %v5654_v12, %v8402_v8 }
 0x14c   : > { %8029 = vmatprep.mubr.msk.f32.mxu0 %vm8313_vm0, %v11062_v20  ;;  %v3088_v2 = vrot.slane %v3081_v37, %v8402_v8  ;;  %v5929_v47 = vcombine.low %v5921_v52, %v5928_v58 }
 0x14d   : > { %v5936_v31 = vrot.slane %v5661_v10, %v8402_v8 }
 0x14e   : > { %7893 = vmatmul.mubr.msk.f32.gmra.mrb[14].mxu1 %vm1497_vm1, %v3000_v59 }
 0x14f   : > { %8030 = vmatmul.mubr.msk.f32.gmra.mrb[12].mxu0 %vm1497_vm1, %v5830_v7  ;;  %7895 = vmatprep.mubr.msk.f32.mxu1 %vm8313_vm0, %v11062_v20  ;;  %v5943_v51 = vrot.slane %v5936_v31, %v8402_v8 }
 0x150   : > { %8032 = vmatprep.mubr.msk.f32.mxu0 %vm8313_vm0, %v11062_v20 }
 0x152   : > { %7896 = vmatmul.mubr.msk.f32.gmra.mrb[16].mxu1 %vm1497_vm1, %v3025_v42 }
 0x153   : > { %8033 = vmatmul.mubr.msk.f32.gmra.mrb[14].mxu0 %vm1497_vm1, %v5855_v62  ;;  %7898 = vmatprep.mubr.msk.f32.mxu1 %vm8313_vm0, %v11062_v20 }
 0x154   : > { %8035 = vmatprep.mubr.msk.f32.mxu0 %vm8313_vm0, %v11062_v20 }
 0x156   : > { %7899 = vmatmul.mubr.msk.f32.gmra.mrb[18].mxu1 %vm1497_vm1, %v3074_v35 }
 0x157   : > { %8036 = vmatmul.mubr.msk.f32.gmra.mrb[16].mxu0 %vm1497_vm1, %v5880_v50  ;;  %7901 = vmatprep.mubr.msk.f32.mxu1 %vm8313_vm0, %v11062_v20 }
 0x158   : > { %8038 = vmatprep.mubr.msk.f32.mxu0 %vm8313_vm0, %v11062_v20 }
 0x15a   : > { %7902 = vmatmul.mubr.msk.f32.gmra.mrb[20].mxu1 %vm1497_vm1, %v3088_v2 }
 0x15b   : > { %8039 = vmatmul.mubr.msk.f32.gmra.mrb[18].mxu0 %vm1497_vm1, %v5929_v47 }
 0x15c   : > { %8041 = vmatprep.mubr.msk.f32.mxu0 %vm8313_vm0, %v11062_v20 }
 0x15f   : > { %8042 = vmatmul.mubr.msk.f32.gmra.mrb[20].mxu0 %vm1497_vm1, %v5943_v51 }
 0x205   : > { %v3177_v32 = vpop.f32.mrb[0].mxu1 }
 0x206   : > { %v7873_v43 = vpop.f32.mrb[1].mxu1  ;;  %v8044_v11 = vadd.f32 %v10529_v9, %v3177_v32 }
 0x209   : > { %v3182_v13 = vpop.f32.mrb[2].mxu1 }
 0x20a   : > { %v6032_v16 = vpop.f32.mrb[0].mxu0  ;;  %v7876_v57 = vpop.f32.mrb[3].mxu1  ;;  %v8046_v56 = vadd.f32 %v10529_v9, %v3182_v13 }
 0x20b   : > { %v8045_v19 = vadd.f32 %v8044_v11, %v6032_v16  ;;  %v8013_v20 = vpop.f32.mrb[1].mxu0 }
 0x20d   : > { %v6108_v54 = vcombine.high %v8045_v19, %v8045_v19  ;;  %v6115_v27 = vrot.slane %v8045_v19, %v8402_v8  ;;  %v7243_v1 = vmul.f32 %v8045_v19, %v8045_v19  ;;  %v3187_v30 = vpop.f32.mrb[4].mxu1  ;;  %v7216_v49 = vsel %vm1497_vm1, %v8045_v19, 0.0 }
 0x20e   : > { %v6037_v28 = vpop.f32.mrb[2].mxu0  ;;  %v7879_v26 = vpop.f32.mrb[5].mxu1  ;;  %v8048_v53 = vadd.f32 %v10529_v9, %v3187_v30 }
 0x20f   : > { %v6122_v41 = vrot.slane %v6108_v54, %v8402_v8  ;;  %v6123_v45 = vcombine.high %v6115_v27, %v6115_v27  ;;  %v8016_v4 = vpop.f32.mrb[3].mxu0  ;;  %v6131_v39 = vrot.slane %v6115_v27, %v8402_v8  ;;  %v8047_v17 = vadd.f32 %v8046_v56, %v6037_v28 }
 0x210   : > { %v7254_v40 = vsel %vm1497_vm1, %v7243_v1, 0.0 }
 0x211   : > { %v6124_v34 = vcombine.high %v6122_v41, %v6122_v41  ;;  %v6138_v36 = vrot.slane %v6122_v41, %v8402_v8  ;;  %v6145_v7 = vrot.slane %v6123_v45, %v8402_v8  ;;  %v3192_v24 = vpop.f32.mrb[6].mxu1  ;;  %v6157_v63 = vcombine.high %v8047_v17, %v8047_v17 }
 0x212   : > { %v6164_v48 = vrot.slane %v8047_v17, %v8402_v8  ;;  %v7217_v23 = vsel %vm1497_vm1, %v8047_v17, 0.0  ;;  %v7244_v59 = vmul.f32 %v8047_v17, %v8047_v17  ;;  %v6042_v44 = vpop.f32.mrb[4].mxu0  ;;  %v7882_v38 = vpop.f32.mrb[7].mxu1  ;;  %v8050_v28 = vadd.f32 %v10529_v9, %v3192_v24 }
 0x213   : > { %v6152_v33 = vrot.slane %v6124_v34, %v8402_v8  ;;  %v6612_v60 = vcombine.low %v6131_v39, %v6145_v7  ;;  %v7644_v29 = vcombine.high %v6131_v39, %v6145_v7  ;;  %v7218_v5 = vadd.f32 %v7217_v23, %v7216_v49  ;;  %v8019_v61 = vpop.f32.mrb[5].mxu0 }
 0x214   : > { %v6171_v3 = vrot.slane %v6157_v63, %v8402_v8  ;;  %v6172_v22 = vcombine.high %v6164_v48, %v6164_v48  ;;  %v6180_v25 = vrot.slane %v6164_v48, %v8402_v8  ;;  %v7255_v55 = vsel %vm1497_vm1, %v7244_v59, 0.0 }
 0x215   : > { %v6614_v62 = vcombine.low %v6138_v36, %v6152_v33  ;;  %v7645_v18 = vcombine.high %v6138_v36, %v6152_v33  ;;  %v6622_v21 = vrot.slane %v6612_v60, %v8402_v8  ;;  %v6629_v42 = vrot.slane %v7644_v29, %v8402_v8  ;;  %v3197_v0 = vpop.f32.mrb[8].mxu1 }
 0x216   : > { %v6173_v46 = vcombine.high %v6171_v3, %v6171_v3  ;;  %v6187_v14 = vrot.slane %v6171_v3, %v8402_v8  ;;  %v6194_v15 = vrot.slane %v6172_v22, %v8402_v8  ;;  %v6202_v6 = vcombine.high %v6180_v25, %v6180_v25  ;;  %v6047_v12 = vpop.f32.mrb[6].mxu0  ;;  %v7885_v50 = vpop.f32.mrb[9].mxu1 }
 0x217   : > { %v6636_v35 = vrot.slane %v6614_v62, %v8402_v8  ;;  %v6643_v37 = vrot.slane %v7645_v18, %v8402_v8  ;;  %v6644_v52 = vcombine.low %v6622_v21, %v6629_v42  ;;  %v6667_v58 = vrot.slane %v6180_v25, %v8402_v8  ;;  %v8022_v10 = vpop.f32.mrb[7].mxu0 }
 0x218   : > { %v6201_v2 = vrot.slane %v6173_v46, %v8402_v8  ;;  %v6203_v47 = vcombine.high %v6187_v14, %v6187_v14  ;;  %v6204_v31 = vcombine.high %v6194_v15, %v6194_v15  ;;  %v6675_v51 = vcombine.low %v6194_v15, %v6202_v6 }
 0x219   : > { %v6645_v32 = vcombine.low %v6636_v35, %v6643_v37  ;;  %v6652_v43 = vrot.slane %v6644_v52, %v8402_v8  ;;  %v6674_v11 = vrot.slane %v6667_v58, %v8402_v8  ;;  %v7256_v13 = vadd.f32 %v7255_v55, %v7254_v40  ;;  %v10571_v16 = vpop.f32.mrb[10].mxu1 }
 0x21a   : > { %v6676_v57 = vcombine.low %v6204_v31, %v6187_v14  ;;  %v6677_v19 = vcombine.low %v6201_v2, %v6203_v47  ;;  %v6685_v20 = vrot.slane %v6675_v51, %v8402_v8  ;;  %v8049_v56 = vadd.f32 %v8048_v53, %v6042_v44  ;;  %v10574_v54 = vpop.f32.mrb[8].mxu0  ;;  %v7888_v27 = vpop.f32.mrb[11].mxu1 }
 0x21b   : > { %v6659_v1 = vrot.slane %v6645_v32, %v8402_v8  ;;  %7199 = vst.msk [vmem:[%s10566_s28 + $0x8] sm:$0x1] %vm7198_vm2, %v6674_v11  ;;  %v6205_v30 = vcombine.high %v6201_v2, %v6201_v2  ;;  %v10581_v26 = vadd.f32 %v10529_v9, %v3197_v0  ;;  %v8025_v41 = vpop.f32.mrb[9].mxu0  ;;  %v8051_v36 = vadd.f32 %v8050_v28, %v6047_v12 }
 0x21c   : > { %v6692_v45 = vrot.slane %v6676_v57, %v8402_v8  ;;  %v6206_v4 = vcombine.high %v8049_v56, %v8049_v56  ;;  %v6213_v39 = vrot.slane %v8049_v56, %v8402_v8  ;;  %v6699_v49 = vrot.slane %v6677_v19, %v8402_v8 }
 0x21d   : > { %v6660_v17 = vcombine.low %v6652_v43, %v6659_v1  ;;  %v7219_v53 = vsel %vm1497_vm1, %v8049_v56, 0.0  ;;  %v7245_v34 = vmul.f32 %v8049_v56, %v8049_v56  ;;  %v10587_v7 = vpop.f32.mrb[12].mxu1  ;;  %v6255_v33 = vcombine.high %v8051_v36, %v8051_v36 }
 0x21e   : > { %v6707_v40 = vcombine.low %v6685_v20, %v6692_v45  ;;  %v6220_v24 = vrot.slane %v6206_v4, %v8402_v8  ;;  %v6221_v63 = vcombine.high %v6213_v39, %v6213_v39  ;;  %v6229_v48 = vrot.slane %v6213_v39, %v8402_v8  ;;  %v10591_v23 = vpop.f32.mrb[10].mxu0  ;;  %v7891_v59 = vpop.f32.mrb[13].mxu1 }
 0x21f   : > { %7197 = vst.msk [vmem:[%s10566_s28] sm:$0xff] %vm1497_vm1, %v6660_v17  ;;  %v7220_v44 = vadd.f32 %v7219_v53, %v7218_v5  ;;  %v7257_v38 = vsel %vm1497_vm1, %v7245_v34, 0.0  ;;  %v6262_v60 = vrot.slane %v8051_v36, %v8402_v8  ;;  %v8028_v29 = vpop.f32.mrb[11].mxu0  ;;  %v6269_v18 = vrot.slane %v6255_v33, %v8402_v8 }
 0x220   : > { %v6715_v61 = vrot.slane %v6707_v40, %v8402_v8  ;;  %v6222_v3 = vcombine.high %v6220_v24, %v6220_v24  ;;  %v6236_v22 = vrot.slane %v6220_v24, %v8402_v8  ;;  %v6243_v25 = vrot.slane %v6221_v63, %v8402_v8 }
 0x221   : > { %v6678_v55 = vcombine.low %v6205_v30, %v6229_v48  ;;  %v7258_v62 = vadd.f32 %v7257_v38, %v7256_v13  ;;  %v6270_v21 = vcombine.high %v6262_v60, %v6262_v60  ;;  %v10601_v42 = vpop.f32.mrb[14].mxu1  ;;  %v6278_v14 = vrot.slane %v6262_v60, %v8402_v8 }
 0x222   : > { %v6250_v5 = vrot.slane %v6222_v3, %v8402_v8  ;;  %v6730_v0 = vrot.slane %v6243_v25, %v8402_v8  ;;  %v7646_v46 = vcombine.high %v6229_v48, %v6243_v25  ;;  %v10606_v15 = vpop.f32.mrb[12].mxu0  ;;  %v7894_v6 = vpop.f32.mrb[15].mxu1  ;;  %v6271_v50 = vcombine.high %v6269_v18, %v6269_v18 }
 0x223   : > { %v6706_v12 = vrot.slane %v6678_v55, %v8402_v8  ;;  %v6285_v35 = vrot.slane %v6269_v18, %v8402_v8  ;;  %v6292_v37 = vrot.slane %v6270_v21, %v8402_v8  ;;  %v8031_v52 = vpop.f32.mrb[13].mxu0  ;;  %v6300_v32 = vcombine.high %v6278_v14, %v6278_v14 }
 0x224   : > { %v6737_v58 = vrot.slane %v6730_v0, %v8402_v8  ;;  %v6739_v10 = vcombine.low %v6236_v22, %v6250_v5  ;;  %v7647_v2 = vcombine.high %v6236_v22, %v6250_v5  ;;  %v6748_v47 = vrot.slane %v7646_v46, %v8402_v8 }
 0x225   : > { %v6708_v31 = vcombine.low %v6699_v49, %v6706_v12  ;;  %v10614_v51 = vrot.slane %v6271_v50, %v8402_v8  ;;  %v6301_v43 = vcombine.high %v6285_v35, %v6285_v35  ;;  %v10616_v11 = vpop.f32.mrb[16].mxu1  ;;  %v6302_v19 = vcombine.high %v6292_v37, %v6292_v37 }
 0x226   : > { %v6755_v13 = vrot.slane %v6739_v10, %v8402_v8  ;;  %v6762_v57 = vrot.slane %v7647_v2, %v8402_v8  ;;  %7201 = vst.msk [vmem:[%s10566_s28 + $0x18] sm:$0x1] %vm7198_vm2, %v6737_v58  ;;  %v6741_v20 = vcombine.low %v6278_v14, %v6292_v37  ;;  %v10622_v56 = vpop.f32.mrb[14].mxu0  ;;  %v7897_v27 = vpop.f32.mrb[17].mxu1  ;;  %v6793_v30 = vrot.slane %v6300_v32, %v8402_v8 }
 0x227   : > { %v6722_v1 = vrot.slane %v6708_v31, %v8402_v8  ;;  %v6802_v28 = vcombine.low %v10614_v51, %v6301_v43  ;;  %v7221_v41 = vsel %vm1497_vm1, %v8051_v36, 0.0  ;;  %v8034_v45 = vpop.f32.mrb[15].mxu0  ;;  %v6801_v49 = vcombine.low %v6302_v19, %v6285_v35 }
 0x228   : > { %v6770_v4 = vcombine.low %v6748_v47, %v6755_v13  ;;  %v6769_v39 = vrot.slane %v6741_v20, %v8402_v8  ;;  %v7222_v17 = vadd.f32 %v7221_v41, %v7220_v44  ;;  %v6800_v34 = vrot.slane %v6793_v30, %v8402_v8 }
 0x229   : > { %v6723_v53 = vcombine.low %v6715_v61, %v6722_v1  ;;  %v6818_v40 = vrot.slane %v6802_v28, %v8402_v8  ;;  %v7246_v24 = vmul.f32 %v8051_v36, %v8051_v36  ;;  %v10631_v63 = vpop.f32.mrb[18].mxu1  ;;  %v6811_v38 = vrot.slane %v6801_v49, %v8402_v8 }
 0x22a   : > { %v6778_v48 = vrot.slane %v6770_v4, %v8402_v8  ;;  %v6771_v59 = vcombine.low %v6762_v57, %v6769_v39  ;;  %v8053_v33 = vadd.f32 %v10581_v26, %v10574_v54  ;;  %v10637_v60 = vpop.f32.mrb[16].mxu0  ;;  %v7900_v29 = vpop.f32.mrb[19].mxu1  ;;  %7203 = vst.msk [vmem:[%s10566_s28 + $0x28] sm:$0x1] %vm7198_vm2, %v6800_v34  ;;  %v6303_v36 = vcombine.high %v10614_v51, %v10614_v51 }
 0x22b   : > { %7200 = vst.msk [vmem:[%s10566_s28 + $0x10] sm:$0xff] %vm1497_vm1, %v6723_v53  ;;  %v7259_v44 = vsel %vm1497_vm1, %v7246_v24, 0.0  ;;  %v8054_v61 = vadd.f32 %v10529_v9, %v10571_v16  ;;  %v10650_v3 = vadd.f32 %v10529_v9, %v10587_v7  ;;  %v8037_v54 = vpop.f32.mrb[17].mxu0  ;;  %v10653_v22 = vcombine.low %v6811_v38, %v6818_v40 }
 0x22c   : > { %v6785_v26 = vrot.slane %v6771_v59, %v8402_v8  ;;  %v7260_v25 = vadd.f32 %v7259_v44, %v7258_v62  ;;  %v6304_v55 = vcombine.high %v8053_v33, %v8053_v33  ;;  %v6311_v18 = vrot.slane %v8053_v33, %v8402_v8 }
 0x22d   : > { %v7223_v21 = vsel %vm1497_vm1, %v8053_v33, 0.0  ;;  %v7247_v5 = vmul.f32 %v8053_v33, %v8053_v33  ;;  %v8055_v0 = vadd.f32 %v8054_v61, %v10591_v23  ;;  %v10658_v16 = vpop.f32.mrb[20].mxu1  ;;  %v6841_v7 = vrot.slane %v10653_v22, %v8402_v8 }
 0x22e   : > { %v6786_v46 = vcombine.low %v6778_v48, %v6785_v26  ;;  %v6318_v14 = vrot.slane %v6304_v55, %v8402_v8  ;;  %v7224_v6 = vadd.f32 %v7223_v21, %v7222_v17  ;;  %v10663_v12 = vpop.f32.mrb[18].mxu0  ;;  %v7903_v62 = vpop.f32.mrb[21].mxu1  ;;  %v6319_v50 = vcombine.high %v6311_v18, %v6311_v18 }
 0x22f   : > { %v6327_v35 = vrot.slane %v6311_v18, %v8402_v8  ;;  %v7261_v37 = vsel %vm1497_vm1, %v7247_v5, 0.0  ;;  %v6353_v52 = vcombine.high %v8055_v0, %v8055_v0  ;;  %v8040_v58 = vpop.f32.mrb[19].mxu0  ;;  %v6360_v47 = vrot.slane %v8055_v0, %v8402_v8 }
 0x230   : > { %7202 = vst.msk [vmem:[%s10566_s28 + $0x20] sm:$0xff] %vm1497_vm1, %v6786_v46  ;;  %v6320_v23 = vcombine.high %v6318_v14, %v6318_v14  ;;  %v6334_v10 = vrot.slane %v6318_v14, %v8402_v8  ;;  %v7262_v2 = vadd.f32 %v7261_v37, %v7260_v25  ;;  %v6341_v31 = vrot.slane %v6319_v50, %v8402_v8 }
 0x231   : > { %v6349_v51 = vcombine.high %v6327_v35, %v6327_v35  ;;  %v6803_v32 = vcombine.low %v6303_v36, %v6327_v35  ;;  %v6367_v43 = vrot.slane %v6353_v52, %v8402_v8  ;;  %v6368_v57 = vcombine.high %v6360_v47, %v6360_v47 }
 0x232   : > { %v6348_v13 = vrot.slane %v6320_v23, %v8402_v8  ;;  %v6376_v19 = vrot.slane %v6360_v47, %v8402_v8  ;;  %v7225_v20 = vsel %vm1497_vm1, %v8055_v0, 0.0  ;;  %v10676_v27 = vpop.f32.mrb[20].mxu0  ;;  %v6351_v1 = vcombine.high %v6341_v31, %v6341_v31 }
 0x233   : > { %v6804_v30 = vcombine.low %v6341_v31, %v6349_v51  ;;  %v6825_v28 = vrot.slane %v6803_v32, %v8402_v8  ;;  %v6369_v41 = vcombine.high %v6367_v43, %v6367_v43  ;;  %v8043_v45 = vpop.f32.mrb[21].mxu0  ;;  %v6383_v49 = vrot.slane %v6367_v43, %v8402_v8 }
 0x234   : > { %v6864_v4 = vcombine.low %v6334_v10, %v6348_v13  ;;  %v7648_v39 = vcombine.high %v6334_v10, %v6348_v13  ;;  %v6390_v17 = vrot.slane %v6368_v57, %v8402_v8  ;;  %v6856_v34 = vrot.slane %v6351_v1, %v8402_v8 }
 0x235   : > { %v6832_v53 = vrot.slane %v6804_v30, %v8402_v8  ;;  %v6397_v40 = vrot.slane %v6369_v41, %v8402_v8  ;;  %v7226_v24 = vadd.f32 %v7225_v20, %v7224_v6  ;;  %v6399_v38 = vcombine.high %v6383_v49, %v6383_v49 }
 0x236   : > { %v6874_v48 = vrot.slane %v6864_v4, %v8402_v8  ;;  %v6881_v59 = vrot.slane %v7648_v39, %v8402_v8  ;;  %v6866_v33 = vcombine.low %v6376_v19, %v6390_v17  ;;  %v6863_v44 = vrot.slane %v6856_v34, %v8402_v8 }
 0x237   : > { %v6834_v29 = vcombine.low %v6825_v28, %v6832_v53  ;;  %v7649_v36 = vcombine.high %v6376_v19, %v6390_v17  ;;  %v6919_v61 = vrot.slane %v6383_v49, %v8402_v8  ;;  %v6927_v22 = vcombine.low %v6397_v40, %v6399_v38 }
 0x238   : > { %v6896_v54 = vcombine.low %v6874_v48, %v6881_v59  ;;  %v6888_v26 = vrot.slane %v6866_v33, %v8402_v8  ;;  %v7248_v25 = vmul.f32 %v8055_v0, %v8055_v0  ;;  %7205 = vst.msk [vmem:[%s10566_s28 + $0x38] sm:$0x1] %vm7198_vm2, %v6863_v44  ;;  %v8057_v5 = vadd.f32 %v10650_v3, %v10606_v15 }
 0x239   : > { %v6848_v55 = vrot.slane %v6834_v29, %v8402_v8  ;;  %v6895_v18 = vrot.slane %v7649_v36, %v8402_v8  ;;  %v6926_v21 = vrot.slane %v6919_v61, %v8402_v8  ;;  %v6401_v6 = vcombine.high %v6397_v40, %v6397_v40 }
 0x23a   : > { %v6904_v46 = vrot.slane %v6896_v54, %v8402_v8  ;;  %v7263_v14 = vsel %vm1497_vm1, %v7248_v25, 0.0  ;;  %v6937_v62 = vrot.slane %v6927_v22, %v8402_v8  ;;  %v6402_v37 = vcombine.high %v8057_v5, %v8057_v5 }
 0x23b   : > { %v6849_v0 = vcombine.low %v6841_v7, %v6848_v55  ;;  %v6897_v50 = vcombine.low %v6888_v26, %v6895_v18  ;;  %7207 = vst.msk [vmem:[%s10566_s28 + $0x48] sm:$0x1] %vm7198_vm2, %v6926_v21  ;;  %v7264_v35 = vadd.f32 %v7263_v14, %v7262_v2  ;;  %v6409_v52 = vrot.slane %v8057_v5, %v8402_v8 }
 0x23c   : > { %v7227_v58 = vsel %vm1497_vm1, %v8057_v5, 0.0  ;;  %v7249_v23 = vmul.f32 %v8057_v5, %v8057_v5  ;;  %v8058_v15 = vadd.f32 %v10529_v9, %v10601_v42  ;;  %v6416_v7 = vrot.slane %v6402_v37, %v8402_v8 }
 0x23d   : > { %7204 = vst.msk [vmem:[%s10566_s28 + $0x30] sm:$0xff] %vm1497_vm1, %v6849_v0  ;;  %v6911_v3 = vrot.slane %v6897_v50, %v8402_v8  ;;  %v7228_v10 = vadd.f32 %v7227_v58, %v7226_v24  ;;  %v8060_v2 = vadd.f32 %v10529_v9, %v10616_v11  ;;  %v6417_v47 = vcombine.high %v6409_v52, %v6409_v52 }
 0x23e   : > { %v6425_v31 = vrot.slane %v6409_v52, %v8402_v8  ;;  %v7265_v51 = vsel %vm1497_vm1, %v7249_v23, 0.0  ;;  %v8059_v32 = vadd.f32 %v8058_v15, %v10622_v56  ;;  %v6418_v42 = vcombine.high %v6416_v7, %v6416_v7 }
 0x23f   : > { %v6912_v43 = vcombine.low %v6904_v46, %v6911_v3  ;;  %v6432_v13 = vrot.slane %v6416_v7, %v8402_v8  ;;  %v7266_v57 = vadd.f32 %v7265_v51, %v7264_v35  ;;  %v6439_v19 = vrot.slane %v6417_v47, %v8402_v8 }
 0x240   : > { %v6447_v20 = vcombine.high %v6425_v31, %v6425_v31  ;;  %v6928_v1 = vcombine.low %v6401_v6, %v6425_v31  ;;  %v6451_v30 = vcombine.high %v8059_v32, %v8059_v32  ;;  %v6446_v11 = vrot.slane %v6418_v42, %v8402_v8 }
 0x241   : > { %7206 = vst.msk [vmem:[%s10566_s28 + $0x40] sm:$0xff] %vm1497_vm1, %v6912_v43  ;;  %v6458_v28 = vrot.slane %v8059_v32, %v8402_v8  ;;  %v7229_v41 = vsel %vm1497_vm1, %v8059_v32, 0.0  ;;  %v7250_v45 = vmul.f32 %v8059_v32, %v8059_v32  ;;  %v6449_v56 = vcombine.high %v6439_v19, %v6439_v19 }
 0x242   : > { %v6929_v4 = vcombine.low %v6439_v19, %v6447_v20  ;;  %v6944_v39 = vrot.slane %v6928_v1, %v8402_v8  ;;  %v6465_v49 = vrot.slane %v6451_v30, %v8402_v8  ;;  %v6982_v17 = vrot.slane %v6446_v11, %v8402_v8 }
 0x243   : > { %v7650_v53 = vcombine.high %v6432_v13, %v6446_v11  ;;  %v6466_v34 = vcombine.high %v6458_v28, %v6458_v28  ;;  %v6474_v40 = vrot.slane %v6458_v28, %v8402_v8  ;;  %v6930_v24 = vcombine.low %v6449_v56, %v6432_v13 }
 0x244   : > { %v6951_v48 = vrot.slane %v6929_v4, %v8402_v8  ;;  %v6959_v59 = vcombine.low %v6937_v62, %v6944_v39  ;;  %v6467_v38 = vcombine.high %v6465_v49, %v6465_v49  ;;  %v6989_v33 = vrot.slane %v6982_v17, %v8402_v8 }
 0x245   : > { %v7000_v29 = vrot.slane %v7650_v53, %v8402_v8  ;;  %v6481_v44 = vrot.slane %v6465_v49, %v8402_v8  ;;  %v6488_v36 = vrot.slane %v6466_v34, %v8402_v8  ;;  %v6958_v61 = vrot.slane %v6930_v24, %v8402_v8 }
 0x246   : > { %v6967_v54 = vrot.slane %v6959_v59, %v8402_v8  ;;  %v6495_v26 = vrot.slane %v6467_v38, %v8402_v8  ;;  %v7230_v22 = vadd.f32 %v7229_v41, %v7228_v10  ;;  %7209 = vst.msk [vmem:[%s10566_s28 + $0x58] sm:$0x1] %vm7198_vm2, %v6989_v33  ;;  %v7267_v21 = vsel %vm1497_vm1, %v7250_v45, 0.0 }
 0x247   : > { %v6497_v25 = vcombine.high %v6481_v44, %v6481_v44  ;;  %v6991_v55 = vcombine.low %v6474_v40, %v6488_v36  ;;  %v7651_v18 = vcombine.high %v6474_v40, %v6488_v36  ;;  %v6960_v5 = vcombine.low %v6951_v48, %v6958_v61 }
 0x248   : > { %v6993_v46 = vcombine.low %v6481_v44, %v6495_v26  ;;  %v7268_v14 = vadd.f32 %v7267_v21, %v7266_v57  ;;  %v8061_v6 = vadd.f32 %v8060_v2, %v10637_v60  ;;  %v6499_v35 = vcombine.high %v6495_v26, %v6495_v26 }
 0x249   : > { %v7007_v62 = vrot.slane %v6991_v55, %v8402_v8  ;;  %v7014_v0 = vrot.slane %v7651_v18, %v8402_v8  ;;  %v7045_v50 = vrot.slane %v6497_v25, %v8402_v8  ;;  %v6974_v37 = vrot.slane %v6960_v5, %v8402_v8 }
 0x24a   : > { %v7021_v52 = vrot.slane %v6993_v46, %v8402_v8  ;;  %v6500_v58 = vcombine.high %v8061_v6, %v8061_v6  ;;  %v6507_v23 = vrot.slane %v8061_v6, %v8402_v8  ;;  %v7231_v60 = vsel %vm1497_vm1, %v8061_v6, 0.0 }
 0x24b   : > { %v7022_v15 = vcombine.low %v7000_v29, %v7007_v62  ;;  %v7052_v3 = vrot.slane %v7045_v50, %v8402_v8  ;;  %v7251_v7 = vmul.f32 %v8061_v6, %v8061_v6  ;;  %v6975_v10 = vcombine.low %v6967_v54, %v6974_v37 }
 0x24c   : > { %v7023_v2 = vcombine.low %v7014_v0, %v7021_v52  ;;  %v6514_v47 = vrot.slane %v6500_v58, %v8402_v8  ;;  %v6515_v31 = vcombine.high %v6507_v23, %v6507_v23  ;;  %v6523_v32 = vrot.slane %v6507_v23, %v8402_v8 }
 0x24d   : > { %v7030_v51 = vrot.slane %v7022_v15, %v8402_v8  ;;  %7211 = vst.msk [vmem:[%s10566_s28 + $0x68] sm:$0x1] %vm7198_vm2, %v7052_v3  ;;  %v7232_v43 = vadd.f32 %v7231_v60, %v7230_v22  ;;  %v7269_v42 = vsel %vm1497_vm1, %v7251_v7, 0.0  ;;  %v8062_v28 = vadd.f32 %v10529_v9, %v10631_v63 }
 0x24e   : > { %7208 = vst.msk [vmem:[%s10566_s28 + $0x50] sm:$0xff] %vm1497_vm1, %v6975_v10  ;;  %v7037_v13 = vrot.slane %v7023_v2, %v8402_v8  ;;  %v6516_v57 = vcombine.high %v6514_v47, %v6514_v47  ;;  %v6530_v19 = vrot.slane %v6514_v47, %v8402_v8  ;;  %v6537_v20 = vrot.slane %v6515_v31, %v8402_v8 }
 0x24f   : > { %v6545_v1 = vcombine.high %v6523_v32, %v6523_v32  ;;  %v7053_v30 = vcombine.low %v6499_v35, %v6523_v32  ;;  %v7270_v11 = vadd.f32 %v7269_v42, %v7268_v14  ;;  %v8063_v17 = vadd.f32 %v8062_v28, %v10663_v12 }
 0x250   : > { %v7038_v41 = vcombine.low %v7030_v51, %v7037_v13  ;;  %v6544_v45 = vrot.slane %v6516_v57, %v8402_v8  ;;  %v6546_v56 = vcombine.high %v6530_v19, %v6530_v19  ;;  %v6547_v4 = vcombine.high %v6537_v20, %v6537_v20 }
 0x251   : > { %v7054_v39 = vcombine.low %v6537_v20, %v6545_v1  ;;  %v7063_v49 = vrot.slane %v7053_v30, %v8402_v8  ;;  %v8064_v24 = vadd.f32 %v10529_v9, %v10658_v16  ;;  %v6549_v48 = vcombine.high %v8063_v17, %v8063_v17 }
 0x252   : > { %7210 = vst.msk [vmem:[%s10566_s28 + $0x60] sm:$0xff] %vm1497_vm1, %v7038_v41  ;;  %v6548_v53 = vcombine.high %v6544_v45, %v6544_v45  ;;  %v7055_v34 = vcombine.low %v6547_v4, %v6530_v19  ;;  %v7056_v40 = vcombine.low %v6544_v45, %v6546_v56  ;;  %v6556_v59 = vrot.slane %v8063_v17, %v8402_v8 }
 0x253   : > { %v7070_v63 = vrot.slane %v7054_v39, %v8402_v8  ;;  %v7233_v38 = vsel %vm1497_vm1, %v8063_v17, 0.0  ;;  %v7252_v44 = vmul.f32 %v8063_v17, %v8063_v17  ;;  %v6563_v61 = vrot.slane %v6549_v48, %v8402_v8 }
 0x254   : > { %v7077_v33 = vrot.slane %v7055_v34, %v8402_v8  ;;  %v7084_v29 = vrot.slane %v7056_v40, %v8402_v8  ;;  %v7108_v12 = vrot.slane %v6548_v53, %v8402_v8  ;;  %v6564_v54 = vcombine.high %v6556_v59, %v6556_v59 }
 0x255   : > { %v7085_v36 = vcombine.low %v7063_v49, %v7070_v63  ;;  %v6572_v9 = vrot.slane %v6556_v59, %v8402_v8  ;;  %v7271_v22 = vsel %vm1497_vm1, %v7252_v44, 0.0  ;;  %v8065_v25 = vadd.f32 %v8064_v24, %v10676_v27 }
 0x256   : > { %v7086_v16 = vcombine.low %v7077_v33, %v7084_v29  ;;  %v7115_v26 = vrot.slane %v7108_v12, %v8402_v8  ;;  %v6565_v18 = vcombine.high %v6563_v61, %v6563_v61  ;;  %v6579_v21 = vrot.slane %v6563_v61, %v8402_v8 }
 0x257   : > { %v7093_v55 = vrot.slane %v7085_v36, %v8402_v8  ;;  %v6586_v5 = vrot.slane %v6564_v54, %v8402_v8  ;;  %v6604_v14 = vrot.slane %v8065_v25, %v8402_v8  ;;  %v7234_v6 = vadd.f32 %v7233_v38, %v7232_v43 }
 0x258   : > { %v7100_v46 = vrot.slane %v7086_v16, %v8402_v8  ;;  %7213 = vst.msk [vmem:[%s10566_s28 + $0x78] sm:$0x1] %vm7198_vm2, %v7115_v26  ;;  %v7235_v62 = vsel %vm7198_vm2, %v8065_v25, 0.0  ;;  %v6593_v0 = vrot.slane %v6565_v18, %v8402_v8  ;;  %v7253_v35 = vmul.f32 %v8065_v25, %v8065_v25 }
 0x259   : > { %v7116_v27 = vcombine.low %v6572_v9, %v6586_v5  ;;  %v7652_v50 = vcombine.high %v6572_v9, %v6586_v5  ;;  %v6611_v52 = vrot.slane %v6604_v14, %v8402_v8  ;;  %v7236_v58 = vadd.f32 %v7235_v62, %v7234_v6 }
 0x25a   : > { %v7101_v37 = vcombine.low %v7093_v55, %v7100_v46  ;;  %v7272_v23 = vadd.f32 %v7271_v22, %v7270_v11  ;;  %v7118_v15 = vcombine.low %v6579_v21, %v6593_v0  ;;  %v7653_v3 = vcombine.high %v6579_v21, %v6593_v0 }
 0x25b   : > { %v7126_v60 = vrot.slane %v7116_v27, %v8402_v8  ;;  %v7133_v7 = vrot.slane %v7652_v50, %v8402_v8  ;;  %v7171_v10 = vrot.slane %v6611_v52, %v8402_v8  ;;  %v7237_v2 = vrot.slane %v7236_v58, 4 }
 0x25c   : > { %7212 = vst.msk [vmem:[%s10566_s28 + $0x70] sm:$0xff] %vm1497_vm1, %v7101_v37  ;;  %v7273_v47 = vsel %vm7198_vm2, %v7253_v35, 0.0  ;;  %v7140_v31 = vrot.slane %v7118_v15, %v8402_v8  ;;  %v7147_v51 = vrot.slane %v7653_v3, %v8402_v8 }
 0x25d   : > { %v7148_v32 = vcombine.low %v7126_v60, %v7133_v7  ;;  %v7274_v43 = vadd.f32 %v7273_v47, %v7272_v23  ;;  %v7178_v42 = vrot.slane %v7171_v10, %v8402_v8  ;;  %v7238_v13 = vadd.f32 %v7237_v2, %v7236_v58 }
 0x25e   : > { %v7149_v57 = vcombine.low %v7140_v31, %v7147_v51 }
 0x25f   : > { %v7275_v19 = vrot.slane %v7274_v43, 4  ;;  %7215 = vst.msk [vmem:[%s10566_s28 + $0x88] sm:$0x1] %vm7198_vm2, %v7178_v42  ;;  %v7239_v20 = vrot.slane %v7238_v13, 2  ;;  %v7156_v1 = vrot.slane %v7148_v32, %v8402_v8 }
 0x260   : > { %v7163_v30 = vrot.slane %v7149_v57, %v8402_v8 }
 0x261   : > { %v7276_v11 = vadd.f32 %v7275_v19, %v7274_v43  ;;  %v7240_v28 = vadd.f32 %v7239_v20, %v7238_v13 }
 0x262   : > { %v7164_v41 = vcombine.low %v7156_v1, %v7163_v30 }
 0x263   : > { %v7277_v45 = vrot.slane %v7276_v11, 2  ;;  %v7241_v56 = vrot.slane %v7240_v28, 1 }
 0x264   : > { %7214 = vst.msk [vmem:[%s10566_s28 + $0x80] sm:$0xff] %vm1497_vm1, %v7164_v41 }
 0x265   : > { %v7278_v4 = vadd.f32 %v7277_v45, %v7276_v11  ;;  %v7242_v49 = vadd.f32 %v7241_v56, %v7240_v28 }
 0x267   : > { %v7279_v39 = vrot.slane %v7278_v4, 1 }
 0x269   : > { %v7280_v17 = vadd.f32 %v7279_v39, %v7278_v4 }
 0x26b   : > { %v7282_v8 = vsel %vm7281_vm3, %v7242_v49, %v7280_v17 }
 0x26c   : > { %v7284_v53 = vsel %vm7283_vm4, %v7282_v8, 0.0 }
 0x26d   : > { %7285 = vst.msk [vmem:[%s378_s8] sm:$0xff] %vm1497_vm1, %v7284_v53 }
 0x26e PF: > { %s16_s22 = sadd.s32 1, %s8310_s22   ;;  %s11370_s18 = smov %s8302_s20 }
 0x26f   : > { %p13_p13 = scmp.ge.s32.totalorder %s16_s22, 20   ;;  %s11371_s19 = smov %s8306_s21 }
 0x270   : > { %s11372_s20 = smov %s11375_s23  ;;  %s11373_s21 = smov %s11379_s24 }
 0x271   :  { %15 = sbr.rel (!%p13_p13) target bundleno = 3 (0x3), region = 88 }

</bundles_post_ra>
